<compile_context>
chip_gen: v5e
topology: v5e:2x2
jax: 0.10.0
libtpu: 0.0.40
codegen_flags: <defaults>
</compile_context>

<pallas_src>
import functools
import math

import numpy as np
import jax
import jax.numpy as jnp
from jax import lax
from jax.experimental import pallas as pl
from jax.experimental.pallas import tpu as pltpu

# --- small, module-consistent hyper-parameters -------------------------------
HID = 32          # hid_dim (scaled down from 256)
N_HEADS = 4       # n_heads (scaled down from 8)
DEPTH = HID // N_HEADS
PF = 64           # pf_dim (scaled down from 1024)
N_LAYERS = 2      # n_layers
N_ENC_VOCAB = 50
N_DEC_VOCAB = 60
SEQ = 8           # ENCODER_LEN == DECODER_LEN (scaled down from 40)
PE_LEN = 64       # pe_source == pe_target (scaled down from 512)
LN_EPS = 1e-5     # nn.LayerNorm default


def _vmem_spec():
    return pl.BlockSpec(memory_space=pltpu.MemorySpace.VMEM)


# ----------------------------- in-kernel helpers ------------------------------
def _mm(a, b):
    """MXU matmul: bf16 operands, f32 accumulation."""
    return jnp.dot(a.astype(jnp.bfloat16), b.astype(jnp.bfloat16),
                   preferred_element_type=jnp.float32)


def _qkT(q, k):
    """q @ k.T via dot_general (contract last dims, no explicit transpose)."""
    return lax.dot_general(q.astype(jnp.bfloat16), k.astype(jnp.bfloat16),
                           (((1,), (1,)), ((), ())),
                           preferred_element_type=jnp.float32)


def _add_ln(x, y, g, b):
    """LayerNorm(x + y) in f32; rsqrt goes to the EUP slot."""
    z = x + y
    mean = jnp.mean(z, axis=-1, keepdims=True)
    var = jnp.mean((z - mean) ** 2, axis=-1, keepdims=True)
    return (z - mean) * lax.rsqrt(var + LN_EPS) * g + b


def _mha_into_ctx(q, k, v, mask_for_batch, ctx_ref, batch, sq, sk):
    """Multi-head scaled-dot attention; writes the merged (B*Sq, HID) context
    into ctx_ref.  q: (B*Sq, HID), k/v: (B*Sk, HID).  mask_for_batch(b) returns
    the additive-mask pattern ((1,Sk) or (Sq,Sk), 1.0 = masked) for batch b."""
    inv_sqrt_d = 1.0 / math.sqrt(DEPTH)
    for b in range(batch):
        qb = q[b * sq:(b + 1) * sq, :]
        kb = k[b * sk:(b + 1) * sk, :]
        vb = v[b * sk:(b + 1) * sk, :]
        neg = mask_for_batch(b) * (-1e9)          # hoisted out of the head loop
        for h in range(N_HEADS):
            lo, hi = h * DEPTH, (h + 1) * DEPTH
            s = _qkT(qb[:, lo:hi], kb[:, lo:hi]) * inv_sqrt_d + neg
            s = s - jnp.max(s, axis=-1, keepdims=True)
            p = jnp.exp(s)
            p = p * pl.reciprocal(jnp.sum(p, axis=-1, keepdims=True), approx=True)
            ctx_ref[b * sq:(b + 1) * sq, lo:hi] = _mm(p, vb[:, lo:hi])


# ----------------------------- fused layer kernels ----------------------------
def _encoder_layer_kernel(x_ref, pad_ref,
                          wqkv_ref, bqkv_ref, wo_ref, bo_ref,
                          g1_ref, b1_ref,
                          wf1_ref, bf1_ref, wf2_ref, bf2_ref,
                          g2_ref, b2_ref,
                          o_ref, ctx_ref, *, batch, seq):
    x = x_ref[...]                                            # (B*S, HID)
    qkv = _mm(x, wqkv_ref[...]) + bqkv_ref[...]               # fused Q/K/V projection
    q = qkv[:, :HID]
    k = qkv[:, HID:2 * HID]
    v = qkv[:, 2 * HID:]

    pad = pad_ref[...]                                        # (B, S), 1.0 = pad token

    def mask_for_batch(b):
        return pad[b:b + 1, :]                                # broadcasts over query rows

    _mha_into_ctx(q, k, v, mask_for_batch, ctx_ref, batch, seq, seq)

    attn = _mm(ctx_ref[...], wo_ref[...]) + bo_ref[...]       # out-projection
    h1 = _add_ln(x, attn, g1_ref[...], b1_ref[...])           # dropout = identity

    f = jnp.maximum(_mm(h1, wf1_ref[...]) + bf1_ref[...], 0.0)
    f = _mm(f, wf2_ref[...]) + bf2_ref[...]
    o_ref[...] = _add_ln(h1, f, g2_ref[...], b2_ref[...])


def _decoder_layer_kernel(x_ref, enc_ref, pad_dec_ref, pad_enc_ref,
                          wqkv1_ref, bqkv1_ref, wo1_ref, bo1_ref, g1_ref, b1_ref,
                          wq2_ref, bq2_ref, wkv2_ref, bkv2_ref, wo2_ref, bo2_ref,
                          g2_ref, b2_ref,
                          wf1_ref, bf1_ref, wf2_ref, bf2_ref, g3_ref, b3_ref,
                          o_ref, ctx_ref, *, batch, seq_q, seq_k):
    x = x_ref[...]                                            # (B*Sd, HID)
    enc = enc_ref[...]                                        # (B*Se, HID)

    # --- masked self-attention (look-ahead built in-kernel, max'ed with target padding)
    qkv = _mm(x, wqkv1_ref[...]) + bqkv1_ref[...]
    q = qkv[:, :HID]
    k = qkv[:, HID:2 * HID]
    v = qkv[:, 2 * HID:]

    row = lax.broadcasted_iota(jnp.int32, (seq_q, seq_q), 0)
    col = lax.broadcasted_iota(jnp.int32, (seq_q, seq_q), 1)
    look_ahead = (col > row).astype(jnp.float32)
    pad_d = pad_dec_ref[...]                                  # (B, Sd)

    def self_mask(b):
        return jnp.maximum(pad_d[b:b + 1, :], look_ahead)     # (Sd, Sd)

    _mha_into_ctx(q, k, v, self_mask, ctx_ref, batch, seq_q, seq_q)
    a1 = _mm(ctx_ref[...], wo1_ref[...]) + bo1_ref[...]
    h1 = _add_ln(x, a1, g1_ref[...], b1_ref[...])

    # --- cross-attention over encoder output (encoder padding mask)
    q2 = _mm(h1, wq2_ref[...]) + bq2_ref[...]
    kv2 = _mm(enc, wkv2_ref[...]) + bkv2_ref[...]
    k2 = kv2[:, :HID]
    v2 = kv2[:, HID:]
    pad_e = pad_enc_ref[...]                                  # (B, Se)

    def cross_mask(b):
        return pad_e[b:b + 1, :]

    _mha_into_ctx(q2, k2, v2, cross_mask, ctx_ref, batch, seq_q, seq_k)
    a2 = _mm(ctx_ref[...], wo2_ref[...]) + bo2_ref[...]
    h2 = _add_ln(h1, a2, g2_ref[...], b2_ref[...])

    # --- position-wise FFN
    f = jnp.maximum(_mm(h2, wf1_ref[...]) + bf1_ref[...], 0.0)
    f = _mm(f, wf2_ref[...]) + bf2_ref[...]
    o_ref[...] = _add_ln(h2, f, g3_ref[...], b3_ref[...])


def _final_linear_kernel(x_ref, w_ref, b_ref, o_ref):
    o_ref[...] = _mm(x_ref[...], w_ref[...]) + b_ref[...]


# ----------------------------- pallas_call wrappers ---------------------------
def encoder_layer_call(p, x, pad_enc, batch, seq):
    bs = batch * seq
    kernel = functools.partial(_encoder_layer_kernel, batch=batch, seq=seq)
    return pl.pallas_call(
        kernel,
        out_shape=jax.ShapeDtypeStruct((bs, HID), jnp.float32),
        in_specs=[_vmem_spec() for _ in range(14)],
        out_specs=_vmem_spec(),
        scratch_shapes=[pltpu.VMEM((bs, HID), jnp.float32)],
    )(x, pad_enc,
      p["wqkv"], p["bqkv"], p["wo"], p["bo"],
      p["g1"], p["b1"],
      p["wf1"], p["bf1"], p["wf2"], p["bf2"],
      p["g2"], p["b2"])


def decoder_layer_call(p, x, enc_out, pad_dec, pad_enc, batch, seq_q, seq_k):
    bs = batch * seq_q
    kernel = functools.partial(_decoder_layer_kernel,
                               batch=batch, seq_q=seq_q, seq_k=seq_k)
    return pl.pallas_call(
        kernel,
        out_shape=jax.ShapeDtypeStruct((bs, HID), jnp.float32),
        in_specs=[_vmem_spec() for _ in range(24)],
        out_specs=_vmem_spec(),
        scratch_shapes=[pltpu.VMEM((bs, HID), jnp.float32)],
    )(x, enc_out, pad_dec, pad_enc,
      p["wqkv1"], p["bqkv1"], p["wo1"], p["bo1"], p["g1"], p["b1"],
      p["wq2"], p["bq2"], p["wkv2"], p["bkv2"], p["wo2"], p["bo2"],
      p["g2"], p["b2"],
      p["wf1"], p["bf1"], p["wf2"], p["bf2"], p["g3"], p["b3"])


def final_linear_call(x2d, p):
    m = x2d.shape[0]
    return pl.pallas_call(
        _final_linear_kernel,
        out_shape=jax.ShapeDtypeStruct((m, N_DEC_VOCAB), jnp.float32),
        in_specs=[_vmem_spec() for _ in range(3)],
        out_specs=_vmem_spec(),
    )(x2d, p["w"], p["b"])


# ----------------------------- full forward (jitted) --------------------------
@jax.jit
def transformer_forward(params, enc_inputs, dec_inputs):
    B, S_enc = enc_inputs.shape
    S_dec = dec_inputs.shape[1]

    # padding rows only; dense additive masks are built inside the fused kernels
    pad_enc = (enc_inputs == 0).astype(jnp.float32)            # (B, S_enc)
    pad_dec = (dec_inputs == 0).astype(jnp.float32)            # (B, S_dec) — target padding,
    #   combined with the look-ahead mask in-kernel; cross-attn uses pad_enc (from enc_inputs),
    #   exactly as create_padding_mask(enc_inputs) in the reference.

    scale = math.sqrt(HID)

    # --- Encoder (sqrt scaling applied twice, as in the reference code) -------
    emb = params["enc_emb"][enc_inputs] * scale
    emb = scale * emb + params["pe_src"][None, :S_enc]
    out = emb.reshape(B * S_enc, HID)                          # dropout = identity
    for _ in range(N_LAYERS):                                  # shared layer params (quirk)
        out = encoder_layer_call(params["enc_layer"], out, pad_enc, B, S_enc)
    enc_output = out                                           # (B*S_enc, HID)

    # --- Decoder ---------------------------------------------------------------
    demb = params["dec_emb"][dec_inputs] * scale
    demb = scale * demb + params["pe_tgt"][None, :S_dec]
    dout = demb.reshape(B * S_dec, HID)
    for _ in range(N_LAYERS):
        dout = decoder_layer_call(params["dec_layer"], dout, enc_output,
                                  pad_dec, pad_enc, B, S_dec, S_enc)

    logits = final_linear_call(dout, params["fin"])
    return logits.reshape(B, S_dec, N_DEC_VOCAB)               # LogSoftmax not applied in forward


# ----------------------------- parameter init ---------------------------------
def sinusoid_table(position, hid):
    # reproduces get_sinusoid_encoding_table exactly (raw channel index in exponent)
    pe = np.zeros((position, hid), dtype=np.float32)
    for pos in range(position):
        for i in range(0, hid, 2):
            pe[pos, i] = math.sin(pos / 10000 ** (2 * i / hid))
            pe[pos, i + 1] = math.cos(pos / 10000 ** (2 * i / hid))
    return jnp.asarray(pe)


def init_params(key):
    keys = iter(jax.random.split(key, 64))

    def w(shape):
        return (0.05 * jax.random.normal(next(keys), shape)).astype(jnp.float32)

    def dense(din, dout):
        return w((din, dout)), w((dout,))

    def fused_qkv():
        wq, bq = dense(HID, HID)
        wk, bk = dense(HID, HID)
        wv, bv = dense(HID, HID)
        return (jnp.concatenate([wq, wk, wv], axis=1),
                jnp.concatenate([bq, bk, bv]).reshape(1, 3 * HID))

    def fused_kv():
        wk, bk = dense(HID, HID)
        wv, bv = dense(HID, HID)
        return (jnp.concatenate([wk, wv], axis=1),
                jnp.concatenate([bk, bv]).reshape(1, 2 * HID))

    def ln():
        return jnp.ones((1, HID), jnp.float32), jnp.zeros((1, HID), jnp.float32)

    # --- encoder layer (single shared instance, as in reference) --------------
    wqkv, bqkv = fused_qkv()
    wo, bo = dense(HID, HID)
    eg1, eb1 = ln()
    eg2, eb2 = ln()
    ewf1, ebf1 = dense(HID, PF)
    ewf2, ebf2 = dense(PF, HID)
    enc_layer = dict(wqkv=wqkv, bqkv=bqkv, wo=wo, bo=bo.reshape(1, HID),
                     g1=eg1, b1=eb1,
                     wf1=ewf1, bf1=ebf1.reshape(1, PF),
                     wf2=ewf2, bf2=ebf2.reshape(1, HID),
                     g2=eg2, b2=eb2)

    # --- decoder layer (single shared instance) --------------------------------
    wqkv1, bqkv1 = fused_qkv()
    wo1, bo1 = dense(HID, HID)
    wq2, bq2 = dense(HID, HID)
    wkv2, bkv2 = fused_kv()
    wo2, bo2 = dense(HID, HID)
    dg1, db1 = ln()
    dg2, db2 = ln()
    dg3, db3 = ln()
    dwf1, dbf1 = dense(HID, PF)
    dwf2, dbf2 = dense(PF, HID)
    dec_layer = dict(wqkv1=wqkv1, bqkv1=bqkv1, wo1=wo1, bo1=bo1.reshape(1, HID),
                     g1=dg1, b1=db1,
                     wq2=wq2, bq2=bq2.reshape(1, HID),
                     wkv2=wkv2, bkv2=bkv2,
                     wo2=wo2, bo2=bo2.reshape(1, HID),
                     g2=dg2, b2=db2,
                     wf1=dwf1, bf1=dbf1.reshape(1, PF),
                     wf2=dwf2, bf2=dbf2.reshape(1, HID),
                     g3=dg3, b3=db3)

    fw, fb = dense(HID, N_DEC_VOCAB)

    return {
        "enc_emb": w((N_ENC_VOCAB, HID)),
        "dec_emb": w((N_DEC_VOCAB, HID)),
        "pe_src": sinusoid_table(PE_LEN, HID),
        "pe_tgt": sinusoid_table(PE_LEN, HID),
        "enc_layer": enc_layer,
        "dec_layer": dec_layer,
        "fin": {"w": fw, "b": fb.reshape(1, N_DEC_VOCAB)},
    }


# ----------------------------- main --------------------------------------------
if __name__ == "__main__":
    key = jax.random.PRNGKey(0)
    k_enc, k_dec, k_par = jax.random.split(key, 3)

    enc_inputs = jax.random.randint(k_enc, (2, SEQ), 0, N_ENC_VOCAB, dtype=jnp.int32)
    dec_inputs = jax.random.randint(k_dec, (2, SEQ), 0, N_DEC_VOCAB, dtype=jnp.int32)
    # force a couple of pad tokens so padding masks are exercised
    enc_inputs = enc_inputs.at[0, -2:].set(0)
    dec_inputs = dec_inputs.at[1, -1:].set(0)

    params = init_params(k_par)
    out = transformer_forward(params, enc_inputs, dec_inputs)
    jax.block_until_ready(out)
    assert out.shape == (2, SEQ, N_DEC_VOCAB) and out.dtype == jnp.float32
    print("KERNEL_OK")
</pallas_src>

<mosaic_0001>
module attributes {stable_mosaic.version = 11 : i64} {
  func.func @_final_linear_kernel(%arg0: memref<16x32xf32, #tpu.memory_space<vmem>>, %arg1: memref<32x60xf32, #tpu.memory_space<vmem>>, %arg2: memref<1x60xf32, #tpu.memory_space<vmem>>, %arg3: memref<16x60xf32, #tpu.memory_space<vmem>>) attributes {dimension_semantics = [], scalar_prefetch = 0 : i64, scratch_operands = 0 : i64, tpu.core_type = #tpu.core_type<tc>} {
    %c0 = arith.constant 0 : index
    %c0_0 = arith.constant 0 : index
    %0 = vector.load %arg0[%c0, %c0_0] : memref<16x32xf32, #tpu.memory_space<vmem>>, vector<16x32xf32>
    %c0_1 = arith.constant 0 : index
    %c0_2 = arith.constant 0 : index
    %1 = vector.load %arg1[%c0_1, %c0_2] : memref<32x60xf32, #tpu.memory_space<vmem>>, vector<32x60xf32>
    %2 = arith.truncf %0 : vector<16x32xf32> to vector<16x32xbf16>
    %3 = arith.truncf %1 : vector<32x60xf32> to vector<32x60xbf16>
    %cst = arith.constant dense<0.000000e+00> : vector<16x60xf32>
    %4 = tpu.matmul %2, %3, %cst {dimension_numbers = #tpu.dot_dimension_numbers<[1], [0], [0], [1], [0, 0, 1, 1], [], []>} : vector<16x32xbf16>, vector<32x60xbf16>, vector<16x60xf32> -> vector<16x60xf32>
    %c0_3 = arith.constant 0 : index
    %c0_4 = arith.constant 0 : index
    %5 = vector.load %arg2[%c0_3, %c0_4] : memref<1x60xf32, #tpu.memory_space<vmem>>, vector<1x60xf32>
    %6 = vector.broadcast %5 : vector<1x60xf32> to vector<16x60xf32>
    %7 = arith.addf %4, %6 : vector<16x60xf32>
    %c0_5 = arith.constant 0 : index
    %c0_6 = arith.constant 0 : index
    %8 = vector.load %arg3[%c0_5, %c0_6] : memref<16x60xf32, #tpu.memory_space<vmem>>, vector<16x60xf32>
    tpu.vector_store %arg3[%c0_5, %c0_6], %7 {strides = array<i32>} : memref<16x60xf32, #tpu.memory_space<vmem>>, vector<16x60xf32>,
    return
  }
}

module attributes {stable_mosaic.version = 11 : i64} {
  func.func @_encoder_layer_kernel(%arg0: memref<16x32xf32, #tpu.memory_space<vmem>>, %arg1: memref<2x8xf32, #tpu.memory_space<vmem>>, %arg2: memref<32x96xf32, #tpu.memory_space<vmem>>, %arg3: memref<1x96xf32, #tpu.memory_space<vmem>>, %arg4: memref<32x32xf32, #tpu.memory_space<vmem>>, %arg5: memref<1x32xf32, #tpu.memory_space<vmem>>, %arg6: memref<1x32xf32, #tpu.memory_space<vmem>>, %arg7: memref<1x32xf32, #tpu.memory_space<vmem>>, %arg8: memref<32x64xf32, #tpu.memory_space<vmem>>, %arg9: memref<1x64xf32, #tpu.memory_space<vmem>>, %arg10: memref<64x32xf32, #tpu.memory_space<vmem>>, %arg11: memref<1x32xf32, #tpu.memory_space<vmem>>, %arg12: memref<1x32xf32, #tpu.memory_space<vmem>>, %arg13: memref<1x32xf32, #tpu.memory_space<vmem>>, %arg14: memref<16x32xf32, #tpu.memory_space<vmem>>, %arg15: memref<16x32xf32, #tpu.memory_space<vmem>>) attributes {dimension_semantics = [], scalar_prefetch = 0 : i64, scratch_operands = 1 : i64, tpu.core_type = #tpu.core_type<tc>} {
    %c0 = arith.constant 0 : index
    %c0_0 = arith.constant 0 : index
    %0 = vector.load %arg0[%c0, %c0_0] : memref<16x32xf32, #tpu.memory_space<vmem>>, vector<16x32xf32>
    %c0_1 = arith.constant 0 : index
    %c0_2 = arith.constant 0 : index
    %1 = vector.load %arg2[%c0_1, %c0_2] : memref<32x96xf32, #tpu.memory_space<vmem>>, vector<32x96xf32>
    %2 = arith.truncf %0 : vector<16x32xf32> to vector<16x32xbf16>
    %3 = arith.truncf %1 : vector<32x96xf32> to vector<32x96xbf16>
    %cst = arith.constant dense<0.000000e+00> : vector<16x96xf32>
    %4 = tpu.matmul %2, %3, %cst {dimension_numbers = #tpu.dot_dimension_numbers<[1], [0], [0], [1], [0, 0, 1, 1], [], []>} : vector<16x32xbf16>, vector<32x96xbf16>, vector<16x96xf32> -> vector<16x96xf32>
    %c0_3 = arith.constant 0 : index
    %c0_4 = arith.constant 0 : index
    %5 = vector.load %arg3[%c0_3, %c0_4] : memref<1x96xf32, #tpu.memory_space<vmem>>, vector<1x96xf32>
    %6 = vector.broadcast %5 : vector<1x96xf32> to vector<16x96xf32>
    %7 = arith.addf %4, %6 : vector<16x96xf32>
    %8 = vector.extract_strided_slice %7 {offsets = [0, 0], sizes = [16, 32], strides = [1, 1]} : vector<16x96xf32> to vector<16x32xf32>
    %9 = vector.extract_strided_slice %7 {offsets = [0, 32], sizes = [16, 32], strides = [1, 1]} : vector<16x96xf32> to vector<16x32xf32>
    %10 = vector.extract_strided_slice %7 {offsets = [0, 64], sizes = [16, 32], strides = [1, 1]} : vector<16x96xf32> to vector<16x32xf32>
    %c0_5 = arith.constant 0 : index
    %c0_6 = arith.constant 0 : index
    %11 = vector.load %arg1[%c0_5, %c0_6] : memref<2x8xf32, #tpu.memory_space<vmem>>, vector<2x8xf32>
    %12 = vector.extract_strided_slice %8 {offsets = [0, 0], sizes = [8, 32], strides = [1, 1]} : vector<16x32xf32> to vector<8x32xf32>
    %13 = vector.extract_strided_slice %9 {offsets = [0, 0], sizes = [8, 32], strides = [1, 1]} : vector<16x32xf32> to vector<8x32xf32>
    %14 = vector.extract_strided_slice %10 {offsets = [0, 0], sizes = [8, 32], strides = [1, 1]} : vector<16x32xf32> to vector<8x32xf32>
    %15 = vector.extract_strided_slice %11 {offsets = [0, 0], sizes = [1, 8], strides = [1, 1]} : vector<2x8xf32> to vector<1x8xf32>
    %cst_7 = arith.constant -1.000000e+09 : f32
    %16 = vector.broadcast %cst_7 : f32 to vector<1x8xf32>
    %17 = arith.mulf %15, %16 : vector<1x8xf32>
    %18 = vector.extract_strided_slice %12 {offsets = [0, 0], sizes = [8, 8], strides = [1, 1]} : vector<8x32xf32> to vector<8x8xf32>
    %19 = vector.extract_strided_slice %13 {offsets = [0, 0], sizes = [8, 8], strides = [1, 1]} : vector<8x32xf32> to vector<8x8xf32>
    %20 = arith.truncf %18 : vector<8x8xf32> to vector<8x8xbf16>
    %21 = arith.truncf %19 : vector<8x8xf32> to vector<8x8xbf16>
    %cst_8 = arith.constant dense<0.000000e+00> : vector<8x8xf32>
    %22 = tpu.matmul %20, %21, %cst_8 {dimension_numbers = #tpu.dot_dimension_numbers<[1], [1], [0], [0], [0, 0, 1, 0], [], []>} : vector<8x8xbf16>, vector<8x8xbf16>, vector<8x8xf32> -> vector<8x8xf32>
    %cst_9 = arith.constant 0.353553385 : f32
    %23 = vector.broadcast %cst_9 : f32 to vector<8x8xf32>
    %24 = arith.mulf %22, %23 : vector<8x8xf32>
    %25 = vector.broadcast %17 : vector<1x8xf32> to vector<8x8xf32>
    %26 = arith.addf %24, %25 : vector<8x8xf32>
    %cst_10 = arith.constant dense<0xFF800000> : vector<8xf32>
    %27 = vector.multi_reduction <maximumf>, %26, %cst_10 [1] : vector<8x8xf32> to vector<8xf32>
    %28 = vector.shape_cast %27 : vector<8xf32> to vector<8x1xf32>
    %29 = vector.broadcast %28 : vector<8x1xf32> to vector<8x8xf32>
    %30 = arith.subf %26, %29 : vector<8x8xf32>
    %31 = math.exp %30 : vector<8x8xf32>
    %cst_11 = arith.constant dense<0.000000e+00> : vector<8xf32>
    %32 = vector.multi_reduction <add>, %31, %cst_11 [1] : vector<8x8xf32> to vector<8xf32>
    %33 = vector.shape_cast %32 : vector<8xf32> to vector<8x1xf32>
    %34 = tpu.reciprocal %33 {approx = true} : vector<8x1xf32> -> vector<8x1xf32>
    %35 = vector.broadcast %34 : vector<8x1xf32> to vector<8x8xf32>
    %36 = arith.mulf %31, %35 : vector<8x8xf32>
    %37 = vector.extract_strided_slice %14 {offsets = [0, 0], sizes = [8, 8], strides = [1, 1]} : vector<8x32xf32> to vector<8x8xf32>
    %38 = arith.truncf %36 : vector<8x8xf32> to vector<8x8xbf16>
    %39 = arith.truncf %37 : vector<8x8xf32> to vector<8x8xbf16>
    %cst_12 = arith.constant dense<0.000000e+00> : vector<8x8xf32>
    %40 = tpu.matmul %38, %39, %cst_12 {dimension_numbers = #tpu.dot_dimension_numbers<[1], [0], [0], [1], [0, 0, 1, 1], [], []>} : vector<8x8xbf16>, vector<8x8xbf16>, vector<8x8xf32> -> vector<8x8xf32>
    %c0_13 = arith.constant 0 : index
    %c0_14 = arith.constant 0 : index
    %41 = vector.load %arg15[%c0_13, %c0_14] : memref<16x32xf32, #tpu.memory_space<vmem>>, vector<8x8xf32>
    tpu.vector_store %arg15[%c0_13, %c0_14], %40 {strides = array<i32>} : memref<16x32xf32, #tpu.memory_space<vmem>>, vector<8x8xf32>,
    %42 = vector.extract_strided_slice %12 {offsets = [0, 8], sizes = [8, 8], strides = [1, 1]} : vector<8x32xf32> to vector<8x8xf32>
    %43 = vector.extract_strided_slice %13 {offsets = [0, 8], sizes = [8, 8], strides = [1, 1]} : vector<8x32xf32> to vector<8x8xf32>
    %44 = arith.truncf %42 : vector<8x8xf32> to vector<8x8xbf16>
    %45 = arith.truncf %43 : vector<8x8xf32> to vector<8x8xbf16>
    %cst_15 = arith.constant dense<0.000000e+00> : vector<8x8xf32>
    %46 = tpu.matmul %44, %45, %cst_15 {dimension_numbers = #tpu.dot_dimension_numbers<[1], [1], [0], [0], [0, 0, 1, 0], [], []>} : vector<8x8xbf16>, vector<8x8xbf16>, vector<8x8xf32> -> vector<8x8xf32>
    %cst_16 = arith.constant 0.353553385 : f32
    %47 = vector.broadcast %cst_16 : f32 to vector<8x8xf32>
    %48 = arith.mulf %46, %47 : vector<8x8xf32>
    %49 = vector.broadcast %17 : vector<1x8xf32> to vector<8x8xf32>
    %50 = arith.addf %48, %49 : vector<8x8xf32>
    %cst_17 = arith.constant dense<0xFF800000> : vector<8xf32>
    %51 = vector.multi_reduction <maximumf>, %50, %cst_17 [1] : vector<8x8xf32> to vector<8xf32>
    %52 = vector.shape_cast %51 : vector<8xf32> to vector<8x1xf32>
    %53 = vector.broadcast %52 : vector<8x1xf32> to vector<8x8xf32>
    %54 = arith.subf %50, %53 : vector<8x8xf32>
    %55 = math.exp %54 : vector<8x8xf32>
    %cst_18 = arith.constant dense<0.000000e+00> : vector<8xf32>
    %56 = vector.multi_reduction <add>, %55, %cst_18 [1] : vector<8x8xf32> to vector<8xf32>
    %57 = vector.shape_cast %56 : vector<8xf32> to vector<8x1xf32>
    %58 = tpu.reciprocal %57 {approx = true} : vector<8x1xf32> -> vector<8x1xf32>
    %59 = vector.broadcast %58 : vector<8x1xf32> to vector<8x8xf32>
    %60 = arith.mulf %55, %59 : vector<8x8xf32>
    %61 = vector.extract_strided_slice %14 {offsets = [0, 8], sizes = [8, 8], strides = [1, 1]} : vector<8x32xf32> to vector<8x8xf32>
    %62 = arith.truncf %60 : vector<8x8xf32> to vector<8x8xbf16>
    %63 = arith.truncf %61 : vector<8x8xf32> to vector<8x8xbf16>
    %cst_19 = arith.constant dense<0.000000e+00> : vector<8x8xf32>
    %64 = tpu.matmul %62, %63, %cst_19 {dimension_numbers = #tpu.dot_dimension_numbers<[1], [0], [0], [1], [0, 0, 1, 1], [], []>} : vector<8x8xbf16>, vector<8x8xbf16>, vector<8x8xf32> -> vector<8x8xf32>
    %c0_20 = arith.constant 0 : index
    %c8 = arith.constant 8 : index
    %65 = vector.load %arg15[%c0_20, %c8] : memref<16x32xf32, #tpu.memory_space<vmem>>, vector<8x8xf32>
    tpu.vector_store %arg15[%c0_20, %c8], %64 {strides = array<i32>} : memref<16x32xf32, #tpu.memory_space<vmem>>, vector<8x8xf32>,
    %66 = vector.extract_strided_slice %12 {offsets = [0, 16], sizes = [8, 8], strides = [1, 1]} : vector<8x32xf32> to vector<8x8xf32>
    %67 = vector.extract_strided_slice %13 {offsets = [0, 16], sizes = [8, 8], strides = [1, 1]} : vector<8x32xf32> to vector<8x8xf32>
    %68 = arith.truncf %66 : vector<8x8xf32> to vector<8x8xbf16>
    %69 = arith.truncf %67 : vector<8x8xf32> to vector<8x8xbf16>
    %cst_21 = arith.constant dense<0.000000e+00> : vector<8x8xf32>
    %70 = tpu.matmul %68, %69, %cst_21 {dimension_numbers = #tpu.dot_dimension_numbers<[1], [1], [0], [0], [0, 0, 1, 0], [], []>} : vector<8x8xbf16>, vector<8x8xbf16>, vector<8x8xf32> -> vector<8x8xf32>
    %cst_22 = arith.constant 0.353553385 : f32
    %71 = vector.broadcast %cst_22 : f32 to vector<8x8xf32>
    %72 = arith.mulf %70, %71 : vector<8x8xf32>
    %73 = vector.broadcast %17 : vector<1x8xf32> to vector<8x8xf32>
    %74 = arith.addf %72, %73 : vector<8x8xf32>
    %cst_23 = arith.constant dense<0xFF800000> : vector<8xf32>
    %75 = vector.multi_reduction <maximumf>, %74, %cst_23 [1] : vector<8x8xf32> to vector<8xf32>
    %76 = vector.shape_cast %75 : vector<8xf32> to vector<8x1xf32>
    %77 = vector.broadcast %76 : vector<8x1xf32> to vector<8x8xf32>
    %78 = arith.subf %74, %77 : vector<8x8xf32>
    %79 = math.exp %78 : vector<8x8xf32>
    %cst_24 = arith.constant dense<0.000000e+00> : vector<8xf32>
    %80 = vector.multi_reduction <add>, %79, %cst_24 [1] : vector<8x8xf32> to vector<8xf32>
    %81 = vector.shape_cast %80 : vector<8xf32> to vector<8x1xf32>
    %82 = tpu.reciprocal %81 {approx = true} : vector<8x1xf32> -> vector<8x1xf32>
    %83 = vector.broadcast %82 : vector<8x1xf32> to vector<8x8xf32>
    %84 = arith.mulf %79, %83 : vector<8x8xf32>
    %85 = vector.extract_strided_slice %14 {offsets = [0, 16], sizes = [8, 8], strides = [1, 1]} : vector<8x32xf32> to vector<8x8xf32>
    %86 = arith.truncf %84 : vector<8x8xf32> to vector<8x8xbf16>
    %87 = arith.truncf %85 : vector<8x8xf32> to vector<8x8xbf16>
    %cst_25 = arith.constant dense<0.000000e+00> : vector<8x8xf32>
    %88 = tpu.matmul %86, %87, %cst_25 {dimension_numbers = #tpu.dot_dimension_numbers<[1], [0], [0], [1], [0, 0, 1, 1], [], []>} : vector<8x8xbf16>, vector<8x8xbf16>, vector<8x8xf32> -> vector<8x8xf32>
    %c0_26 = arith.constant 0 : index
    %c16 = arith.constant 16 : index
    %89 = vector.load %arg15[%c0_26, %c16] : memref<16x32xf32, #tpu.memory_space<vmem>>, vector<8x8xf32>
    tpu.vector_store %arg15[%c0_26, %c16], %88 {strides = array<i32>} : memref<16x32xf32, #tpu.memory_space<vmem>>, vector<8x8xf32>,
    %90 = vector.extract_strided_slice %12 {offsets = [0, 24], sizes = [8, 8], strides = [1, 1]} : vector<8x32xf32> to vector<8x8xf32>
    %91 = vector.extract_strided_slice %13 {offsets = [0, 24], sizes = [8, 8], strides = [1, 1]} : vector<8x32xf32> to vector<8x8xf32>
    %92 = arith.truncf %90 : vector<8x8xf32> to vector<8x8xbf16>
    %93 = arith.truncf %91 : vector<8x8xf32> to vector<8x8xbf16>
    %cst_27 = arith.constant dense<0.000000e+00> : vector<8x8xf32>
    %94 = tpu.matmul %92, %93, %cst_27 {dimension_numbers = #tpu.dot_dimension_numbers<[1], [1], [0], [0], [0, 0, 1, 0], [], []>} : vector<8x8xbf16>, vector<8x8xbf16>, vector<8x8xf32> -> vector<8x8xf32>
    %cst_28 = arith.constant 0.353553385 : f32
    %95 = vector.broadcast %cst_28 : f32 to vector<8x8xf32>
    %96 = arith.mulf %94, %95 : vector<8x8xf32>
    %97 = vector.broadcast %17 : vector<1x8xf32> to vector<8x8xf32>
    %98 = arith.addf %96, %97 : vector<8x8xf32>
    %cst_29 = arith.constant dense<0xFF800000> : vector<8xf32>
    %99 = vector.multi_reduction <maximumf>, %98, %cst_29 [1] : vector<8x8xf32> to vector<8xf32>
    %100 = vector.shape_cast %99 : vector<8xf32> to vector<8x1xf32>
    %101 = vector.broadcast %100 : vector<8x1xf32> to vector<8x8xf32>
    %102 = arith.subf %98, %101 : vector<8x8xf32>
    %103 = math.exp %102 : vector<8x8xf32>
    %cst_30 = arith.constant dense<0.000000e+00> : vector<8xf32>
    %104 = vector.multi_reduction <add>, %103, %cst_30 [1] : vector<8x8xf32> to vector<8xf32>
    %105 = vector.shape_cast %104 : vector<8xf32> to vector<8x1xf32>
    %106 = tpu.reciprocal %105 {approx = true} : vector<8x1xf32> -> vector<8x1xf32>
    %107 = vector.broadcast %106 : vector<8x1xf32> to vector<8x8xf32>
    %108 = arith.mulf %103, %107 : vector<8x8xf32>
    %109 = vector.extract_strided_slice %14 {offsets = [0, 24], sizes = [8, 8], strides = [1, 1]} : vector<8x32xf32> to vector<8x8xf32>
    %110 = arith.truncf %108 : vector<8x8xf32> to vector<8x8xbf16>
    %111 = arith.truncf %109 : vector<8x8xf32> to vector<8x8xbf16>
    %cst_31 = arith.constant dense<0.000000e+00> : vector<8x8xf32>
    %112 = tpu.matmul %110, %111, %cst_31 {dimension_numbers = #tpu.dot_dimension_numbers<[1], [0], [0], [1], [0, 0, 1, 1], [], []>} : vector<8x8xbf16>, vector<8x8xbf16>, vector<8x8xf32> -> vector<8x8xf32>
    %c0_32 = arith.constant 0 : index
    %c24 = arith.constant 24 : index
    %113 = vector.load %arg15[%c0_32, %c24] : memref<16x32xf32, #tpu.memory_space<vmem>>, vector<8x8xf32>
    tpu.vector_store %arg15[%c0_32, %c24], %112 {strides = array<i32>} : memref<16x32xf32, #tpu.memory_space<vmem>>, vector<8x8xf32>,
    %114 = vector.extract_strided_slice %8 {offsets = [8, 0], sizes = [8, 32], strides = [1, 1]} : vector<16x32xf32> to vector<8x32xf32>
    %115 = vector.extract_strided_slice %9 {offsets = [8, 0], sizes = [8, 32], strides = [1, 1]} : vector<16x32xf32> to vector<8x32xf32>
    %116 = vector.extract_strided_slice %10 {offsets = [8, 0], sizes = [8, 32], strides = [1, 1]} : vector<16x32xf32> to vector<8x32xf32>
    %117 = vector.extract_strided_slice %11 {offsets = [1, 0], sizes = [1, 8], strides = [1, 1]} : vector<2x8xf32> to vector<1x8xf32>
    %cst_33 = arith.constant -1.000000e+09 : f32
    %118 = vector.broadcast %cst_33 : f32 to vector<1x8xf32>
    %119 = arith.mulf %117, %118 : vector<1x8xf32>
    %120 = vector.extract_strided_slice %114 {offsets = [0, 0], sizes = [8, 8], strides = [1, 1]} : vector<8x32xf32> to vector<8x8xf32>
    %121 = vector.extract_strided_slice %115 {offsets = [0, 0], sizes = [8, 8], strides = [1, 1]} : vector<8x32xf32> to vector<8x8xf32>
    %122 = arith.truncf %120 : vector<8x8xf32> to vector<8x8xbf16>
    %123 = arith.truncf %121 : vector<8x8xf32> to vector<8x8xbf16>
    %cst_34 = arith.constant dense<0.000000e+00> : vector<8x8xf32>
    %124 = tpu.matmul %122, %123, %cst_34 {dimension_numbers = #tpu.dot_dimension_numbers<[1], [1], [0], [0], [0, 0, 1, 0], [], []>} : vector<8x8xbf16>, vector<8x8xbf16>, vector<8x8xf32> -> vector<8x8xf32>
    %cst_35 = arith.constant 0.353553385 : f32
    %125 = vector.broadcast %cst_35 : f32 to vector<8x8xf32>
    %126 = arith.mulf %124, %125 : vector<8x8xf32>
    %127 = vector.broadcast %119 : vector<1x8xf32> to vector<8x8xf32>
    %128 = arith.addf %126, %127 : vector<8x8xf32>
    %cst_36 = arith.constant dense<0xFF800000> : vector<8xf32>
    %129 = vector.multi_reduction <maximumf>, %128, %cst_36 [1] : vector<8x8xf32> to vector<8xf32>
    %130 = vector.shape_cast %129 : vector<8xf32> to vector<8x1xf32>
    %131 = vector.broadcast %130 : vector<8x1xf32> to vector<8x8xf32>
    %132 = arith.subf %128, %131 : vector<8x8xf32>
    %133 = math.exp %132 : vector<8x8xf32>
    %cst_37 = arith.constant dense<0.000000e+00> : vector<8xf32>
    %134 = vector.multi_reduction <add>, %133, %cst_37 [1] : vector<8x8xf32> to vector<8xf32>
    %135 = vector.shape_cast %134 : vector<8xf32> to vector<8x1xf32>
    %136 = tpu.reciprocal %135 {approx = true} : vector<8x1xf32> -> vector<8x1xf32>
    %137 = vector.broadcast %136 : vector<8x1xf32> to vector<8x8xf32>
    %138 = arith.mulf %133, %137 : vector<8x8xf32>
    %139 = vector.extract_strided_slice %116 {offsets = [0, 0], sizes = [8, 8], strides = [1, 1]} : vector<8x32xf32> to vector<8x8xf32>
    %140 = arith.truncf %138 : vector<8x8xf32> to vector<8x8xbf16>
    %141 = arith.truncf %139 : vector<8x8xf32> to vector<8x8xbf16>
    %cst_38 = arith.constant dense<0.000000e+00> : vector<8x8xf32>
    %142 = tpu.matmul %140, %141, %cst_38 {dimension_numbers = #tpu.dot_dimension_numbers<[1], [0], [0], [1], [0, 0, 1, 1], [], []>} : vector<8x8xbf16>, vector<8x8xbf16>, vector<8x8xf32> -> vector<8x8xf32>
    %c8_39 = arith.constant 8 : index
    %c0_40 = arith.constant 0 : index
    %143 = vector.load %arg15[%c8_39, %c0_40] : memref<16x32xf32, #tpu.memory_space<vmem>>, vector<8x8xf32>
    tpu.vector_store %arg15[%c8_39, %c0_40], %142 {strides = array<i32>} : memref<16x32xf32, #tpu.memory_space<vmem>>, vector<8x8xf32>,
    %144 = vector.extract_strided_slice %114 {offsets = [0, 8], sizes = [8, 8], strides = [1, 1]} : vector<8x32xf32> to vector<8x8xf32>
    %145 = vector.extract_strided_slice %115 {offsets = [0, 8], sizes = [8, 8], strides = [1, 1]} : vector<8x32xf32> to vector<8x8xf32>
    %146 = arith.truncf %144 : vector<8x8xf32> to vector<8x8xbf16>
    %147 = arith.truncf %145 : vector<8x8xf32> to vector<8x8xbf16>
    %cst_41 = arith.constant dense<0.000000e+00> : vector<8x8xf32>
    %148 = tpu.matmul %146, %147, %cst_41 {dimension_numbers = #tpu.dot_dimension_numbers<[1], [1], [0], [0], [0, 0, 1, 0], [], []>} : vector<8x8xbf16>, vector<8x8xbf16>, vector<8x8xf32> -> vector<8x8xf32>
    %cst_42 = arith.constant 0.353553385 : f32
    %149 = vector.broadcast %cst_42 : f32 to vector<8x8xf32>
    %150 = arith.mulf %148, %149 : vector<8x8xf32>
    %151 = vector.broadcast %119 : vector<1x8xf32> to vector<8x8xf32>
    %152 = arith.addf %150, %151 : vector<8x8xf32>
    %cst_43 = arith.constant dense<0xFF800000> : vector<8xf32>
    %153 = vector.multi_reduction <maximumf>, %152, %cst_43 [1] : vector<8x8xf32> to vector<8xf32>
    %154 = vector.shape_cast %153 : vector<8xf32> to vector<8x1xf32>
    %155 = vector.broadcast %154 : vector<8x1xf32> to vector<8x8xf32>
    %156 = arith.subf %152, %155 : vector<8x8xf32>
    %157 = math.exp %156 : vector<8x8xf32>
    %cst_44 = arith.constant dense<0.000000e+00> : vector<8xf32>
    %158 = vector.multi_reduction <add>, %157, %cst_44 [1] : vector<8x8xf32> to vector<8xf32>
    %159 = vector.shape_cast %158 : vector<8xf32> to vector<8x1xf32>
    %160 = tpu.reciprocal %159 {approx = true} : vector<8x1xf32> -> vector<8x1xf32>
    %161 = vector.broadcast %160 : vector<8x1xf32> to vector<8x8xf32>
    %162 = arith.mulf %157, %161 : vector<8x8xf32>
    %163 = vector.extract_strided_slice %116 {offsets = [0, 8], sizes = [8, 8], strides = [1, 1]} : vector<8x32xf32> to vector<8x8xf32>
    %164 = arith.truncf %162 : vector<8x8xf32> to vector<8x8xbf16>
    %165 = arith.truncf %163 : vector<8x8xf32> to vector<8x8xbf16>
    %cst_45 = arith.constant dense<0.000000e+00> : vector<8x8xf32>
    %166 = tpu.matmul %164, %165, %cst_45 {dimension_numbers = #tpu.dot_dimension_numbers<[1], [0], [0], [1], [0, 0, 1, 1], [], []>} : vector<8x8xbf16>, vector<8x8xbf16>, vector<8x8xf32> -> vector<8x8xf32>
    %c8_46 = arith.constant 8 : index
    %c8_47 = arith.constant 8 : index
    %167 = vector.load %arg15[%c8_46, %c8_47] : memref<16x32xf32, #tpu.memory_space<vmem>>, vector<8x8xf32>
    tpu.vector_store %arg15[%c8_46, %c8_47], %166 {strides = array<i32>} : memref<16x32xf32, #tpu.memory_space<vmem>>, vector<8x8xf32>,
    %168 = vector.extract_strided_slice %114 {offsets = [0, 16], sizes = [8, 8], strides = [1, 1]} : vector<8x32xf32> to vector<8x8xf32>
    %169 = vector.extract_strided_slice %115 {offsets = [0, 16], sizes = [8, 8], strides = [1, 1]} : vector<8x32xf32> to vector<8x8xf32>
    %170 = arith.truncf %168 : vector<8x8xf32> to vector<8x8xbf16>
    %171 = arith.truncf %169 : vector<8x8xf32> to vector<8x8xbf16>
    %cst_48 = arith.constant dense<0.000000e+00> : vector<8x8xf32>
    %172 = tpu.matmul %170, %171, %cst_48 {dimension_numbers = #tpu.dot_dimension_numbers<[1], [1], [0], [0], [0, 0, 1, 0], [], []>} : vector<8x8xbf16>, vector<8x8xbf16>, vector<8x8xf32> -> vector<8x8xf32>
    %cst_49 = arith.constant 0.353553385 : f32
    %173 = vector.broadcast %cst_49 : f32 to vector<8x8xf32>
    %174 = arith.mulf %172, %173 : vector<8x8xf32>
    %175 = vector.broadcast %119 : vector<1x8xf32> to vector<8x8xf32>
    %176 = arith.addf %174, %175 : vector<8x8xf32>
    %cst_50 = arith.constant dense<0xFF800000> : vector<8xf32>
    %177 = vector.multi_reduction <maximumf>, %176, %cst_50 [1] : vector<8x8xf32> to vector<8xf32>
    %178 = vector.shape_cast %177 : vector<8xf32> to vector<8x1xf32>
    %179 = vector.broadcast %178 : vector<8x1xf32> to vector<8x8xf32>
    %180 = arith.subf %176, %179 : vector<8x8xf32>
    %181 = math.exp %180 : vector<8x8xf32>
    %cst_51 = arith.constant dense<0.000000e+00> : vector<8xf32>
    %182 = vector.multi_reduction <add>, %181, %cst_51 [1] : vector<8x8xf32> to vector<8xf32>
    %183 = vector.shape_cast %182 : vector<8xf32> to vector<8x1xf32>
    %184 = tpu.reciprocal %183 {approx = true} : vector<8x1xf32> -> vector<8x1xf32>
    %185 = vector.broadcast %184 : vector<8x1xf32> to vector<8x8xf32>
    %186 = arith.mulf %181, %185 : vector<8x8xf32>
    %187 = vector.extract_strided_slice %116 {offsets = [0, 16], sizes = [8, 8], strides = [1, 1]} : vector<8x32xf32> to vector<8x8xf32>
    %188 = arith.truncf %186 : vector<8x8xf32> to vector<8x8xbf16>
    %189 = arith.truncf %187 : vector<8x8xf32> to vector<8x8xbf16>
    %cst_52 = arith.constant dense<0.000000e+00> : vector<8x8xf32>
    %190 = tpu.matmul %188, %189, %cst_52 {dimension_numbers = #tpu.dot_dimension_numbers<[1], [0], [0], [1], [0, 0, 1, 1], [], []>} : vector<8x8xbf16>, vector<8x8xbf16>, vector<8x8xf32> -> vector<8x8xf32>
    %c8_53 = arith.constant 8 : index
    %c16_54 = arith.constant 16 : index
    %191 = vector.load %arg15[%c8_53, %c16_54] : memref<16x32xf32, #tpu.memory_space<vmem>>, vector<8x8xf32>
    tpu.vector_store %arg15[%c8_53, %c16_54], %190 {strides = array<i32>} : memref<16x32xf32, #tpu.memory_space<vmem>>, vector<8x8xf32>,
    %192 = vector.extract_strided_slice %114 {offsets = [0, 24], sizes = [8, 8], strides = [1, 1]} : vector<8x32xf32> to vector<8x8xf32>
    %193 = vector.extract_strided_slice %115 {offsets = [0, 24], sizes = [8, 8], strides = [1, 1]} : vector<8x32xf32> to vector<8x8xf32>
    %194 = arith.truncf %192 : vector<8x8xf32> to vector<8x8xbf16>
    %195 = arith.truncf %193 : vector<8x8xf32> to vector<8x8xbf16>
    %cst_55 = arith.constant dense<0.000000e+00> : vector<8x8xf32>
    %196 = tpu.matmul %194, %195, %cst_55 {dimension_numbers = #tpu.dot_dimension_numbers<[1], [1], [0], [0], [0, 0, 1, 0], [], []>} : vector<8x8xbf16>, vector<8x8xbf16>, vector<8x8xf32> -> vector<8x8xf32>
    %cst_56 = arith.constant 0.353553385 : f32
    %197 = vector.broadcast %cst_56 : f32 to vector<8x8xf32>
    %198 = arith.mulf %196, %197 : vector<8x8xf32>
    %199 = vector.broadcast %119 : vector<1x8xf32> to vector<8x8xf32>
    %200 = arith.addf %198, %199 : vector<8x8xf32>
    %cst_57 = arith.constant dense<0xFF800000> : vector<8xf32>
    %201 = vector.multi_reduction <maximumf>, %200, %cst_57 [1] : vector<8x8xf32> to vector<8xf32>
    %202 = vector.shape_cast %201 : vector<8xf32> to vector<8x1xf32>
    %203 = vector.broadcast %202 : vector<8x1xf32> to vector<8x8xf32>
    %204 = arith.subf %200, %203 : vector<8x8xf32>
    %205 = math.exp %204 : vector<8x8xf32>
    %cst_58 = arith.constant dense<0.000000e+00> : vector<8xf32>
    %206 = vector.multi_reduction <add>, %205, %cst_58 [1] : vector<8x8xf32> to vector<8xf32>
    %207 = vector.shape_cast %206 : vector<8xf32> to vector<8x1xf32>
    %208 = tpu.reciprocal %207 {approx = true} : vector<8x1xf32> -> vector<8x1xf32>
    %209 = vector.broadcast %208 : vector<8x1xf32> to vector<8x8xf32>
    %210 = arith.mulf %205, %209 : vector<8x8xf32>
    %211 = vector.extract_strided_slice %116 {offsets = [0, 24], sizes = [8, 8], strides = [1, 1]} : vector<8x32xf32> to vector<8x8xf32>
    %212 = arith.truncf %210 : vector<8x8xf32> to vector<8x8xbf16>
    %213 = arith.truncf %211 : vector<8x8xf32> to vector<8x8xbf16>
    %cst_59 = arith.constant dense<0.000000e+00> : vector<8x8xf32>
    %214 = tpu.matmul %212, %213, %cst_59 {dimension_numbers = #tpu.dot_dimension_numbers<[1], [0], [0], [1], [0, 0, 1, 1], [], []>} : vector<8x8xbf16>, vector<8x8xbf16>, vector<8x8xf32> -> vector<8x8xf32>
    %c8_60 = arith.constant 8 : index
    %c24_61 = arith.constant 24 : index
    %215 = vector.load %arg15[%c8_60, %c24_61] : memref<16x32xf32, #tpu.memory_space<vmem>>, vector<8x8xf32>
    tpu.vector_store %arg15[%c8_60, %c24_61], %214 {strides = array<i32>} : memref<16x32xf32, #tpu.memory_space<vmem>>, vector<8x8xf32>,
    %c0_62 = arith.constant 0 : index
    %c0_63 = arith.constant 0 : index
    %216 = vector.load %arg15[%c0_62, %c0_63] : memref<16x32xf32, #tpu.memory_space<vmem>>, vector<16x32xf32>
    %c0_64 = arith.constant 0 : index
    %c0_65 = arith.constant 0 : index
    %217 = vector.load %arg4[%c0_64, %c0_65] : memref<32x32xf32, #tpu.memory_space<vmem>>, vector<32x32xf32>
    %218 = arith.truncf %216 : vector<16x32xf32> to vector<16x32xbf16>
    %219 = arith.truncf %217 : vector<32x32xf32> to vector<32x32xbf16>
    %cst_66 = arith.constant dense<0.000000e+00> : vector<16x32xf32>
    %220 = tpu.matmul %218, %219, %cst_66 {dimension_numbers = #tpu.dot_dimension_numbers<[1], [0], [0], [1], [0, 0, 1, 1], [], []>} : vector<16x32xbf16>, vector<32x32xbf16>, vector<16x32xf32> -> vector<16x32xf32>
    %c0_67 = arith.constant 0 : index
    %c0_68 = arith.constant 0 : index
    %221 = vector.load %arg5[%c0_67, %c0_68] : memref<1x32xf32, #tpu.memory_space<vmem>>, vector<1x32xf32>
    %222 = vector.broadcast %221 : vector<1x32xf32> to vector<16x32xf32>
    %223 = arith.addf %220, %222 : vector<16x32xf32>
    %c0_69 = arith.constant 0 : index
    %c0_70 = arith.constant 0 : index
    %224 = vector.load %arg6[%c0_69, %c0_70] : memref<1x32xf32, #tpu.memory_space<vmem>>, vector<1x32xf32>
    %c0_71 = arith.constant 0 : index
    %c0_72 = arith.constant 0 : index
    %225 = vector.load %arg7[%c0_71, %c0_72] : memref<1x32xf32, #tpu.memory_space<vmem>>, vector<1x32xf32>
    %226 = arith.addf %0, %223 : vector<16x32xf32>
    %cst_73 = arith.constant dense<0.000000e+00> : vector<16xf32>
    %227 = vector.multi_reduction <add>, %226, %cst_73 [1] : vector<16x32xf32> to vector<16xf32>
    %228 = vector.shape_cast %227 : vector<16xf32> to vector<16x1xf32>
    %cst_74 = arith.constant 3.200000e+01 : f32
    %229 = vector.broadcast %cst_74 : f32 to vector<16x1xf32>
    %230 = arith.divf %228, %229 : vector<16x1xf32>
    %231 = vector.broadcast %230 : vector<16x1xf32> to vector<16x32xf32>
    %232 = arith.subf %226, %231 : vector<16x32xf32>
    %233 = arith.mulf %232, %232 : vector<16x32xf32>
    %cst_75 = arith.constant dense<0.000000e+00> : vector<16xf32>
    %234 = vector.multi_reduction <add>, %233, %cst_75 [1] : vector<16x32xf32> to vector<16xf32>
    %235 = vector.shape_cast %234 : vector<16xf32> to vector<16x1xf32>
    %cst_76 = arith.constant 3.200000e+01 : f32
    %236 = vector.broadcast %cst_76 : f32 to vector<16x1xf32>
    %237 = arith.divf %235, %236 : vector<16x1xf32>
    %238 = vector.broadcast %230 : vector<16x1xf32> to vector<16x32xf32>
    %239 = arith.subf %226, %238 : vector<16x32xf32>
    %cst_77 = arith.constant 9.99999974E-6 : f32
    %240 = vector.broadcast %cst_77 : f32 to vector<16x1xf32>
    %241 = arith.addf %237, %240 : vector<16x1xf32>
    %242 = math.rsqrt %241 : vector<16x1xf32>
    %243 = vector.broadcast %242 : vector<16x1xf32> to vector<16x32xf32>
    %244 = arith.mulf %239, %243 : vector<16x32xf32>
    %245 = vector.broadcast %224 : vector<1x32xf32> to vector<16x32xf32>
    %246 = arith.mulf %244, %245 : vector<16x32xf32>
    %247 = vector.broadcast %225 : vector<1x32xf32> to vector<16x32xf32>
    %248 = arith.addf %246, %247 : vector<16x32xf32>
    %c0_78 = arith.constant 0 : index
    %c0_79 = arith.constant 0 : index
    %249 = vector.load %arg8[%c0_78, %c0_79] : memref<32x64xf32, #tpu.memory_space<vmem>>, vector<32x64xf32>
    %250 = arith.truncf %248 : vector<16x32xf32> to vector<16x32xbf16>
    %251 = arith.truncf %249 : vector<32x64xf32> to vector<32x64xbf16>
    %cst_80 = arith.constant dense<0.000000e+00> : vector<16x64xf32>
    %252 = tpu.matmul %250, %251, %cst_80 {dimension_numbers = #tpu.dot_dimension_numbers<[1], [0], [0], [1], [0, 0, 1, 1], [], []>} : vector<16x32xbf16>, vector<32x64xbf16>, vector<16x64xf32> -> vector<16x64xf32>
    %c0_81 = arith.constant 0 : index
    %c0_82 = arith.constant 0 : index
    %253 = vector.load %arg9[%c0_81, %c0_82] : memref<1x64xf32, #tpu.memory_space<vmem>>, vector<1x64xf32>
    %254 = vector.broadcast %253 : vector<1x64xf32> to vector<16x64xf32>
    %255 = arith.addf %252, %254 : vector<16x64xf32>
    %cst_83 = arith.constant 0.000000e+00 : f32
    %256 = vector.broadcast %cst_83 : f32 to vector<16x64xf32>
    %257 = arith.maximumf %255, %256 : vector<16x64xf32>
    %c0_84 = arith.constant 0 : index
    %c0_85 = arith.constant 0 : index
    %258 = vector.load %arg10[%c0_84, %c0_85] : memref<64x32xf32, #tpu.memory_space<vmem>>, vector<64x32xf32>
    %259 = arith.truncf %257 : vector<16x64xf32> to vector<16x64xbf16>
    %260 = arith.truncf %258 : vector<64x32xf32> to vector<64x32xbf16>
    %cst_86 = arith.constant dense<0.000000e+00> : vector<16x32xf32>
    %261 = tpu.matmul %259, %260, %cst_86 {dimension_numbers = #tpu.dot_dimension_numbers<[1], [0], [0], [1], [0, 0, 1, 1], [], []>} : vector<16x64xbf16>, vector<64x32xbf16>, vector<16x32xf32> -> vector<16x32xf32>
    %c0_87 = arith.constant 0 : index
    %c0_88 = arith.constant 0 : index
    %262 = vector.load %arg11[%c0_87, %c0_88] : memref<1x32xf32, #tpu.memory_space<vmem>>, vector<1x32xf32>
    %263 = vector.broadcast %262 : vector<1x32xf32> to vector<16x32xf32>
    %264 = arith.addf %261, %263 : vector<16x32xf32>
    %c0_89 = arith.constant 0 : index
    %c0_90 = arith.constant 0 : index
    %265 = vector.load %arg12[%c0_89, %c0_90] : memref<1x32xf32, #tpu.memory_space<vmem>>, vector<1x32xf32>
    %c0_91 = arith.constant 0 : index
    %c0_92 = arith.constant 0 : index
    %266 = vector.load %arg13[%c0_91, %c0_92] : memref<1x32xf32, #tpu.memory_space<vmem>>, vector<1x32xf32>
    %267 = arith.addf %248, %264 : vector<16x32xf32>
    %cst_93 = arith.constant dense<0.000000e+00> : vector<16xf32>
    %268 = vector.multi_reduction <add>, %267, %cst_93 [1] : vector<16x32xf32> to vector<16xf32>
    %269 = vector.shape_cast %268 : vector<16xf32> to vector<16x1xf32>
    %cst_94 = arith.constant 3.200000e+01 : f32
    %270 = vector.broadcast %cst_94 : f32 to vector<16x1xf32>
    %271 = arith.divf %269, %270 : vector<16x1xf32>
    %272 = vector.broadcast %271 : vector<16x1xf32> to vector<16x32xf32>
    %273 = arith.subf %267, %272 : vector<16x32xf32>
    %274 = arith.mulf %273, %273 : vector<16x32xf32>
    %cst_95 = arith.constant dense<0.000000e+00> : vector<16xf32>
    %275 = vector.multi_reduction <add>, %274, %cst_95 [1] : vector<16x32xf32> to vector<16xf32>
    %276 = vector.shape_cast %275 : vector<16xf32> to vector<16x1xf32>
    %cst_96 = arith.constant 3.200000e+01 : f32
    %277 = vector.broadcast %cst_96 : f32 to vector<16x1xf32>
    %278 = arith.divf %276, %277 : vector<16x1xf32>
    %279 = vector.broadcast %271 : vector<16x1xf32> to vector<16x32xf32>
    %280 = arith.subf %267, %279 : vector<16x32xf32>
    %cst_97 = arith.constant 9.99999974E-6 : f32
    %281 = vector.broadcast %cst_97 : f32 to vector<16x1xf32>
    %282 = arith.addf %278, %281 : vector<16x1xf32>
    %283 = math.rsqrt %282 : vector<16x1xf32>
    %284 = vector.broadcast %283 : vector<16x1xf32> to vector<16x32xf32>
    %285 = arith.mulf %280, %284 : vector<16x32xf32>
    %286 = vector.broadcast %265 : vector<1x32xf32> to vector<16x32xf32>
    %287 = arith.mulf %285, %286 : vector<16x32xf32>
    %288 = vector.broadcast %266 : vector<1x32xf32> to vector<16x32xf32>
    %289 = arith.addf %287, %288 : vector<16x32xf32>
    %c0_98 = arith.constant 0 : index
    %c0_99 = arith.constant 0 : index
    %290 = vector.load %arg14[%c0_98, %c0_99] : memref<16x32xf32, #tpu.memory_space<vmem>>, vector<16x32xf32>
    tpu.vector_store %arg14[%c0_98, %c0_99], %289 {strides = array<i32>} : memref<16x32xf32, #tpu.memory_space<vmem>>, vector<16x32xf32>,
    return
  }
}

module attributes {stable_mosaic.version = 11 : i64} {
  func.func @_decoder_layer_kernel(%arg0: memref<16x32xf32, #tpu.memory_space<vmem>>, %arg1: memref<16x32xf32, #tpu.memory_space<vmem>>, %arg2: memref<2x8xf32, #tpu.memory_space<vmem>>, %arg3: memref<2x8xf32, #tpu.memory_space<vmem>>, %arg4: memref<32x96xf32, #tpu.memory_space<vmem>>, %arg5: memref<1x96xf32, #tpu.memory_space<vmem>>, %arg6: memref<32x32xf32, #tpu.memory_space<vmem>>, %arg7: memref<1x32xf32, #tpu.memory_space<vmem>>, %arg8: memref<1x32xf32, #tpu.memory_space<vmem>>, %arg9: memref<1x32xf32, #tpu.memory_space<vmem>>, %arg10: memref<32x32xf32, #tpu.memory_space<vmem>>, %arg11: memref<1x32xf32, #tpu.memory_space<vmem>>, %arg12: memref<32x64xf32, #tpu.memory_space<vmem>>, %arg13: memref<1x64xf32, #tpu.memory_space<vmem>>, %arg14: memref<32x32xf32, #tpu.memory_space<vmem>>, %arg15: memref<1x32xf32, #tpu.memory_space<vmem>>, %arg16: memref<1x32xf32, #tpu.memory_space<vmem>>, %arg17: memref<1x32xf32, #tpu.memory_space<vmem>>, %arg18: memref<32x64xf32, #tpu.memory_space<vmem>>, %arg19: memref<1x64xf32, #tpu.memory_space<vmem>>, %arg20: memref<64x32xf32, #tpu.memory_space<vmem>>, %arg21: memref<1x32xf32, #tpu.memory_space<vmem>>, %arg22: memref<1x32xf32, #tpu.memory_space<vmem>>, %arg23: memref<1x32xf32, #tpu.memory_space<vmem>>, %arg24: memref<16x32xf32, #tpu.memory_space<vmem>>, %arg25: memref<16x32xf32, #tpu.memory_space<vmem>>) attributes {dimension_semantics = [], scalar_prefetch = 0 : i64, scratch_operands = 1 : i64, tpu.core_type = #tpu.core_type<tc>} {
    %c0 = arith.constant 0 : index
    %c0_0 = arith.constant 0 : index
    %0 = vector.load %arg0[%c0, %c0_0] : memref<16x32xf32, #tpu.memory_space<vmem>>, vector<16x32xf32>
    %c0_1 = arith.constant 0 : index
    %c0_2 = arith.constant 0 : index
    %1 = vector.load %arg1[%c0_1, %c0_2] : memref<16x32xf32, #tpu.memory_space<vmem>>, vector<16x32xf32>
    %c0_3 = arith.constant 0 : index
    %c0_4 = arith.constant 0 : index
    %2 = vector.load %arg4[%c0_3, %c0_4] : memref<32x96xf32, #tpu.memory_space<vmem>>, vector<32x96xf32>
    %3 = arith.truncf %0 : vector<16x32xf32> to vector<16x32xbf16>
    %4 = arith.truncf %2 : vector<32x96xf32> to vector<32x96xbf16>
    %cst = arith.constant dense<0.000000e+00> : vector<16x96xf32>
    %5 = tpu.matmul %3, %4, %cst {dimension_numbers = #tpu.dot_dimension_numbers<[1], [0], [0], [1], [0, 0, 1, 1], [], []>} : vector<16x32xbf16>, vector<32x96xbf16>, vector<16x96xf32> -> vector<16x96xf32>
    %c0_5 = arith.constant 0 : index
    %c0_6 = arith.constant 0 : index
    %6 = vector.load %arg5[%c0_5, %c0_6] : memref<1x96xf32, #tpu.memory_space<vmem>>, vector<1x96xf32>
    %7 = vector.broadcast %6 : vector<1x96xf32> to vector<16x96xf32>
    %8 = arith.addf %5, %7 : vector<16x96xf32>
    %9 = vector.extract_strided_slice %8 {offsets = [0, 0], sizes = [16, 32], strides = [1, 1]} : vector<16x96xf32> to vector<16x32xf32>
    %10 = vector.extract_strided_slice %8 {offsets = [0, 32], sizes = [16, 32], strides = [1, 1]} : vector<16x96xf32> to vector<16x32xf32>
    %11 = vector.extract_strided_slice %8 {offsets = [0, 64], sizes = [16, 32], strides = [1, 1]} : vector<16x96xf32> to vector<16x32xf32>
    %12 = tpu.iota {dimensions = array<i32: 0>} : vector<8x8xi32>
    %13 = tpu.iota {dimensions = array<i32: 1>} : vector<8x8xi32>
    %14 = arith.cmpi sgt, %13, %12 : vector<8x8xi32>
    %15 = arith.extui %14 : vector<8x8xi1> to vector<8x8xi32>
    %16 = arith.sitofp %15 : vector<8x8xi32> to vector<8x8xf32>
    %c0_7 = arith.constant 0 : index
    %c0_8 = arith.constant 0 : index
    %17 = vector.load %arg2[%c0_7, %c0_8] : memref<2x8xf32, #tpu.memory_space<vmem>>, vector<2x8xf32>
    %18 = vector.extract_strided_slice %9 {offsets = [0, 0], sizes = [8, 32], strides = [1, 1]} : vector<16x32xf32> to vector<8x32xf32>
    %19 = vector.extract_strided_slice %10 {offsets = [0, 0], sizes = [8, 32], strides = [1, 1]} : vector<16x32xf32> to vector<8x32xf32>
    %20 = vector.extract_strided_slice %11 {offsets = [0, 0], sizes = [8, 32], strides = [1, 1]} : vector<16x32xf32> to vector<8x32xf32>
    %21 = vector.extract_strided_slice %17 {offsets = [0, 0], sizes = [1, 8], strides = [1, 1]} : vector<2x8xf32> to vector<1x8xf32>
    %22 = vector.broadcast %21 : vector<1x8xf32> to vector<8x8xf32>
    %23 = arith.maximumf %22, %16 : vector<8x8xf32>
    %cst_9 = arith.constant -1.000000e+09 : f32
    %24 = vector.broadcast %cst_9 : f32 to vector<8x8xf32>
    %25 = arith.mulf %23, %24 : vector<8x8xf32>
    %26 = vector.extract_strided_slice %18 {offsets = [0, 0], sizes = [8, 8], strides = [1, 1]} : vector<8x32xf32> to vector<8x8xf32>
    %27 = vector.extract_strided_slice %19 {offsets = [0, 0], sizes = [8, 8], strides = [1, 1]} : vector<8x32xf32> to vector<8x8xf32>
    %28 = arith.truncf %26 : vector<8x8xf32> to vector<8x8xbf16>
    %29 = arith.truncf %27 : vector<8x8xf32> to vector<8x8xbf16>
    %cst_10 = arith.constant dense<0.000000e+00> : vector<8x8xf32>
    %30 = tpu.matmul %28, %29, %cst_10 {dimension_numbers = #tpu.dot_dimension_numbers<[1], [1], [0], [0], [0, 0, 1, 0], [], []>} : vector<8x8xbf16>, vector<8x8xbf16>, vector<8x8xf32> -> vector<8x8xf32>
    %cst_11 = arith.constant 0.353553385 : f32
    %31 = vector.broadcast %cst_11 : f32 to vector<8x8xf32>
    %32 = arith.mulf %30, %31 : vector<8x8xf32>
    %33 = arith.addf %32, %25 : vector<8x8xf32>
    %cst_12 = arith.constant dense<0xFF800000> : vector<8xf32>
    %34 = vector.multi_reduction <maximumf>, %33, %cst_12 [1] : vector<8x8xf32> to vector<8xf32>
    %35 = vector.shape_cast %34 : vector<8xf32> to vector<8x1xf32>
    %36 = vector.broadcast %35 : vector<8x1xf32> to vector<8x8xf32>
    %37 = arith.subf %33, %36 : vector<8x8xf32>
    %38 = math.exp %37 : vector<8x8xf32>
    %cst_13 = arith.constant dense<0.000000e+00> : vector<8xf32>
    %39 = vector.multi_reduction <add>, %38, %cst_13 [1] : vector<8x8xf32> to vector<8xf32>
    %40 = vector.shape_cast %39 : vector<8xf32> to vector<8x1xf32>
    %41 = tpu.reciprocal %40 {approx = true} : vector<8x1xf32> -> vector<8x1xf32>
    %42 = vector.broadcast %41 : vector<8x1xf32> to vector<8x8xf32>
    %43 = arith.mulf %38, %42 : vector<8x8xf32>
    %44 = vector.extract_strided_slice %20 {offsets = [0, 0], sizes = [8, 8], strides = [1, 1]} : vector<8x32xf32> to vector<8x8xf32>
    %45 = arith.truncf %43 : vector<8x8xf32> to vector<8x8xbf16>
    %46 = arith.truncf %44 : vector<8x8xf32> to vector<8x8xbf16>
    %cst_14 = arith.constant dense<0.000000e+00> : vector<8x8xf32>
    %47 = tpu.matmul %45, %46, %cst_14 {dimension_numbers = #tpu.dot_dimension_numbers<[1], [0], [0], [1], [0, 0, 1, 1], [], []>} : vector<8x8xbf16>, vector<8x8xbf16>, vector<8x8xf32> -> vector<8x8xf32>
    %c0_15 = arith.constant 0 : index
    %c0_16 = arith.constant 0 : index
    %48 = vector.load %arg25[%c0_15, %c0_16] : memref<16x32xf32, #tpu.memory_space<vmem>>, vector<8x8xf32>
    tpu.vector_store %arg25[%c0_15, %c0_16], %47 {strides = array<i32>} : memref<16x32xf32, #tpu.memory_space<vmem>>, vector<8x8xf32>,
    %49 = vector.extract_strided_slice %18 {offsets = [0, 8], sizes = [8, 8], strides = [1, 1]} : vector<8x32xf32> to vector<8x8xf32>
    %50 = vector.extract_strided_slice %19 {offsets = [0, 8], sizes = [8, 8], strides = [1, 1]} : vector<8x32xf32> to vector<8x8xf32>
    %51 = arith.truncf %49 : vector<8x8xf32> to vector<8x8xbf16>
    %52 = arith.truncf %50 : vector<8x8xf32> to vector<8x8xbf16>
    %cst_17 = arith.constant dense<0.000000e+00> : vector<8x8xf32>
    %53 = tpu.matmul %51, %52, %cst_17 {dimension_numbers = #tpu.dot_dimension_numbers<[1], [1], [0], [0], [0, 0, 1, 0], [], []>} : vector<8x8xbf16>, vector<8x8xbf16>, vector<8x8xf32> -> vector<8x8xf32>
    %cst_18 = arith.constant 0.353553385 : f32
    %54 = vector.broadcast %cst_18 : f32 to vector<8x8xf32>
    %55 = arith.mulf %53, %54 : vector<8x8xf32>
    %56 = arith.addf %55, %25 : vector<8x8xf32>
    %cst_19 = arith.constant dense<0xFF800000> : vector<8xf32>
    %57 = vector.multi_reduction <maximumf>, %56, %cst_19 [1] : vector<8x8xf32> to vector<8xf32>
    %58 = vector.shape_cast %57 : vector<8xf32> to vector<8x1xf32>
    %59 = vector.broadcast %58 : vector<8x1xf32> to vector<8x8xf32>
    %60 = arith.subf %56, %59 : vector<8x8xf32>
    %61 = math.exp %60 : vector<8x8xf32>
    %cst_20 = arith.constant dense<0.000000e+00> : vector<8xf32>
    %62 = vector.multi_reduction <add>, %61, %cst_20 [1] : vector<8x8xf32> to vector<8xf32>
    %63 = vector.shape_cast %62 : vector<8xf32> to vector<8x1xf32>
    %64 = tpu.reciprocal %63 {approx = true} : vector<8x1xf32> -> vector<8x1xf32>
    %65 = vector.broadcast %64 : vector<8x1xf32> to vector<8x8xf32>
    %66 = arith.mulf %61, %65 : vector<8x8xf32>
    %67 = vector.extract_strided_slice %20 {offsets = [0, 8], sizes = [8, 8], strides = [1, 1]} : vector<8x32xf32> to vector<8x8xf32>
    %68 = arith.truncf %66 : vector<8x8xf32> to vector<8x8xbf16>
    %69 = arith.truncf %67 : vector<8x8xf32> to vector<8x8xbf16>
    %cst_21 = arith.constant dense<0.000000e+00> : vector<8x8xf32>
    %70 = tpu.matmul %68, %69, %cst_21 {dimension_numbers = #tpu.dot_dimension_numbers<[1], [0], [0], [1], [0, 0, 1, 1], [], []>} : vector<8x8xbf16>, vector<8x8xbf16>, vector<8x8xf32> -> vector<8x8xf32>
    %c0_22 = arith.constant 0 : index
    %c8 = arith.constant 8 : index
    %71 = vector.load %arg25[%c0_22, %c8] : memref<16x32xf32, #tpu.memory_space<vmem>>, vector<8x8xf32>
    tpu.vector_store %arg25[%c0_22, %c8], %70 {strides = array<i32>} : memref<16x32xf32, #tpu.memory_space<vmem>>, vector<8x8xf32>,
    %72 = vector.extract_strided_slice %18 {offsets = [0, 16], sizes = [8, 8], strides = [1, 1]} : vector<8x32xf32> to vector<8x8xf32>
    %73 = vector.extract_strided_slice %19 {offsets = [0, 16], sizes = [8, 8], strides = [1, 1]} : vector<8x32xf32> to vector<8x8xf32>
    %74 = arith.truncf %72 : vector<8x8xf32> to vector<8x8xbf16>
    %75 = arith.truncf %73 : vector<8x8xf32> to vector<8x8xbf16>
    %cst_23 = arith.constant dense<0.000000e+00> : vector<8x8xf32>
    %76 = tpu.matmul %74, %75, %cst_23 {dimension_numbers = #tpu.dot_dimension_numbers<[1], [1], [0], [0], [0, 0, 1, 0], [], []>} : vector<8x8xbf16>, vector<8x8xbf16>, vector<8x8xf32> -> vector<8x8xf32>
    %cst_24 = arith.constant 0.353553385 : f32
    %77 = vector.broadcast %cst_24 : f32 to vector<8x8xf32>
    %78 = arith.mulf %76, %77 : vector<8x8xf32>
    %79 = arith.addf %78, %25 : vector<8x8xf32>
    %cst_25 = arith.constant dense<0xFF800000> : vector<8xf32>
    %80 = vector.multi_reduction <maximumf>, %79, %cst_25 [1] : vector<8x8xf32> to vector<8xf32>
    %81 = vector.shape_cast %80 : vector<8xf32> to vector<8x1xf32>
    %82 = vector.broadcast %81 : vector<8x1xf32> to vector<8x8xf32>
    %83 = arith.subf %79, %82 : vector<8x8xf32>
    %84 = math.exp %83 : vector<8x8xf32>
    %cst_26 = arith.constant dense<0.000000e+00> : vector<8xf32>
    %85 = vector.multi_reduction <add>, %84, %cst_26 [1] : vector<8x8xf32> to vector<8xf32>
    %86 = vector.shape_cast %85 : vector<8xf32> to vector<8x1xf32>
    %87 = tpu.reciprocal %86 {approx = true} : vector<8x1xf32> -> vector<8x1xf32>
    %88 = vector.broadcast %87 : vector<8x1xf32> to vector<8x8xf32>
    %89 = arith.mulf %84, %88 : vector<8x8xf32>
    %90 = vector.extract_strided_slice %20 {offsets = [0, 16], sizes = [8, 8], strides = [1, 1]} : vector<8x32xf32> to vector<8x8xf32>
    %91 = arith.truncf %89 : vector<8x8xf32> to vector<8x8xbf16>
    %92 = arith.truncf %90 : vector<8x8xf32> to vector<8x8xbf16>
    %cst_27 = arith.constant dense<0.000000e+00> : vector<8x8xf32>
    %93 = tpu.matmul %91, %92, %cst_27 {dimension_numbers = #tpu.dot_dimension_numbers<[1], [0], [0], [1], [0, 0, 1, 1], [], []>} : vector<8x8xbf16>, vector<8x8xbf16>, vector<8x8xf32> -> vector<8x8xf32>
    %c0_28 = arith.constant 0 : index
    %c16 = arith.constant 16 : index
    %94 = vector.load %arg25[%c0_28, %c16] : memref<16x32xf32, #tpu.memory_space<vmem>>, vector<8x8xf32>
    tpu.vector_store %arg25[%c0_28, %c16], %93 {strides = array<i32>} : memref<16x32xf32, #tpu.memory_space<vmem>>, vector<8x8xf32>,
    %95 = vector.extract_strided_slice %18 {offsets = [0, 24], sizes = [8, 8], strides = [1, 1]} : vector<8x32xf32> to vector<8x8xf32>
    %96 = vector.extract_strided_slice %19 {offsets = [0, 24], sizes = [8, 8], strides = [1, 1]} : vector<8x32xf32> to vector<8x8xf32>
    %97 = arith.truncf %95 : vector<8x8xf32> to vector<8x8xbf16>
    %98 = arith.truncf %96 : vector<8x8xf32> to vector<8x8xbf16>
    %cst_29 = arith.constant dense<0.000000e+00> : vector<8x8xf32>
    %99 = tpu.matmul %97, %98, %cst_29 {dimension_numbers = #tpu.dot_dimension_numbers<[1], [1], [0], [0], [0, 0, 1, 0], [], []>} : vector<8x8xbf16>, vector<8x8xbf16>, vector<8x8xf32> -> vector<8x8xf32>
    %cst_30 = arith.constant 0.353553385 : f32
    %100 = vector.broadcast %cst_30 : f32 to vector<8x8xf32>
    %101 = arith.mulf %99, %100 : vector<8x8xf32>
    %102 = arith.addf %101, %25 : vector<8x8xf32>
    %cst_31 = arith.constant dense<0xFF800000> : vector<8xf32>
    %103 = vector.multi_reduction <maximumf>, %102, %cst_31 [1] : vector<8x8xf32> to vector<8xf32>
    %104 = vector.shape_cast %103 : vector<8xf32> to vector<8x1xf32>
    %105 = vector.broadcast %104 : vector<8x1xf32> to vector<8x8xf32>
    %106 = arith.subf %102, %105 : vector<8x8xf32>
    %107 = math.exp %106 : vector<8x8xf32>
    %cst_32 = arith.constant dense<0.000000e+00> : vector<8xf32>
    %108 = vector.multi_reduction <add>, %107, %cst_32 [1] : vector<8x8xf32> to vector<8xf32>
    %109 = vector.shape_cast %108 : vector<8xf32> to vector<8x1xf32>
    %110 = tpu.reciprocal %109 {approx = true} : vector<8x1xf32> -> vector<8x1xf32>
    %111 = vector.broadcast %110 : vector<8x1xf32> to vector<8x8xf32>
    %112 = arith.mulf %107, %111 : vector<8x8xf32>
    %113 = vector.extract_strided_slice %20 {offsets = [0, 24], sizes = [8, 8], strides = [1, 1]} : vector<8x32xf32> to vector<8x8xf32>
    %114 = arith.truncf %112 : vector<8x8xf32> to vector<8x8xbf16>
    %115 = arith.truncf %113 : vector<8x8xf32> to vector<8x8xbf16>
    %cst_33 = arith.constant dense<0.000000e+00> : vector<8x8xf32>
    %116 = tpu.matmul %114, %115, %cst_33 {dimension_numbers = #tpu.dot_dimension_numbers<[1], [0], [0], [1], [0, 0, 1, 1], [], []>} : vector<8x8xbf16>, vector<8x8xbf16>, vector<8x8xf32> -> vector<8x8xf32>
    %c0_34 = arith.constant 0 : index
    %c24 = arith.constant 24 : index
    %117 = vector.load %arg25[%c0_34, %c24] : memref<16x32xf32, #tpu.memory_space<vmem>>, vector<8x8xf32>
    tpu.vector_store %arg25[%c0_34, %c24], %116 {strides = array<i32>} : memref<16x32xf32, #tpu.memory_space<vmem>>, vector<8x8xf32>,
    %118 = vector.extract_strided_slice %9 {offsets = [8, 0], sizes = [8, 32], strides = [1, 1]} : vector<16x32xf32> to vector<8x32xf32>
    %119 = vector.extract_strided_slice %10 {offsets = [8, 0], sizes = [8, 32], strides = [1, 1]} : vector<16x32xf32> to vector<8x32xf32>
    %120 = vector.extract_strided_slice %11 {offsets = [8, 0], sizes = [8, 32], strides = [1, 1]} : vector<16x32xf32> to vector<8x32xf32>
    %121 = vector.extract_strided_slice %17 {offsets = [1, 0], sizes = [1, 8], strides = [1, 1]} : vector<2x8xf32> to vector<1x8xf32>
    %122 = vector.broadcast %121 : vector<1x8xf32> to vector<8x8xf32>
    %123 = arith.maximumf %122, %16 : vector<8x8xf32>
    %cst_35 = arith.constant -1.000000e+09 : f32
    %124 = vector.broadcast %cst_35 : f32 to vector<8x8xf32>
    %125 = arith.mulf %123, %124 : vector<8x8xf32>
    %126 = vector.extract_strided_slice %118 {offsets = [0, 0], sizes = [8, 8], strides = [1, 1]} : vector<8x32xf32> to vector<8x8xf32>
    %127 = vector.extract_strided_slice %119 {offsets = [0, 0], sizes = [8, 8], strides = [1, 1]} : vector<8x32xf32> to vector<8x8xf32>
    %128 = arith.truncf %126 : vector<8x8xf32> to vector<8x8xbf16>
    %129 = arith.truncf %127 : vector<8x8xf32> to vector<8x8xbf16>
    %cst_36 = arith.constant dense<0.000000e+00> : vector<8x8xf32>
    %130 = tpu.matmul %128, %129, %cst_36 {dimension_numbers = #tpu.dot_dimension_numbers<[1], [1], [0], [0], [0, 0, 1, 0], [], []>} : vector<8x8xbf16>, vector<8x8xbf16>, vector<8x8xf32> -> vector<8x8xf32>
    %cst_37 = arith.constant 0.353553385 : f32
    %131 = vector.broadcast %cst_37 : f32 to vector<8x8xf32>
    %132 = arith.mulf %130, %131 : vector<8x8xf32>
    %133 = arith.addf %132, %125 : vector<8x8xf32>
    %cst_38 = arith.constant dense<0xFF800000> : vector<8xf32>
    %134 = vector.multi_reduction <maximumf>, %133, %cst_38 [1] : vector<8x8xf32> to vector<8xf32>
    %135 = vector.shape_cast %134 : vector<8xf32> to vector<8x1xf32>
    %136 = vector.broadcast %135 : vector<8x1xf32> to vector<8x8xf32>
    %137 = arith.subf %133, %136 : vector<8x8xf32>
    %138 = math.exp %137 : vector<8x8xf32>
    %cst_39 = arith.constant dense<0.000000e+00> : vector<8xf32>
    %139 = vector.multi_reduction <add>, %138, %cst_39 [1] : vector<8x8xf32> to vector<8xf32>
    %140 = vector.shape_cast %139 : vector<8xf32> to vector<8x1xf32>
    %141 = tpu.reciprocal %140 {approx = true} : vector<8x1xf32> -> vector<8x1xf32>
    %142 = vector.broadcast %141 : vector<8x1xf32> to vector<8x8xf32>
    %143 = arith.mulf %138, %142 : vector<8x8xf32>
    %144 = vector.extract_strided_slice %120 {offsets = [0, 0], sizes = [8, 8], strides = [1, 1]} : vector<8x32xf32> to vector<8x8xf32>
    %145 = arith.truncf %143 : vector<8x8xf32> to vector<8x8xbf16>
    %146 = arith.truncf %144 : vector<8x8xf32> to vector<8x8xbf16>
    %cst_40 = arith.constant dense<0.000000e+00> : vector<8x8xf32>
    %147 = tpu.matmul %145, %146, %cst_40 {dimension_numbers = #tpu.dot_dimension_numbers<[1], [0], [0], [1], [0, 0, 1, 1], [], []>} : vector<8x8xbf16>, vector<8x8xbf16>, vector<8x8xf32> -> vector<8x8xf32>
    %c8_41 = arith.constant 8 : index
    %c0_42 = arith.constant 0 : index
    %148 = vector.load %arg25[%c8_41, %c0_42] : memref<16x32xf32, #tpu.memory_space<vmem>>, vector<8x8xf32>
    tpu.vector_store %arg25[%c8_41, %c0_42], %147 {strides = array<i32>} : memref<16x32xf32, #tpu.memory_space<vmem>>, vector<8x8xf32>,
    %149 = vector.extract_strided_slice %118 {offsets = [0, 8], sizes = [8, 8], strides = [1, 1]} : vector<8x32xf32> to vector<8x8xf32>
    %150 = vector.extract_strided_slice %119 {offsets = [0, 8], sizes = [8, 8], strides = [1, 1]} : vector<8x32xf32> to vector<8x8xf32>
    %151 = arith.truncf %149 : vector<8x8xf32> to vector<8x8xbf16>
    %152 = arith.truncf %150 : vector<8x8xf32> to vector<8x8xbf16>
    %cst_43 = arith.constant dense<0.000000e+00> : vector<8x8xf32>
    %153 = tpu.matmul %151, %152, %cst_43 {dimension_numbers = #tpu.dot_dimension_numbers<[1], [1], [0], [0], [0, 0, 1, 0], [], []>} : vector<8x8xbf16>, vector<8x8xbf16>, vector<8x8xf32> -> vector<8x8xf32>
    %cst_44 = arith.constant 0.353553385 : f32
    %154 = vector.broadcast %cst_44 : f32 to vector<8x8xf32>
    %155 = arith.mulf %153, %154 : vector<8x8xf32>
    %156 = arith.addf %155, %125 : vector<8x8xf32>
    %cst_45 = arith.constant dense<0xFF800000> : vector<8xf32>
    %157 = vector.multi_reduction <maximumf>, %156, %cst_45 [1] : vector<8x8xf32> to vector<8xf32>
    %158 = vector.shape_cast %157 : vector<8xf32> to vector<8x1xf32>
    %159 = vector.broadcast %158 : vector<8x1xf32> to vector<8x8xf32>
    %160 = arith.subf %156, %159 : vector<8x8xf32>
    %161 = math.exp %160 : vector<8x8xf32>
    %cst_46 = arith.constant dense<0.000000e+00> : vector<8xf32>
    %162 = vector.multi_reduction <add>, %161, %cst_46 [1] : vector<8x8xf32> to vector<8xf32>
    %163 = vector.shape_cast %162 : vector<8xf32> to vector<8x1xf32>
    %164 = tpu.reciprocal %163 {approx = true} : vector<8x1xf32> -> vector<8x1xf32>
    %165 = vector.broadcast %164 : vector<8x1xf32> to vector<8x8xf32>
    %166 = arith.mulf %161, %165 : vector<8x8xf32>
    %167 = vector.extract_strided_slice %120 {offsets = [0, 8], sizes = [8, 8], strides = [1, 1]} : vector<8x32xf32> to vector<8x8xf32>
    %168 = arith.truncf %166 : vector<8x8xf32> to vector<8x8xbf16>
    %169 = arith.truncf %167 : vector<8x8xf32> to vector<8x8xbf16>
    %cst_47 = arith.constant dense<0.000000e+00> : vector<8x8xf32>
    %170 = tpu.matmul %168, %169, %cst_47 {dimension_numbers = #tpu.dot_dimension_numbers<[1], [0], [0], [1], [0, 0, 1, 1], [], []>} : vector<8x8xbf16>, vector<8x8xbf16>, vector<8x8xf32> -> vector<8x8xf32>
    %c8_48 = arith.constant 8 : index
    %c8_49 = arith.constant 8 : index
    %171 = vector.load %arg25[%c8_48, %c8_49] : memref<16x32xf32, #tpu.memory_space<vmem>>, vector<8x8xf32>
    tpu.vector_store %arg25[%c8_48, %c8_49], %170 {strides = array<i32>} : memref<16x32xf32, #tpu.memory_space<vmem>>, vector<8x8xf32>,
    %172 = vector.extract_strided_slice %118 {offsets = [0, 16], sizes = [8, 8], strides = [1, 1]} : vector<8x32xf32> to vector<8x8xf32>
    %173 = vector.extract_strided_slice %119 {offsets = [0, 16], sizes = [8, 8], strides = [1, 1]} : vector<8x32xf32> to vector<8x8xf32>
    %174 = arith.truncf %172 : vector<8x8xf32> to vector<8x8xbf16>
    %175 = arith.truncf %173 : vector<8x8xf32> to vector<8x8xbf16>
    %cst_50 = arith.constant dense<0.000000e+00> : vector<8x8xf32>
    %176 = tpu.matmul %174, %175, %cst_50 {dimension_numbers = #tpu.dot_dimension_numbers<[1], [1], [0], [0], [0, 0, 1, 0], [], []>} : vector<8x8xbf16>, vector<8x8xbf16>, vector<8x8xf32> -> vector<8x8xf32>
    %cst_51 = arith.constant 0.353553385 : f32
    %177 = vector.broadcast %cst_51 : f32 to vector<8x8xf32>
    %178 = arith.mulf %176, %177 : vector<8x8xf32>
    %179 = arith.addf %178, %125 : vector<8x8xf32>
    %cst_52 = arith.constant dense<0xFF800000> : vector<8xf32>
    %180 = vector.multi_reduction <maximumf>, %179, %cst_52 [1] : vector<8x8xf32> to vector<8xf32>
    %181 = vector.shape_cast %180 : vector<8xf32> to vector<8x1xf32>
    %182 = vector.broadcast %181 : vector<8x1xf32> to vector<8x8xf32>
    %183 = arith.subf %179, %182 : vector<8x8xf32>
    %184 = math.exp %183 : vector<8x8xf32>
    %cst_53 = arith.constant dense<0.000000e+00> : vector<8xf32>
    %185 = vector.multi_reduction <add>, %184, %cst_53 [1] : vector<8x8xf32> to vector<8xf32>
    %186 = vector.shape_cast %185 : vector<8xf32> to vector<8x1xf32>
    %187 = tpu.reciprocal %186 {approx = true} : vector<8x1xf32> -> vector<8x1xf32>
    %188 = vector.broadcast %187 : vector<8x1xf32> to vector<8x8xf32>
    %189 = arith.mulf %184, %188 : vector<8x8xf32>
    %190 = vector.extract_strided_slice %120 {offsets = [0, 16], sizes = [8, 8], strides = [1, 1]} : vector<8x32xf32> to vector<8x8xf32>
    %191 = arith.truncf %189 : vector<8x8xf32> to vector<8x8xbf16>
    %192 = arith.truncf %190 : vector<8x8xf32> to vector<8x8xbf16>
    %cst_54 = arith.constant dense<0.000000e+00> : vector<8x8xf32>
    %193 = tpu.matmul %191, %192, %cst_54 {dimension_numbers = #tpu.dot_dimension_numbers<[1], [0], [0], [1], [0, 0, 1, 1], [], []>} : vector<8x8xbf16>, vector<8x8xbf16>, vector<8x8xf32> -> vector<8x8xf32>
    %c8_55 = arith.constant 8 : index
    %c16_56 = arith.constant 16 : index
    %194 = vector.load %arg25[%c8_55, %c16_56] : memref<16x32xf32, #tpu.memory_space<vmem>>, vector<8x8xf32>
    tpu.vector_store %arg25[%c8_55, %c16_56], %193 {strides = array<i32>} : memref<16x32xf32, #tpu.memory_space<vmem>>, vector<8x8xf32>,
    %195 = vector.extract_strided_slice %118 {offsets = [0, 24], sizes = [8, 8], strides = [1, 1]} : vector<8x32xf32> to vector<8x8xf32>
    %196 = vector.extract_strided_slice %119 {offsets = [0, 24], sizes = [8, 8], strides = [1, 1]} : vector<8x32xf32> to vector<8x8xf32>
    %197 = arith.truncf %195 : vector<8x8xf32> to vector<8x8xbf16>
    %198 = arith.truncf %196 : vector<8x8xf32> to vector<8x8xbf16>
    %cst_57 = arith.constant dense<0.000000e+00> : vector<8x8xf32>
    %199 = tpu.matmul %197, %198, %cst_57 {dimension_numbers = #tpu.dot_dimension_numbers<[1], [1], [0], [0], [0, 0, 1, 0], [], []>} : vector<8x8xbf16>, vector<8x8xbf16>, vector<8x8xf32> -> vector<8x8xf32>
    %cst_58 = arith.constant 0.353553385 : f32
    %200 = vector.broadcast %cst_58 : f32 to vector<8x8xf32>
    %201 = arith.mulf %199, %200 : vector<8x8xf32>
    %202 = arith.addf %201, %125 : vector<8x8xf32>
    %cst_59 = arith.constant dense<0xFF800000> : vector<8xf32>
    %203 = vector.multi_reduction <maximumf>, %202, %cst_59 [1] : vector<8x8xf32> to vector<8xf32>
    %204 = vector.shape_cast %203 : vector<8xf32> to vector<8x1xf32>
    %205 = vector.broadcast %204 : vector<8x1xf32> to vector<8x8xf32>
    %206 = arith.subf %202, %205 : vector<8x8xf32>
    %207 = math.exp %206 : vector<8x8xf32>
    %cst_60 = arith.constant dense<0.000000e+00> : vector<8xf32>
    %208 = vector.multi_reduction <add>, %207, %cst_60 [1] : vector<8x8xf32> to vector<8xf32>
    %209 = vector.shape_cast %208 : vector<8xf32> to vector<8x1xf32>
    %210 = tpu.reciprocal %209 {approx = true} : vector<8x1xf32> -> vector<8x1xf32>
    %211 = vector.broadcast %210 : vector<8x1xf32> to vector<8x8xf32>
    %212 = arith.mulf %207, %211 : vector<8x8xf32>
    %213 = vector.extract_strided_slice %120 {offsets = [0, 24], sizes = [8, 8], strides = [1, 1]} : vector<8x32xf32> to vector<8x8xf32>
    %214 = arith.truncf %212 : vector<8x8xf32> to vector<8x8xbf16>
    %215 = arith.truncf %213 : vector<8x8xf32> to vector<8x8xbf16>
    %cst_61 = arith.constant dense<0.000000e+00> : vector<8x8xf32>
    %216 = tpu.matmul %214, %215, %cst_61 {dimension_numbers = #tpu.dot_dimension_numbers<[1], [0], [0], [1], [0, 0, 1, 1], [], []>} : vector<8x8xbf16>, vector<8x8xbf16>, vector<8x8xf32> -> vector<8x8xf32>
    %c8_62 = arith.constant 8 : index
    %c24_63 = arith.constant 24 : index
    %217 = vector.load %arg25[%c8_62, %c24_63] : memref<16x32xf32, #tpu.memory_space<vmem>>, vector<8x8xf32>
    tpu.vector_store %arg25[%c8_62, %c24_63], %216 {strides = array<i32>} : memref<16x32xf32, #tpu.memory_space<vmem>>, vector<8x8xf32>,
    %c0_64 = arith.constant 0 : index
    %c0_65 = arith.constant 0 : index
    %218 = vector.load %arg25[%c0_64, %c0_65] : memref<16x32xf32, #tpu.memory_space<vmem>>, vector<16x32xf32>
    %c0_66 = arith.constant 0 : index
    %c0_67 = arith.constant 0 : index
    %219 = vector.load %arg6[%c0_66, %c0_67] : memref<32x32xf32, #tpu.memory_space<vmem>>, vector<32x32xf32>
    %220 = arith.truncf %218 : vector<16x32xf32> to vector<16x32xbf16>
    %221 = arith.truncf %219 : vector<32x32xf32> to vector<32x32xbf16>
    %cst_68 = arith.constant dense<0.000000e+00> : vector<16x32xf32>
    %222 = tpu.matmul %220, %221, %cst_68 {dimension_numbers = #tpu.dot_dimension_numbers<[1], [0], [0], [1], [0, 0, 1, 1], [], []>} : vector<16x32xbf16>, vector<32x32xbf16>, vector<16x32xf32> -> vector<16x32xf32>
    %c0_69 = arith.constant 0 : index
    %c0_70 = arith.constant 0 : index
    %223 = vector.load %arg7[%c0_69, %c0_70] : memref<1x32xf32, #tpu.memory_space<vmem>>, vector<1x32xf32>
    %224 = vector.broadcast %223 : vector<1x32xf32> to vector<16x32xf32>
    %225 = arith.addf %222, %224 : vector<16x32xf32>
    %c0_71 = arith.constant 0 : index
    %c0_72 = arith.constant 0 : index
    %226 = vector.load %arg8[%c0_71, %c0_72] : memref<1x32xf32, #tpu.memory_space<vmem>>, vector<1x32xf32>
    %c0_73 = arith.constant 0 : index
    %c0_74 = arith.constant 0 : index
    %227 = vector.load %arg9[%c0_73, %c0_74] : memref<1x32xf32, #tpu.memory_space<vmem>>, vector<1x32xf32>
    %228 = arith.addf %0, %225 : vector<16x32xf32>
    %cst_75 = arith.constant dense<0.000000e+00> : vector<16xf32>
    %229 = vector.multi_reduction <add>, %228, %cst_75 [1] : vector<16x32xf32> to vector<16xf32>
    %230 = vector.shape_cast %229 : vector<16xf32> to vector<16x1xf32>
    %cst_76 = arith.constant 3.200000e+01 : f32
    %231 = vector.broadcast %cst_76 : f32 to vector<16x1xf32>
    %232 = arith.divf %230, %231 : vector<16x1xf32>
    %233 = vector.broadcast %232 : vector<16x1xf32> to vector<16x32xf32>
    %234 = arith.subf %228, %233 : vector<16x32xf32>
    %235 = arith.mulf %234, %234 : vector<16x32xf32>
    %cst_77 = arith.constant dense<0.000000e+00> : vector<16xf32>
    %236 = vector.multi_reduction <add>, %235, %cst_77 [1] : vector<16x32xf32> to vector<16xf32>
    %237 = vector.shape_cast %236 : vector<16xf32> to vector<16x1xf32>
    %cst_78 = arith.constant 3.200000e+01 : f32
    %238 = vector.broadcast %cst_78 : f32 to vector<16x1xf32>
    %239 = arith.divf %237, %238 : vector<16x1xf32>
    %240 = vector.broadcast %232 : vector<16x1xf32> to vector<16x32xf32>
    %241 = arith.subf %228, %240 : vector<16x32xf32>
    %cst_79 = arith.constant 9.99999974E-6 : f32
    %242 = vector.broadcast %cst_79 : f32 to vector<16x1xf32>
    %243 = arith.addf %239, %242 : vector<16x1xf32>
    %244 = math.rsqrt %243 : vector<16x1xf32>
    %245 = vector.broadcast %244 : vector<16x1xf32> to vector<16x32xf32>
    %246 = arith.mulf %241, %245 : vector<16x32xf32>
    %247 = vector.broadcast %226 : vector<1x32xf32> to vector<16x32xf32>
    %248 = arith.mulf %246, %247 : vector<16x32xf32>
    %249 = vector.broadcast %227 : vector<1x32xf32> to vector<16x32xf32>
    %250 = arith.addf %248, %249 : vector<16x32xf32>
    %c0_80 = arith.constant 0 : index
    %c0_81 = arith.constant 0 : index
    %251 = vector.load %arg10[%c0_80, %c0_81] : memref<32x32xf32, #tpu.memory_space<vmem>>, vector<32x32xf32>
    %252 = arith.truncf %250 : vector<16x32xf32> to vector<16x32xbf16>
    %253 = arith.truncf %251 : vector<32x32xf32> to vector<32x32xbf16>
    %cst_82 = arith.constant dense<0.000000e+00> : vector<16x32xf32>
    %254 = tpu.matmul %252, %253, %cst_82 {dimension_numbers = #tpu.dot_dimension_numbers<[1], [0], [0], [1], [0, 0, 1, 1], [], []>} : vector<16x32xbf16>, vector<32x32xbf16>, vector<16x32xf32> -> vector<16x32xf32>
    %c0_83 = arith.constant 0 : index
    %c0_84 = arith.constant 0 : index
    %255 = vector.load %arg11[%c0_83, %c0_84] : memref<1x32xf32, #tpu.memory_space<vmem>>, vector<1x32xf32>
    %256 = vector.broadcast %255 : vector<1x32xf32> to vector<16x32xf32>
    %257 = arith.addf %254, %256 : vector<16x32xf32>
    %c0_85 = arith.constant 0 : index
    %c0_86 = arith.constant 0 : index
    %258 = vector.load %arg12[%c0_85, %c0_86] : memref<32x64xf32, #tpu.memory_space<vmem>>, vector<32x64xf32>
    %259 = arith.truncf %1 : vector<16x32xf32> to vector<16x32xbf16>
    %260 = arith.truncf %258 : vector<32x64xf32> to vector<32x64xbf16>
    %cst_87 = arith.constant dense<0.000000e+00> : vector<16x64xf32>
    %261 = tpu.matmul %259, %260, %cst_87 {dimension_numbers = #tpu.dot_dimension_numbers<[1], [0], [0], [1], [0, 0, 1, 1], [], []>} : vector<16x32xbf16>, vector<32x64xbf16>, vector<16x64xf32> -> vector<16x64xf32>
    %c0_88 = arith.constant 0 : index
    %c0_89 = arith.constant 0 : index
    %262 = vector.load %arg13[%c0_88, %c0_89] : memref<1x64xf32, #tpu.memory_space<vmem>>, vector<1x64xf32>
    %263 = vector.broadcast %262 : vector<1x64xf32> to vector<16x64xf32>
    %264 = arith.addf %261, %263 : vector<16x64xf32>
    %265 = vector.extract_strided_slice %264 {offsets = [0, 0], sizes = [16, 32], strides = [1, 1]} : vector<16x64xf32> to vector<16x32xf32>
    %266 = vector.extract_strided_slice %264 {offsets = [0, 32], sizes = [16, 32], strides = [1, 1]} : vector<16x64xf32> to vector<16x32xf32>
    %c0_90 = arith.constant 0 : index
    %c0_91 = arith.constant 0 : index
    %267 = vector.load %arg3[%c0_90, %c0_91] : memref<2x8xf32, #tpu.memory_space<vmem>>, vector<2x8xf32>
    %268 = vector.extract_strided_slice %257 {offsets = [0, 0], sizes = [8, 32], strides = [1, 1]} : vector<16x32xf32> to vector<8x32xf32>
    %269 = vector.extract_strided_slice %265 {offsets = [0, 0], sizes = [8, 32], strides = [1, 1]} : vector<16x32xf32> to vector<8x32xf32>
    %270 = vector.extract_strided_slice %266 {offsets = [0, 0], sizes = [8, 32], strides = [1, 1]} : vector<16x32xf32> to vector<8x32xf32>
    %271 = vector.extract_strided_slice %267 {offsets = [0, 0], sizes = [1, 8], strides = [1, 1]} : vector<2x8xf32> to vector<1x8xf32>
    %cst_92 = arith.constant -1.000000e+09 : f32
    %272 = vector.broadcast %cst_92 : f32 to vector<1x8xf32>
    %273 = arith.mulf %271, %272 : vector<1x8xf32>
    %274 = vector.extract_strided_slice %268 {offsets = [0, 0], sizes = [8, 8], strides = [1, 1]} : vector<8x32xf32> to vector<8x8xf32>
    %275 = vector.extract_strided_slice %269 {offsets = [0, 0], sizes = [8, 8], strides = [1, 1]} : vector<8x32xf32> to vector<8x8xf32>
    %276 = arith.truncf %274 : vector<8x8xf32> to vector<8x8xbf16>
    %277 = arith.truncf %275 : vector<8x8xf32> to vector<8x8xbf16>
    %cst_93 = arith.constant dense<0.000000e+00> : vector<8x8xf32>
    %278 = tpu.matmul %276, %277, %cst_93 {dimension_numbers = #tpu.dot_dimension_numbers<[1], [1], [0], [0], [0, 0, 1, 0], [], []>} : vector<8x8xbf16>, vector<8x8xbf16>, vector<8x8xf32> -> vector<8x8xf32>
    %cst_94 = arith.constant 0.353553385 : f32
    %279 = vector.broadcast %cst_94 : f32 to vector<8x8xf32>
    %280 = arith.mulf %278, %279 : vector<8x8xf32>
    %281 = vector.broadcast %273 : vector<1x8xf32> to vector<8x8xf32>
    %282 = arith.addf %280, %281 : vector<8x8xf32>
    %cst_95 = arith.constant dense<0xFF800000> : vector<8xf32>
    %283 = vector.multi_reduction <maximumf>, %282, %cst_95 [1] : vector<8x8xf32> to vector<8xf32>
    %284 = vector.shape_cast %283 : vector<8xf32> to vector<8x1xf32>
    %285 = vector.broadcast %284 : vector<8x1xf32> to vector<8x8xf32>
    %286 = arith.subf %282, %285 : vector<8x8xf32>
    %287 = math.exp %286 : vector<8x8xf32>
    %cst_96 = arith.constant dense<0.000000e+00> : vector<8xf32>
    %288 = vector.multi_reduction <add>, %287, %cst_96 [1] : vector<8x8xf32> to vector<8xf32>
    %289 = vector.shape_cast %288 : vector<8xf32> to vector<8x1xf32>
    %290 = tpu.reciprocal %289 {approx = true} : vector<8x1xf32> -> vector<8x1xf32>
    %291 = vector.broadcast %290 : vector<8x1xf32> to vector<8x8xf32>
    %292 = arith.mulf %287, %291 : vector<8x8xf32>
    %293 = vector.extract_strided_slice %270 {offsets = [0, 0], sizes = [8, 8], strides = [1, 1]} : vector<8x32xf32> to vector<8x8xf32>
    %294 = arith.truncf %292 : vector<8x8xf32> to vector<8x8xbf16>
    %295 = arith.truncf %293 : vector<8x8xf32> to vector<8x8xbf16>
    %cst_97 = arith.constant dense<0.000000e+00> : vector<8x8xf32>
    %296 = tpu.matmul %294, %295, %cst_97 {dimension_numbers = #tpu.dot_dimension_numbers<[1], [0], [0], [1], [0, 0, 1, 1], [], []>} : vector<8x8xbf16>, vector<8x8xbf16>, vector<8x8xf32> -> vector<8x8xf32>
    %c0_98 = arith.constant 0 : index
    %c0_99 = arith.constant 0 : index
    %297 = vector.load %arg25[%c0_98, %c0_99] : memref<16x32xf32, #tpu.memory_space<vmem>>, vector<8x8xf32>
    tpu.vector_store %arg25[%c0_98, %c0_99], %296 {strides = array<i32>} : memref<16x32xf32, #tpu.memory_space<vmem>>, vector<8x8xf32>,
    %298 = vector.extract_strided_slice %268 {offsets = [0, 8], sizes = [8, 8], strides = [1, 1]} : vector<8x32xf32> to vector<8x8xf32>
    %299 = vector.extract_strided_slice %269 {offsets = [0, 8], sizes = [8, 8], strides = [1, 1]} : vector<8x32xf32> to vector<8x8xf32>
    %300 = arith.truncf %298 : vector<8x8xf32> to vector<8x8xbf16>
    %301 = arith.truncf %299 : vector<8x8xf32> to vector<8x8xbf16>
    %cst_100 = arith.constant dense<0.000000e+00> : vector<8x8xf32>
    %302 = tpu.matmul %300, %301, %cst_100 {dimension_numbers = #tpu.dot_dimension_numbers<[1], [1], [0], [0], [0, 0, 1, 0], [], []>} : vector<8x8xbf16>, vector<8x8xbf16>, vector<8x8xf32> -> vector<8x8xf32>
    %cst_101 = arith.constant 0.353553385 : f32
    %303 = vector.broadcast %cst_101 : f32 to vector<8x8xf32>
    %304 = arith.mulf %302, %303 : vector<8x8xf32>
    %305 = vector.broadcast %273 : vector<1x8xf32> to vector<8x8xf32>
    %306 = arith.addf %304, %305 : vector<8x8xf32>
    %cst_102 = arith.constant dense<0xFF800000> : vector<8xf32>
    %307 = vector.multi_reduction <maximumf>, %306, %cst_102 [1] : vector<8x8xf32> to vector<8xf32>
    %308 = vector.shape_cast %307 : vector<8xf32> to vector<8x1xf32>
    %309 = vector.broadcast %308 : vector<8x1xf32> to vector<8x8xf32>
    %310 = arith.subf %306, %309 : vector<8x8xf32>
    %311 = math.exp %310 : vector<8x8xf32>
    %cst_103 = arith.constant dense<0.000000e+00> : vector<8xf32>
    %312 = vector.multi_reduction <add>, %311, %cst_103 [1] : vector<8x8xf32> to vector<8xf32>
    %313 = vector.shape_cast %312 : vector<8xf32> to vector<8x1xf32>
    %314 = tpu.reciprocal %313 {approx = true} : vector<8x1xf32> -> vector<8x1xf32>
    %315 = vector.broadcast %314 : vector<8x1xf32> to vector<8x8xf32>
    %316 = arith.mulf %311, %315 : vector<8x8xf32>
    %317 = vector.extract_strided_slice %270 {offsets = [0, 8], sizes = [8, 8], strides = [1, 1]} : vector<8x32xf32> to vector<8x8xf32>
    %318 = arith.truncf %316 : vector<8x8xf32> to vector<8x8xbf16>
    %319 = arith.truncf %317 : vector<8x8xf32> to vector<8x8xbf16>
    %cst_104 = arith.constant dense<0.000000e+00> : vector<8x8xf32>
    %320 = tpu.matmul %318, %319, %cst_104 {dimension_numbers = #tpu.dot_dimension_numbers<[1], [0], [0], [1], [0, 0, 1, 1], [], []>} : vector<8x8xbf16>, vector<8x8xbf16>, vector<8x8xf32> -> vector<8x8xf32>
    %c0_105 = arith.constant 0 : index
    %c8_106 = arith.constant 8 : index
    %321 = vector.load %arg25[%c0_105, %c8_106] : memref<16x32xf32, #tpu.memory_space<vmem>>, vector<8x8xf32>
    tpu.vector_store %arg25[%c0_105, %c8_106], %320 {strides = array<i32>} : memref<16x32xf32, #tpu.memory_space<vmem>>, vector<8x8xf32>,
    %322 = vector.extract_strided_slice %268 {offsets = [0, 16], sizes = [8, 8], strides = [1, 1]} : vector<8x32xf32> to vector<8x8xf32>
    %323 = vector.extract_strided_slice %269 {offsets = [0, 16], sizes = [8, 8], strides = [1, 1]} : vector<8x32xf32> to vector<8x8xf32>
    %324 = arith.truncf %322 : vector<8x8xf32> to vector<8x8xbf16>
    %325 = arith.truncf %323 : vector<8x8xf32> to vector<8x8xbf16>
    %cst_107 = arith.constant dense<0.000000e+00> : vector<8x8xf32>
    %326 = tpu.matmul %324, %325, %cst_107 {dimension_numbers = #tpu.dot_dimension_numbers<[1], [1], [0], [0], [0, 0, 1, 0], [], []>} : vector<8x8xbf16>, vector<8x8xbf16>, vector<8x8xf32> -> vector<8x8xf32>
    %cst_108 = arith.constant 0.353553385 : f32
    %327 = vector.broadcast %cst_108 : f32 to vector<8x8xf32>
    %328 = arith.mulf %326, %327 : vector<8x8xf32>
    %329 = vector.broadcast %273 : vector<1x8xf32> to vector<8x8xf32>
    %330 = arith.addf %328, %329 : vector<8x8xf32>
    %cst_109 = arith.constant dense<0xFF800000> : vector<8xf32>
    %331 = vector.multi_reduction <maximumf>, %330, %cst_109 [1] : vector<8x8xf32> to vector<8xf32>
    %332 = vector.shape_cast %331 : vector<8xf32> to vector<8x1xf32>
    %333 = vector.broadcast %332 : vector<8x1xf32> to vector<8x8xf32>
    %334 = arith.subf %330, %333 : vector<8x8xf32>
    %335 = math.exp %334 : vector<8x8xf32>
    %cst_110 = arith.constant dense<0.000000e+00> : vector<8xf32>
    %336 = vector.multi_reduction <add>, %335, %cst_110 [1] : vector<8x8xf32> to vector<8xf32>
    %337 = vector.shape_cast %336 : vector<8xf32> to vector<8x1xf32>
    %338 = tpu.reciprocal %337 {approx = true} : vector<8x1xf32> -> vector<8x1xf32>
    %339 = vector.broadcast %338 : vector<8x1xf32> to vector<8x8xf32>
    %340 = arith.mulf %335, %339 : vector<8x8xf32>
    %341 = vector.extract_strided_slice %270 {offsets = [0, 16], sizes = [8, 8], strides = [1, 1]} : vector<8x32xf32> to vector<8x8xf32>
    %342 = arith.truncf %340 : vector<8x8xf32> to vector<8x8xbf16>
    %343 = arith.truncf %341 : vector<8x8xf32> to vector<8x8xbf16>
    %cst_111 = arith.constant dense<0.000000e+00> : vector<8x8xf32>
    %344 = tpu.matmul %342, %343, %cst_111 {dimension_numbers = #tpu.dot_dimension_numbers<[1], [0], [0], [1], [0, 0, 1, 1], [], []>} : vector<8x8xbf16>, vector<8x8xbf16>, vector<8x8xf32> -> vector<8x8xf32>
    %c0_112 = arith.constant 0 : index
    %c16_113 = arith.constant 16 : index
    %345 = vector.load %arg25[%c0_112, %c16_113] : memref<16x32xf32, #tpu.memory_space<vmem>>, vector<8x8xf32>
    tpu.vector_store %arg25[%c0_112, %c16_113], %344 {strides = array<i32>} : memref<16x32xf32, #tpu.memory_space<vmem>>, vector<8x8xf32>,
    %346 = vector.extract_strided_slice %268 {offsets = [0, 24], sizes = [8, 8], strides = [1, 1]} : vector<8x32xf32> to vector<8x8xf32>
    %347 = vector.extract_strided_slice %269 {offsets = [0, 24], sizes = [8, 8], strides = [1, 1]} : vector<8x32xf32> to vector<8x8xf32>
    %348 = arith.truncf %346 : vector<8x8xf32> to vector<8x8xbf16>
    %349 = arith.truncf %347 : vector<8x8xf32> to vector<8x8xbf16>
    %cst_114 = arith.constant dense<0.000000e+00> : vector<8x8xf32>
    %350 = tpu.matmul %348, %349, %cst_114 {dimension_numbers = #tpu.dot_dimension_numbers<[1], [1], [0], [0], [0, 0, 1, 0], [], []>} : vector<8x8xbf16>, vector<8x8xbf16>, vector<8x8xf32> -> vector<8x8xf32>
    %cst_115 = arith.constant 0.353553385 : f32
    %351 = vector.broadcast %cst_115 : f32 to vector<8x8xf32>
    %352 = arith.mulf %350, %351 : vector<8x8xf32>
    %353 = vector.broadcast %273 : vector<1x8xf32> to vector<8x8xf32>
    %354 = arith.addf %352, %353 : vector<8x8xf32>
    %cst_116 = arith.constant dense<0xFF800000> : vector<8xf32>
    %355 = vector.multi_reduction <maximumf>, %354, %cst_116 [1] : vector<8x8xf32> to vector<8xf32>
    %356 = vector.shape_cast %355 : vector<8xf32> to vector<8x1xf32>
    %357 = vector.broadcast %356 : vector<8x1xf32> to vector<8x8xf32>
    %358 = arith.subf %354, %357 : vector<8x8xf32>
    %359 = math.exp %358 : vector<8x8xf32>
    %cst_117 = arith.constant dense<0.000000e+00> : vector<8xf32>
    %360 = vector.multi_reduction <add>, %359, %cst_117 [1] : vector<8x8xf32> to vector<8xf32>
    %361 = vector.shape_cast %360 : vector<8xf32> to vector<8x1xf32>
    %362 = tpu.reciprocal %361 {approx = true} : vector<8x1xf32> -> vector<8x1xf32>
    %363 = vector.broadcast %362 : vector<8x1xf32> to vector<8x8xf32>
    %364 = arith.mulf %359, %363 : vector<8x8xf32>
    %365 = vector.extract_strided_slice %270 {offsets = [0, 24], sizes = [8, 8], strides = [1, 1]} : vector<8x32xf32> to vector<8x8xf32>
    %366 = arith.truncf %364 : vector<8x8xf32> to vector<8x8xbf16>
    %367 = arith.truncf %365 : vector<8x8xf32> to vector<8x8xbf16>
    %cst_118 = arith.constant dense<0.000000e+00> : vector<8x8xf32>
    %368 = tpu.matmul %366, %367, %cst_118 {dimension_numbers = #tpu.dot_dimension_numbers<[1], [0], [0], [1], [0, 0, 1, 1], [], []>} : vector<8x8xbf16>, vector<8x8xbf16>, vector<8x8xf32> -> vector<8x8xf32>
    %c0_119 = arith.constant 0 : index
    %c24_120 = arith.constant 24 : index
    %369 = vector.load %arg25[%c0_119, %c24_120] : memref<16x32xf32, #tpu.memory_space<vmem>>, vector<8x8xf32>
    tpu.vector_store %arg25[%c0_119, %c24_120], %368 {strides = array<i32>} : memref<16x32xf32, #tpu.memory_space<vmem>>, vector<8x8xf32>,
    %370 = vector.extract_strided_slice %257 {offsets = [8, 0], sizes = [8, 32], strides = [1, 1]} : vector<16x32xf32> to vector<8x32xf32>
    %371 = vector.extract_strided_slice %265 {offsets = [8, 0], sizes = [8, 32], strides = [1, 1]} : vector<16x32xf32> to vector<8x32xf32>
    %372 = vector.extract_strided_slice %266 {offsets = [8, 0], sizes = [8, 32], strides = [1, 1]} : vector<16x32xf32> to vector<8x32xf32>
    %373 = vector.extract_strided_slice %267 {offsets = [1, 0], sizes = [1, 8], strides = [1, 1]} : vector<2x8xf32> to vector<1x8xf32>
    %cst_121 = arith.constant -1.000000e+09 : f32
    %374 = vector.broadcast %cst_121 : f32 to vector<1x8xf32>
    %375 = arith.mulf %373, %374 : vector<1x8xf32>
    %376 = vector.extract_strided_slice %370 {offsets = [0, 0], sizes = [8, 8], strides = [1, 1]} : vector<8x32xf32> to vector<8x8xf32>
    %377 = vector.extract_strided_slice %371 {offsets = [0, 0], sizes = [8, 8], strides = [1, 1]} : vector<8x32xf32> to vector<8x8xf32>
    %378 = arith.truncf %376 : vector<8x8xf32> to vector<8x8xbf16>
    %379 = arith.truncf %377 : vector<8x8xf32> to vector<8x8xbf16>
    %cst_122 = arith.constant dense<0.000000e+00> : vector<8x8xf32>
    %380 = tpu.matmul %378, %379, %cst_122 {dimension_numbers = #tpu.dot_dimension_numbers<[1], [1], [0], [0], [0, 0, 1, 0], [], []>} : vector<8x8xbf16>, vector<8x8xbf16>, vector<8x8xf32> -> vector<8x8xf32>
    %cst_123 = arith.constant 0.353553385 : f32
    %381 = vector.broadcast %cst_123 : f32 to vector<8x8xf32>
    %382 = arith.mulf %380, %381 : vector<8x8xf32>
    %383 = vector.broadcast %375 : vector<1x8xf32> to vector<8x8xf32>
    %384 = arith.addf %382, %383 : vector<8x8xf32>
    %cst_124 = arith.constant dense<0xFF800000> : vector<8xf32>
    %385 = vector.multi_reduction <maximumf>, %384, %cst_124 [1] : vector<8x8xf32> to vector<8xf32>
    %386 = vector.shape_cast %385 : vector<8xf32> to vector<8x1xf32>
    %387 = vector.broadcast %386 : vector<8x1xf32> to vector<8x8xf32>
    %388 = arith.subf %384, %387 : vector<8x8xf32>
    %389 = math.exp %388 : vector<8x8xf32>
    %cst_125 = arith.constant dense<0.000000e+00> : vector<8xf32>
    %390 = vector.multi_reduction <add>, %389, %cst_125 [1] : vector<8x8xf32> to vector<8xf32>
    %391 = vector.shape_cast %390 : vector<8xf32> to vector<8x1xf32>
    %392 = tpu.reciprocal %391 {approx = true} : vector<8x1xf32> -> vector<8x1xf32>
    %393 = vector.broadcast %392 : vector<8x1xf32> to vector<8x8xf32>
    %394 = arith.mulf %389, %393 : vector<8x8xf32>
    %395 = vector.extract_strided_slice %372 {offsets = [0, 0], sizes = [8, 8], strides = [1, 1]} : vector<8x32xf32> to vector<8x8xf32>
    %396 = arith.truncf %394 : vector<8x8xf32> to vector<8x8xbf16>
    %397 = arith.truncf %395 : vector<8x8xf32> to vector<8x8xbf16>
    %cst_126 = arith.constant dense<0.000000e+00> : vector<8x8xf32>
    %398 = tpu.matmul %396, %397, %cst_126 {dimension_numbers = #tpu.dot_dimension_numbers<[1], [0], [0], [1], [0, 0, 1, 1], [], []>} : vector<8x8xbf16>, vector<8x8xbf16>, vector<8x8xf32> -> vector<8x8xf32>
    %c8_127 = arith.constant 8 : index
    %c0_128 = arith.constant 0 : index
    %399 = vector.load %arg25[%c8_127, %c0_128] : memref<16x32xf32, #tpu.memory_space<vmem>>, vector<8x8xf32>
    tpu.vector_store %arg25[%c8_127, %c0_128], %398 {strides = array<i32>} : memref<16x32xf32, #tpu.memory_space<vmem>>, vector<8x8xf32>,
    %400 = vector.extract_strided_slice %370 {offsets = [0, 8], sizes = [8, 8], strides = [1, 1]} : vector<8x32xf32> to vector<8x8xf32>
    %401 = vector.extract_strided_slice %371 {offsets = [0, 8], sizes = [8, 8], strides = [1, 1]} : vector<8x32xf32> to vector<8x8xf32>
    %402 = arith.truncf %400 : vector<8x8xf32> to vector<8x8xbf16>
    %403 = arith.truncf %401 : vector<8x8xf32> to vector<8x8xbf16>
    %cst_129 = arith.constant dense<0.000000e+00> : vector<8x8xf32>
    %404 = tpu.matmul %402, %403, %cst_129 {dimension_numbers = #tpu.dot_dimension_numbers<[1], [1], [0], [0], [0, 0, 1, 0], [], []>} : vector<8x8xbf16>, vector<8x8xbf16>, vector<8x8xf32> -> vector<8x8xf32>
    %cst_130 = arith.constant 0.353553385 : f32
    %405 = vector.broadcast %cst_130 : f32 to vector<8x8xf32>
    %406 = arith.mulf %404, %405 : vector<8x8xf32>
    %407 = vector.broadcast %375 : vector<1x8xf32> to vector<8x8xf32>
    %408 = arith.addf %406, %407 : vector<8x8xf32>
    %cst_131 = arith.constant dense<0xFF800000> : vector<8xf32>
    %409 = vector.multi_reduction <maximumf>, %408, %cst_131 [1] : vector<8x8xf32> to vector<8xf32>
    %410 = vector.shape_cast %409 : vector<8xf32> to vector<8x1xf32>
    %411 = vector.broadcast %410 : vector<8x1xf32> to vector<8x8xf32>
    %412 = arith.subf %408, %411 : vector<8x8xf32>
    %413 = math.exp %412 : vector<8x8xf32>
    %cst_132 = arith.constant dense<0.000000e+00> : vector<8xf32>
    %414 = vector.multi_reduction <add>, %413, %cst_132 [1] : vector<8x8xf32> to vector<8xf32>
    %415 = vector.shape_cast %414 : vector<8xf32> to vector<8x1xf32>
    %416 = tpu.reciprocal %415 {approx = true} : vector<8x1xf32> -> vector<8x1xf32>
    %417 = vector.broadcast %416 : vector<8x1xf32> to vector<8x8xf32>
    %418 = arith.mulf %413, %417 : vector<8x8xf32>
    %419 = vector.extract_strided_slice %372 {offsets = [0, 8], sizes = [8, 8], strides = [1, 1]} : vector<8x32xf32> to vector<8x8xf32>
    %420 = arith.truncf %418 : vector<8x8xf32> to vector<8x8xbf16>
    %421 = arith.truncf %419 : vector<8x8xf32> to vector<8x8xbf16>
    %cst_133 = arith.constant dense<0.000000e+00> : vector<8x8xf32>
    %422 = tpu.matmul %420, %421, %cst_133 {dimension_numbers = #tpu.dot_dimension_numbers<[1], [0], [0], [1], [0, 0, 1, 1], [], []>} : vector<8x8xbf16>, vector<8x8xbf16>, vector<8x8xf32> -> vector<8x8xf32>
    %c8_134 = arith.constant 8 : index
    %c8_135 = arith.constant 8 : index
    %423 = vector.load %arg25[%c8_134, %c8_135] : memref<16x32xf32, #tpu.memory_space<vmem>>, vector<8x8xf32>
    tpu.vector_store %arg25[%c8_134, %c8_135], %422 {strides = array<i32>} : memref<16x32xf32, #tpu.memory_space<vmem>>, vector<8x8xf32>,
    %424 = vector.extract_strided_slice %370 {offsets = [0, 16], sizes = [8, 8], strides = [1, 1]} : vector<8x32xf32> to vector<8x8xf32>
    %425 = vector.extract_strided_slice %371 {offsets = [0, 16], sizes = [8, 8], strides = [1, 1]} : vector<8x32xf32> to vector<8x8xf32>
    %426 = arith.truncf %424 : vector<8x8xf32> to vector<8x8xbf16>
    %427 = arith.truncf %425 : vector<8x8xf32> to vector<8x8xbf16>
    %cst_136 = arith.constant dense<0.000000e+00> : vector<8x8xf32>
    %428 = tpu.matmul %426, %427, %cst_136 {dimension_numbers = #tpu.dot_dimension_numbers<[1], [1], [0], [0], [0, 0, 1, 0], [], []>} : vector<8x8xbf16>, vector<8x8xbf16>, vector<8x8xf32> -> vector<8x8xf32>
    %cst_137 = arith.constant 0.353553385 : f32
    %429 = vector.broadcast %cst_137 : f32 to vector<8x8xf32>
    %430 = arith.mulf %428, %429 : vector<8x8xf32>
    %431 = vector.broadcast %375 : vector<1x8xf32> to vector<8x8xf32>
    %432 = arith.addf %430, %431 : vector<8x8xf32>
    %cst_138 = arith.constant dense<0xFF800000> : vector<8xf32>
    %433 = vector.multi_reduction <maximumf>, %432, %cst_138 [1] : vector<8x8xf32> to vector<8xf32>
    %434 = vector.shape_cast %433 : vector<8xf32> to vector<8x1xf32>
    %435 = vector.broadcast %434 : vector<8x1xf32> to vector<8x8xf32>
    %436 = arith.subf %432, %435 : vector<8x8xf32>
    %437 = math.exp %436 : vector<8x8xf32>
    %cst_139 = arith.constant dense<0.000000e+00> : vector<8xf32>
    %438 = vector.multi_reduction <add>, %437, %cst_139 [1] : vector<8x8xf32> to vector<8xf32>
    %439 = vector.shape_cast %438 : vector<8xf32> to vector<8x1xf32>
    %440 = tpu.reciprocal %439 {approx = true} : vector<8x1xf32> -> vector<8x1xf32>
    %441 = vector.broadcast %440 : vector<8x1xf32> to vector<8x8xf32>
    %442 = arith.mulf %437, %441 : vector<8x8xf32>
    %443 = vector.extract_strided_slice %372 {offsets = [0, 16], sizes = [8, 8], strides = [1, 1]} : vector<8x32xf32> to vector<8x8xf32>
    %444 = arith.truncf %442 : vector<8x8xf32> to vector<8x8xbf16>
    %445 = arith.truncf %443 : vector<8x8xf32> to vector<8x8xbf16>
    %cst_140 = arith.constant dense<0.000000e+00> : vector<8x8xf32>
    %446 = tpu.matmul %444, %445, %cst_140 {dimension_numbers = #tpu.dot_dimension_numbers<[1], [0], [0], [1], [0, 0, 1, 1], [], []>} : vector<8x8xbf16>, vector<8x8xbf16>, vector<8x8xf32> -> vector<8x8xf32>
    %c8_141 = arith.constant 8 : index
    %c16_142 = arith.constant 16 : index
    %447 = vector.load %arg25[%c8_141, %c16_142] : memref<16x32xf32, #tpu.memory_space<vmem>>, vector<8x8xf32>
    tpu.vector_store %arg25[%c8_141, %c16_142], %446 {strides = array<i32>} : memref<16x32xf32, #tpu.memory_space<vmem>>, vector<8x8xf32>,
    %448 = vector.extract_strided_slice %370 {offsets = [0, 24], sizes = [8, 8], strides = [1, 1]} : vector<8x32xf32> to vector<8x8xf32>
    %449 = vector.extract_strided_slice %371 {offsets = [0, 24], sizes = [8, 8], strides = [1, 1]} : vector<8x32xf32> to vector<8x8xf32>
    %450 = arith.truncf %448 : vector<8x8xf32> to vector<8x8xbf16>
    %451 = arith.truncf %449 : vector<8x8xf32> to vector<8x8xbf16>
    %cst_143 = arith.constant dense<0.000000e+00> : vector<8x8xf32>
    %452 = tpu.matmul %450, %451, %cst_143 {dimension_numbers = #tpu.dot_dimension_numbers<[1], [1], [0], [0], [0, 0, 1, 0], [], []>} : vector<8x8xbf16>, vector<8x8xbf16>, vector<8x8xf32> -> vector<8x8xf32>
    %cst_144 = arith.constant 0.353553385 : f32
    %453 = vector.broadcast %cst_144 : f32 to vector<8x8xf32>
    %454 = arith.mulf %452, %453 : vector<8x8xf32>
    %455 = vector.broadcast %375 : vector<1x8xf32> to vector<8x8xf32>
    %456 = arith.addf %454, %455 : vector<8x8xf32>
    %cst_145 = arith.constant dense<0xFF800000> : vector<8xf32>
    %457 = vector.multi_reduction <maximumf>, %456, %cst_145 [1] : vector<8x8xf32> to vector<8xf32>
    %458 = vector.shape_cast %457 : vector<8xf32> to vector<8x1xf32>
    %459 = vector.broadcast %458 : vector<8x1xf32> to vector<8x8xf32>
    %460 = arith.subf %456, %459 : vector<8x8xf32>
    %461 = math.exp %460 : vector<8x8xf32>
    %cst_146 = arith.constant dense<0.000000e+00> : vector<8xf32>
    %462 = vector.multi_reduction <add>, %461, %cst_146 [1] : vector<8x8xf32> to vector<8xf32>
    %463 = vector.shape_cast %462 : vector<8xf32> to vector<8x1xf32>
    %464 = tpu.reciprocal %463 {approx = true} : vector<8x1xf32> -> vector<8x1xf32>
    %465 = vector.broadcast %464 : vector<8x1xf32> to vector<8x8xf32>
    %466 = arith.mulf %461, %465 : vector<8x8xf32>
    %467 = vector.extract_strided_slice %372 {offsets = [0, 24], sizes = [8, 8], strides = [1, 1]} : vector<8x32xf32> to vector<8x8xf32>
    %468 = arith.truncf %466 : vector<8x8xf32> to vector<8x8xbf16>
    %469 = arith.truncf %467 : vector<8x8xf32> to vector<8x8xbf16>
    %cst_147 = arith.constant dense<0.000000e+00> : vector<8x8xf32>
    %470 = tpu.matmul %468, %469, %cst_147 {dimension_numbers = #tpu.dot_dimension_numbers<[1], [0], [0], [1], [0, 0, 1, 1], [], []>} : vector<8x8xbf16>, vector<8x8xbf16>, vector<8x8xf32> -> vector<8x8xf32>
    %c8_148 = arith.constant 8 : index
    %c24_149 = arith.constant 24 : index
    %471 = vector.load %arg25[%c8_148, %c24_149] : memref<16x32xf32, #tpu.memory_space<vmem>>, vector<8x8xf32>
    tpu.vector_store %arg25[%c8_148, %c24_149], %470 {strides = array<i32>} : memref<16x32xf32, #tpu.memory_space<vmem>>, vector<8x8xf32>,
    %c0_150 = arith.constant 0 : index
    %c0_151 = arith.constant 0 : index
    %472 = vector.load %arg25[%c0_150, %c0_151] : memref<16x32xf32, #tpu.memory_space<vmem>>, vector<16x32xf32>
    %c0_152 = arith.constant 0 : index
    %c0_153 = arith.constant 0 : index
    %473 = vector.load %arg14[%c0_152, %c0_153] : memref<32x32xf32, #tpu.memory_space<vmem>>, vector<32x32xf32>
    %474 = arith.truncf %472 : vector<16x32xf32> to vector<16x32xbf16>
    %475 = arith.truncf %473 : vector<32x32xf32> to vector<32x32xbf16>
    %cst_154 = arith.constant dense<0.000000e+00> : vector<16x32xf32>
    %476 = tpu.matmul %474, %475, %cst_154 {dimension_numbers = #tpu.dot_dimension_numbers<[1], [0], [0], [1], [0, 0, 1, 1], [], []>} : vector<16x32xbf16>, vector<32x32xbf16>, vector<16x32xf32> -> vector<16x32xf32>
    %c0_155 = arith.constant 0 : index
    %c0_156 = arith.constant 0 : index
    %477 = vector.load %arg15[%c0_155, %c0_156] : memref<1x32xf32, #tpu.memory_space<vmem>>, vector<1x32xf32>
    %478 = vector.broadcast %477 : vector<1x32xf32> to vector<16x32xf32>
    %479 = arith.addf %476, %478 : vector<16x32xf32>
    %c0_157 = arith.constant 0 : index
    %c0_158 = arith.constant 0 : index
    %480 = vector.load %arg16[%c0_157, %c0_158] : memref<1x32xf32, #tpu.memory_space<vmem>>, vector<1x32xf32>
    %c0_159 = arith.constant 0 : index
    %c0_160 = arith.constant 0 : index
    %481 = vector.load %arg17[%c0_159, %c0_160] : memref<1x32xf32, #tpu.memory_space<vmem>>, vector<1x32xf32>
    %482 = arith.addf %250, %479 : vector<16x32xf32>
    %cst_161 = arith.constant dense<0.000000e+00> : vector<16xf32>
    %483 = vector.multi_reduction <add>, %482, %cst_161 [1] : vector<16x32xf32> to vector<16xf32>
    %484 = vector.shape_cast %483 : vector<16xf32> to vector<16x1xf32>
    %cst_162 = arith.constant 3.200000e+01 : f32
    %485 = vector.broadcast %cst_162 : f32 to vector<16x1xf32>
    %486 = arith.divf %484, %485 : vector<16x1xf32>
    %487 = vector.broadcast %486 : vector<16x1xf32> to vector<16x32xf32>
    %488 = arith.subf %482, %487 : vector<16x32xf32>
    %489 = arith.mulf %488, %488 : vector<16x32xf32>
    %cst_163 = arith.constant dense<0.000000e+00> : vector<16xf32>
    %490 = vector.multi_reduction <add>, %489, %cst_163 [1] : vector<16x32xf32> to vector<16xf32>
    %491 = vector.shape_cast %490 : vector<16xf32> to vector<16x1xf32>
    %cst_164 = arith.constant 3.200000e+01 : f32
    %492 = vector.broadcast %cst_164 : f32 to vector<16x1xf32>
    %493 = arith.divf %491, %492 : vector<16x1xf32>
    %494 = vector.broadcast %486 : vector<16x1xf32> to vector<16x32xf32>
    %495 = arith.subf %482, %494 : vector<16x32xf32>
    %cst_165 = arith.constant 9.99999974E-6 : f32
    %496 = vector.broadcast %cst_165 : f32 to vector<16x1xf32>
    %497 = arith.addf %493, %496 : vector<16x1xf32>
    %498 = math.rsqrt %497 : vector<16x1xf32>
    %499 = vector.broadcast %498 : vector<16x1xf32> to vector<16x32xf32>
    %500 = arith.mulf %495, %499 : vector<16x32xf32>
    %501 = vector.broadcast %480 : vector<1x32xf32> to vector<16x32xf32>
    %502 = arith.mulf %500, %501 : vector<16x32xf32>
    %503 = vector.broadcast %481 : vector<1x32xf32> to vector<16x32xf32>
    %504 = arith.addf %502, %503 : vector<16x32xf32>
    %c0_166 = arith.constant 0 : index
    %c0_167 = arith.constant 0 : index
    %505 = vector.load %arg18[%c0_166, %c0_167] : memref<32x64xf32, #tpu.memory_space<vmem>>, vector<32x64xf32>
    %506 = arith.truncf %504 : vector<16x32xf32> to vector<16x32xbf16>
    %507 = arith.truncf %505 : vector<32x64xf32> to vector<32x64xbf16>
    %cst_168 = arith.constant dense<0.000000e+00> : vector<16x64xf32>
    %508 = tpu.matmul %506, %507, %cst_168 {dimension_numbers = #tpu.dot_dimension_numbers<[1], [0], [0], [1], [0, 0, 1, 1], [], []>} : vector<16x32xbf16>, vector<32x64xbf16>, vector<16x64xf32> -> vector<16x64xf32>
    %c0_169 = arith.constant 0 : index
    %c0_170 = arith.constant 0 : index
    %509 = vector.load %arg19[%c0_169, %c0_170] : memref<1x64xf32, #tpu.memory_space<vmem>>, vector<1x64xf32>
    %510 = vector.broadcast %509 : vector<1x64xf32> to vector<16x64xf32>
    %511 = arith.addf %508, %510 : vector<16x64xf32>
    %cst_171 = arith.constant 0.000000e+00 : f32
    %512 = vector.broadcast %cst_171 : f32 to vector<16x64xf32>
    %513 = arith.maximumf %511, %512 : vector<16x64xf32>
    %c0_172 = arith.constant 0 : index
    %c0_173 = arith.constant 0 : index
    %514 = vector.load %arg20[%c0_172, %c0_173] : memref<64x32xf32, #tpu.memory_space<vmem>>, vector<64x32xf32>
    %515 = arith.truncf %513 : vector<16x64xf32> to vector<16x64xbf16>
    %516 = arith.truncf %514 : vector<64x32xf32> to vector<64x32xbf16>
    %cst_174 = arith.constant dense<0.000000e+00> : vector<16x32xf32>
    %517 = tpu.matmul %515, %516, %cst_174 {dimension_numbers = #tpu.dot_dimension_numbers<[1], [0], [0], [1], [0, 0, 1, 1], [], []>} : vector<16x64xbf16>, vector<64x32xbf16>, vector<16x32xf32> -> vector<16x32xf32>
    %c0_175 = arith.constant 0 : index
    %c0_176 = arith.constant 0 : index
    %518 = vector.load %arg21[%c0_175, %c0_176] : memref<1x32xf32, #tpu.memory_space<vmem>>, vector<1x32xf32>
    %519 = vector.broadcast %518 : vector<1x32xf32> to vector<16x32xf32>
    %520 = arith.addf %517, %519 : vector<16x32xf32>
    %c0_177 = arith.constant 0 : index
    %c0_178 = arith.constant 0 : index
    %521 = vector.load %arg22[%c0_177, %c0_178] : memref<1x32xf32, #tpu.memory_space<vmem>>, vector<1x32xf32>
    %c0_179 = arith.constant 0 : index
    %c0_180 = arith.constant 0 : index
    %522 = vector.load %arg23[%c0_179, %c0_180] : memref<1x32xf32, #tpu.memory_space<vmem>>, vector<1x32xf32>
    %523 = arith.addf %504, %520 : vector<16x32xf32>
    %cst_181 = arith.constant dense<0.000000e+00> : vector<16xf32>
    %524 = vector.multi_reduction <add>, %523, %cst_181 [1] : vector<16x32xf32> to vector<16xf32>
    %525 = vector.shape_cast %524 : vector<16xf32> to vector<16x1xf32>
    %cst_182 = arith.constant 3.200000e+01 : f32
    %526 = vector.broadcast %cst_182 : f32 to vector<16x1xf32>
    %527 = arith.divf %525, %526 : vector<16x1xf32>
    %528 = vector.broadcast %527 : vector<16x1xf32> to vector<16x32xf32>
    %529 = arith.subf %523, %528 : vector<16x32xf32>
    %530 = arith.mulf %529, %529 : vector<16x32xf32>
    %cst_183 = arith.constant dense<0.000000e+00> : vector<16xf32>
    %531 = vector.multi_reduction <add>, %530, %cst_183 [1] : vector<16x32xf32> to vector<16xf32>
    %532 = vector.shape_cast %531 : vector<16xf32> to vector<16x1xf32>
    %cst_184 = arith.constant 3.200000e+01 : f32
    %533 = vector.broadcast %cst_184 : f32 to vector<16x1xf32>
    %534 = arith.divf %532, %533 : vector<16x1xf32>
    %535 = vector.broadcast %527 : vector<16x1xf32> to vector<16x32xf32>
    %536 = arith.subf %523, %535 : vector<16x32xf32>
    %cst_185 = arith.constant 9.99999974E-6 : f32
    %537 = vector.broadcast %cst_185 : f32 to vector<16x1xf32>
    %538 = arith.addf %534, %537 : vector<16x1xf32>
    %539 = math.rsqrt %538 : vector<16x1xf32>
    %540 = vector.broadcast %539 : vector<16x1xf32> to vector<16x32xf32>
    %541 = arith.mulf %536, %540 : vector<16x32xf32>
    %542 = vector.broadcast %521 : vector<1x32xf32> to vector<16x32xf32>
    %543 = arith.mulf %541, %542 : vector<16x32xf32>
    %544 = vector.broadcast %522 : vector<1x32xf32> to vector<16x32xf32>
    %545 = arith.addf %543, %544 : vector<16x32xf32>
    %c0_186 = arith.constant 0 : index
    %c0_187 = arith.constant 0 : index
    %546 = vector.load %arg24[%c0_186, %c0_187] : memref<16x32xf32, #tpu.memory_space<vmem>>, vector<16x32xf32>
    tpu.vector_store %arg24[%c0_186, %c0_187], %545 {strides = array<i32>} : memref<16x32xf32, #tpu.memory_space<vmem>>, vector<16x32xf32>,
    return
  }
}

</mosaic_0001>

<bundles_post_ra>
// kernel: transformer_forward.9
= control target key start
LH: loop header
LB: loop body
LE: loop exit
PB: predicated region body
PF: predicated region fallthrough
CT: control target
= control target key end

     0   :  { %s146_s0 = inlined_call_operand.vmem [shape: f32[16,32], index: 0, kind: input, shape index: {}]   ;;  %s147_s1 = inlined_call_operand.vmem [shape: f32[32,60], index: 1, kind: input, shape index: {}]   ;;  %s148_s2 = inlined_call_operand.vmem [shape: f32[1,60], index: 2, kind: input, shape index: {}]   ;;  %s149_s3 = inlined_call_operand.hbm [shape: f32[16,60], index: 3, kind: output, shape index: {}]  }
   0x1   :  { %v20_v0 = vld [vmem:[%s147_s1 + $0x10] sm:$0xff]  ;;  %v21_v1 = vld [vmem:[%s147_s1 + $0x18] sm:$0xff]  ;;  %v18_v2 = vld [vmem:[%s147_s1] sm:$0xff] }
   0x2   :  { %v24_v3 = vpack.c.bf16 %v21_v1, %v20_v0  ;;  %v19_v4 = vld [vmem:[%s147_s1 + $0x8] sm:$0xff] }
   0x3   :  { %8 = vsyncpa [#allocation3], 0  ;;  %v23_v5 = vpack.c.bf16 %v19_v4, %v18_v2  ;;  %v16_v6 = vld [vmem:[%s146_s0] sm:$0xff]  ;;  %v17_v7 = vld [vmem:[%s146_s0 + $0x8] sm:$0xff]  ;;  %vm29_vm0 = vcmask 261120   ;;  %vm47_vm1 = vcmask 490496  }
   0x4   :  { %39 = vmatpush.bf16.msra.mxu0 %v24_v3  ;;  %v22_v8 = vpack.c.bf16 %v17_v7, %v16_v6  ;;  %v72_v9 = vld [vmem:[%s148_s2] ss:$0 sm:$0xff]  ;;  %s99_s1 = smov [#allocation2]   ;;  %s56_s29 = sshll.u32 %s149_s3, 4  ;;  %s57_s29 = int_to_ptr.hbm [resolvable:$true] %s56_s29 }
   0x5   :  { %s54_s26 = sshll.u32 %s99_s1, 4  ;;  %s100_s0 = smov 128   ;;  %s55_s26 = int_to_ptr.vmem [resolvable:$true] %s54_s26 }
   0x6   :  { %s101_s30 = smov 8  }
   0x8   :  { %40 = vmatpush.bf16.msra.mxu0 %v23_v5 }
   0xb   :  { %68 = vmatmul.msk.bf16.vlgmr.msra.gmra.mxu0 %vm29_vm0, %v22_v8 }
  0x88   :  { %v42_v10 = vpop.f32.mrf.mxu0 }
  0x89   :  { %v43_v11 = vadd.f32 %v72_v9, %v42_v10 }
  0x8b   :  { %48 = vst.msk [vmem:[#allocation2] sm:$0xff] %vm47_vm1, %v43_v11 }
  0x90   :  { %v44_v12 = vpop.f32.mrf.mxu0 }
  0x91   :  { %v45_v13 = vadd.f32 %v72_v9, %v44_v12 }
  0x93   :  { %49 = vst.msk [vmem:[#allocation2 + $0x8] sm:$0xff] %vm47_vm1, %v45_v13 }
  0x94   :  { %62 = dma.vmem_to_hbm [thread:$0]  %s55_s26, 256, %s57_s29, [#allocation3], %s100_s0, %s100_s0, %s101_s30  }
  0x95   :  { %97 = dma.done.wait [#allocation3], 256  }
  0x96   :  { %98 = vsyncadd [#allocation3], 4294967040 }
  0x97   :  { %67 = vsyncpa [#allocation3], 1 }

// kernel: transformer_forward.5
= control target key start
LH: loop header
LB: loop body
LE: loop exit
PB: predicated region body
PF: predicated region fallthrough
CT: control target
= control target key end

     0   :  { %vm61_vm0 = vcmask 261120   ;;  %s893_s26 = smov 104   ;;  %s895_s27 = smov 96   ;;  %vm85_vm1 = vcmask 64512   ;;  %vm125_vm2 = vcmask 1043456   ;;  %vm205_vm3 = vcmask 130112   ;;  %s1237_s2 = inlined_call_operand.vmem [shape: f32[32,96], index: 2, kind: input, shape index: {}]   ;;  %s1238_s0 = inlined_call_operand.vmem [shape: f32[16,32], index: 0, kind: input, shape index: {}]   ;;  %s1239_s3 = inlined_call_operand.vmem [shape: f32[1,96], index: 3, kind: input, shape index: {}]   ;;  %s1240_s1 = inlined_call_operand.vmem [shape: f32[2,8], index: 1, kind: input, shape index: {}]   ;;  %s1241_s5 = inlined_call_operand.vmem [shape: f32[1,32], index: 5, kind: input, shape index: {}]   ;;  %s1242_s4 = inlined_call_operand.vmem [shape: f32[32,32], index: 4, kind: input, shape index: {}]   ;;  %s1243_s6 = inlined_call_operand.vmem [shape: f32[1,32], index: 6, kind: input, shape index: {}]   ;;  %s1244_s7 = inlined_call_operand.vmem [shape: f32[1,32], index: 7, kind: input, shape index: {}]   ;;  %s1245_s9 = inlined_call_operand.vmem [shape: f32[1,64], index: 9, kind: input, shape index: {}]   ;;  %s1246_s8 = inlined_call_operand.vmem [shape: f32[32,64], index: 8, kind: input, shape index: {}]   ;;  %s1247_s11 = inlined_call_operand.vmem [shape: f32[1,32], index: 11, kind: input, shape index: {}]   ;;  %s1248_s10 = inlined_call_operand.vmem [shape: f32[64,32], index: 10, kind: input, shape index: {}]   ;;  %s1249_s12 = inlined_call_operand.vmem [shape: f32[1,32], index: 12, kind: input, shape index: {}]   ;;  %s1250_s13 = inlined_call_operand.vmem [shape: f32[1,32], index: 13, kind: input, shape index: {}]   ;;  %s1251_s14 = inlined_call_operand.vmem [shape: f32[16,32], index: 14, kind: output, shape index: {}]  }
   0x1   :  { %v52_v0 = vld [vmem:[%s1237_s2 + $0x10] sm:$0xff]  ;;  %v53_v1 = vld [vmem:[%s1237_s2 + $0x18] sm:$0xff]  ;;  %v50_v2 = vld [vmem:[%s1237_s2] sm:$0xff]  ;;  %s896_s28 = smov 80   ;;  %s897_s29 = smov 72   ;;  %vm269_vm4 = vcmask 195712  }
   0x2   :  { %v56_v3 = vpack.c.bf16 %v53_v1, %v52_v0  ;;  %v51_v4 = vld [vmem:[%s1237_s2 + $0x8] sm:$0xff]  ;;  %v998_v6 = vld [vmem:[%s1238_s0] sm:$0xff]  ;;  %s899_s30 = smov 112   ;;  %s900_s15 = smov 56   ;;  %vm333_vm5 = vcmask 261312   ;;  %vm726_vm13 = vcmask 523264  }
   0x3   :  { %v55_v5 = vpack.c.bf16 %v51_v4, %v50_v2  ;;  %v1003_v7 = vld [vmem:[%s1238_s0 + $0x8] sm:$0xff]  ;;  %v843_v9 = vld [vmem:[%s1239_s3] ss:$0 sm:$0xff]  ;;  %s894_s0 = smov 120   ;;  %s898_s3 = smov 88  }
   0x4   :  { %71 = vmatpush.bf16.msra.mxu0 %v56_v3  ;;  %v54_v8 = vpack.c.bf16 %v1003_v7, %v998_v6  ;;  %v79_v38 = vld [vmem:[%s1240_s1] sm:$0x3]  ;;  %s901_s1 = smov 64   ;;  %s902_s18 = smov 48  }
   0x5   :  { %v80_v39 = vmul.f32 -1e+09, %v79_v38  ;;  %s903_s19 = smov 40   ;;  %s904_s20 = smov 16  }
   0x6   :  { %s905_s21 = smov 8   ;;  %s906_s22 = smov 24  }
   0x7   :  { %v106_v40 = vperm.slane %v80_v39, 0  ;;  %v359_v56 = vperm.slane %v80_v39, 1 }
   0x8   :  { %72 = vmatpush.bf16.msra.mxu0 %v55_v5 }
   0xb   :  { %808 = vmatmul.msk.bf16.vlgmr.msra.gmra.mxu0 %vm61_vm0, %v54_v8 }
  0x88   :  { %v74_v10 = vpop.f32.mrf.mxu0 }
  0x89   :  { %v75_v11 = vadd.f32 %v843_v9, %v74_v10 }
  0x8b   :  { %v1011_v12 = vpack.c.bf16 %v75_v11, %v75_v11 }
  0x8d   :  { %271 = vrot.lane.b32.xlu2 %v1011_v12, %s893_s26  ;;  %143 = vrot.lane.b32.xlu1 %v1011_v12, %s894_s0 }
  0x8e   :  { %83 = vrot.lane.b32.xlu0 %v1011_v12, %s895_s27 }
  0x90   :  { %v76_v13 = vpop.f32.mrf.mxu0 }
  0x91   :  { %v77_v14 = vadd.f32 %v843_v9, %v76_v13 }
  0x93   :  { %v1019_v15 = vpack.c.bf16 %v77_v14, %v77_v14 }
  0x95   :  { %209 = vrot.lane.b32.xlu2 %v1011_v12, %s896_s28  ;;  %273 = vrot.lane.b32.xlu1 %v1011_v12, %s897_s29 }
  0x96   :  { %145 = vrot.lane.b32.xlu0 %v1011_v12, %s898_s3 }
  0x9d   :  { %395 = vrot.lane.b32.xlu2 %v1019_v15, %s894_s0  ;;  %207 = vrot.lane.b32.xlu1 %v1011_v12, %s899_s30 }
  0x9e   :  { %397 = vrot.lane.b32.xlu0 %v1019_v15, %s898_s3 }
  0xa5   :  { %521 = vrot.lane.b32.xlu2 %v1019_v15, %s893_s26  ;;  %523 = vrot.lane.b32.xlu1 %v1019_v15, %s897_s29 }
  0xa6   :  { %337 = vrot.lane.b32.xlu0 %v1019_v15, %s895_s27 }
  0xad   :  { %458 = vrot.lane.b32.xlu1 %v1019_v15, %s899_s30 }
  0xae   :  { %460 = vrot.lane.b32.xlu0 %v1019_v15, %s896_s28 }
  0xb5   :  { %180 = vrot.lane.b32.xlu1 %v1011_v12, %s900_s15 }
  0xe7   :  { %v272_v16 = vpop.permute.xlu2 %271 }
  0xef   :  { %v210_v17 = vpop.permute.xlu2 %209 }
  0xf0   :  { %v215_v18 = vsel %vm85_vm1, %v210_v17, 0 }
  0xf1   :  { %224 = vmatpush.bf16.xpose.msrb.mxu0 %v215_v18 }
  0xf7   :  { %v396_v35 = vpop.permute.xlu2 %395 }
  0xff   :  { %v144_v19 = vpop.permute.xlu1 %143  ;;  %v522_v37 = vpop.permute.xlu2 %521 }
 0x100   :  { %v84_v20 = vpop.permute.xlu0 %83 }
 0x101   :  { %v90_v21 = vsel %vm85_vm1, %v84_v20, 0 }
 0x102   :  { %99 = vmatpush.bf16.xpose.msra.mxu1 %v90_v21 }
 0x107   :  { %v274_v22 = vpop.permute.xlu1 %273 }
 0x108   :  { %v146_v23 = vpop.permute.xlu0 %145  ;;  %v279_v24 = vsel %vm85_vm1, %v274_v22, 0 }
 0x109   :  { %809 = vmatmul.msk.bf16.vlgmr.msra.gmra.mxu1 %vm85_vm1, %v1011_v12  ;;  %v151_v25 = vsel %vm85_vm1, %v146_v23, 0 }
 0x10a   :  { %160 = vmatpush.bf16.xpose.msra.mxu3 %v151_v25 }
 0x10f   :  { %v208_v26 = vpop.permute.xlu1 %207 }
 0x110   :  { %v398_v27 = vpop.permute.xlu0 %397  ;;  %813 = vmatmul.msk.bf16.vlgmr.msrb.gmra.mxu0 %vm85_vm1, %v208_v26 }
 0x111   :  { %v403_v28 = vsel %vm85_vm1, %v398_v27, 0  ;;  %811 = vmatmul.msk.bf16.vlgmr.msra.gmra.mxu3 %vm85_vm1, %v144_v19 }
 0x112   :  { %288 = vmatpush.bf16.xpose.msrb.mxu3 %v279_v24 }
 0x117   :  { %v524_v31 = vpop.permute.xlu1 %523 }
 0x118   :  { %v338_v29 = vpop.permute.xlu0 %337  ;;  %v529_v33 = vsel %vm85_vm1, %v524_v31, 0 }
 0x119   :  { %v343_v30 = vsel %vm85_vm1, %v338_v29, 0 }
 0x11a   :  { %412 = vmatpush.bf16.xpose.msra.mxu3 %v403_v28  ;;  %352 = vmatpush.bf16.xpose.msra.mxu0 %v343_v30 }
 0x11f   :  { %v459_v36 = vpop.permute.xlu1 %458 }
 0x120   :  { %v461_v32 = vpop.permute.xlu0 %460 }
 0x121   :  { %v466_v34 = vsel %vm85_vm1, %v461_v32, 0  ;;  %815 = vmatmul.msk.bf16.vlgmr.msrb.gmra.mxu3 %vm85_vm1, %v272_v16  ;;  %817 = vmatmul.msk.bf16.vlgmr.msra.gmra.mxu0 %vm85_vm1, %v1019_v15 }
 0x122   :  { %538 = vmatpush.bf16.xpose.msrb.mxu3 %v529_v33  ;;  %475 = vmatpush.bf16.xpose.msrb.mxu0 %v466_v34 }
 0x127   :  { %v181_v31 = vpop.permute.xlu1 %180 }
 0x131   :  { %819 = vmatmul.msk.bf16.vlgmr.msra.gmra.mxu3 %vm85_vm1, %v396_v35  ;;  %821 = vmatmul.msk.bf16.vlgmr.msrb.gmra.mxu0 %vm85_vm1, %v459_v36  ;;  %v186_v36 = vsel %vm125_vm2, %v181_v31, 0 }
 0x141   :  { %823 = vmatmul.msk.bf16.vlgmr.msrb.gmra.mxu3 %vm85_vm1, %v522_v37 }
 0x186   :  { %v101_v41 = vpop.f32.mrf.mxu1 }
 0x187   :  { %v105_v42 = vmul.f32 0.35355338, %v101_v41 }
 0x189   :  { %v107_v43 = vadd.f32 %v106_v40, %v105_v42 }
 0x18b   :  { %v108_v44 = vsel %vm85_vm1, %v107_v43, -inf }
 0x18c   :  { %109 = vmax.xlane.f32.xlu2 %v108_v44 }
 0x18d   :  { %v226_v45 = vpop.f32.mrf.mxu0 }
 0x18e   :  { %v103_v46 = vpop.f32.mrf.mxu1  ;;  %v230_v47 = vmul.f32 0.35355338, %v226_v45 }
 0x190   :  { %v231_v48 = vadd.f32 %v230_v47, %v106_v40 }
 0x192   :  { %v232_v49 = vsel %vm85_vm1, %v231_v48, -inf }
 0x194   :  { %233 = vmax.xlane.f32.xlu2 %v232_v49  ;;  %v162_v50 = vpop.f32.mrf.mxu3 }
 0x195   :  { %v166_v51 = vmul.f32 0.35355338, %v162_v50  ;;  %v228_v52 = vpop.f32.mrf.mxu0 }
 0x197   :  { %v167_v53 = vadd.f32 %v166_v51, %v106_v40 }
 0x199   :  { %v168_v54 = vsel %vm85_vm1, %v167_v53, -inf }
 0x19a   :  { %169 = vmax.xlane.f32.xlu0 %v168_v54 }
 0x19c   :  { %v164_v55 = vpop.f32.mrf.mxu3 }
 0x19e   :  { %v354_v57 = vpop.f32.mrf.mxu0 }
 0x19f   :  { %v358_v58 = vmul.f32 0.35355338, %v354_v57 }
 0x1a1   :  { %v1055_v59 = vadd.f32 %v359_v56, %v358_v58 }
 0x1a3   :  { %v361_v60 = vsel %vm85_vm1, %v1055_v59, -inf }
 0x1a4   :  { %v290_v61 = vpop.f32.mrf.mxu3  ;;  %362 = vmax.xlane.f32.xlu1 %v361_v60 }
 0x1a5   :  { %v294_v62 = vmul.f32 0.35355338, %v290_v61 }
 0x1a6   :  { %v356_v63 = vpop.f32.mrf.mxu0 }
 0x1a7   :  { %v1059_v0 = vadd.f32 %v294_v62, %v106_v40 }
 0x1a9   :  { %v296_v1 = vsel %vm85_vm1, %v1059_v0, -inf }
 0x1ac   :  { %120 = vrot.lane.b32.xlu2 %v1011_v12, %s901_s1  ;;  %v292_v2 = vpop.f32.mrf.mxu3  ;;  %297 = vmax.xlane.f32.xlu1 %v296_v1 }
 0x1ae   :  { %v477_v3 = vpop.f32.mrf.mxu0 }
 0x1af   :  { %v481_v4 = vmul.f32 0.35355338, %v477_v3 }
 0x1b1   :  { %v1065_v5 = vadd.f32 %v481_v4, %v359_v56 }
 0x1b3   :  { %v483_v8 = vsel %vm85_vm1, %v1065_v5, -inf }
 0x1b4   :  { %v414_v9 = vpop.f32.mrf.mxu3  ;;  %484 = vmax.xlane.f32.xlu0 %v483_v8 }
 0x1b5   :  { %v418_v18 = vmul.f32 0.35355338, %v414_v9 }
 0x1b6   :  { %v479_v10 = vpop.f32.mrf.mxu0 }
 0x1b7   :  { %v419_v20 = vadd.f32 %v418_v18, %v359_v56 }
 0x1b9   :  { %v420_v21 = vsel %vm85_vm1, %v419_v20, -inf }
 0x1bc   :  { %v416_v11 = vpop.f32.mrf.mxu3 }
 0x1c4   :  { %v540_v13 = vpop.f32.mrf.mxu3 }
 0x1c5   :  { %v544_v14 = vmul.f32 0.35355338, %v540_v13  ;;  %244 = vrot.lane.b32.xlu1 %v1011_v12, %s902_s18 }
 0x1c7   :  { %v545_v16 = vadd.f32 %v544_v14, %v359_v56 }
 0x1c9   :  { %v546_v17 = vsel %vm85_vm1, %v545_v16, -inf }
 0x1ca   :  { %547 = vmax.xlane.f32.xlu0 %v546_v17 }
 0x1cc   :  { %v542_v19 = vpop.f32.mrf.mxu3 }
 0x1d5   :  { %421 = vmax.xlane.f32.xlu2 %v420_v21 }
 0x1ff   :  { %v110_v22 = vpop.xlane.xlu2 %109 }
 0x200   :  { %v111_v23 = vsub.f32 %v107_v43, %v110_v22 }
 0x202   :  { %v112_v24 = vmul.f32 1.442695, %v111_v23 }
 0x204   :  { %851 = vpow2.f32 %v112_v24 }
 0x207   :  { %v234_v25 = vpop.xlane.xlu2 %233 }
 0x208   :  { %v235_v26 = vsub.f32 %v231_v48, %v234_v25 }
 0x20a   :  { %v1073_v27 = vpop.eup %851  ;;  %v236_v28 = vmul.f32 1.442695, %v235_v26 }
 0x20b   :  { %v114_v29 = vsel %vm85_vm1, %v1073_v27, 0.0 }
 0x20c   :  { %853 = vpow2.f32 %v236_v28  ;;  %115 = vadd.xlane.f32.xlu0 %v114_v29 }
 0x20d   :  { %v170_v30 = vpop.xlane.xlu0 %169 }
 0x20e   :  { %v171_v32 = vsub.f32 %v167_v53, %v170_v30 }
 0x20f   :  { %v121_v33 = vpop.permute.xlu2 %120 }
 0x210   :  { %v172_v34 = vmul.f32 1.442695, %v171_v32  ;;  %v127_v35 = vsel %vm125_vm2, %v121_v33, 0 }
 0x211   :  { %136 = vmatpush.bf16.msra.mxu2 %v127_v35 }
 0x212   :  { %v1079_v37 = vpop.eup %853  ;;  %855 = vpow2.f32 %v172_v34 }
 0x213   :  { %v238_v38 = vsel %vm85_vm1, %v1079_v37, 0.0 }
 0x214   :  { %239 = vadd.xlane.f32.xlu2 %v238_v38 }
 0x215   :  { %195 = vmatpush.bf16.msrb.mxu2 %v186_v36 }
 0x217   :  { %v363_v41 = vpop.xlane.xlu1 %362 }
 0x218   :  { %v1083_v39 = vpop.eup %855  ;;  %v364_v44 = vsub.f32 %v1055_v59, %v363_v41 }
 0x219   :  { %v174_v40 = vsel %vm85_vm1, %v1083_v39, 0.0 }
 0x21a   :  { %175 = vadd.xlane.f32.xlu1 %v174_v40  ;;  %v365_v46 = vmul.f32 1.442695, %v364_v44 }
 0x21c   :  { %857 = vpow2.f32 %v365_v46 }
 0x21f   :  { %v298_v42 = vpop.xlane.xlu1 %297 }
 0x220   :  { %308 = vrot.lane.b32.xlu0 %v1011_v12, %s903_s19  ;;  %v299_v48 = vsub.f32 %v1059_v0, %v298_v42 }
 0x222   :  { %v300_v49 = vmul.f32 1.442695, %v299_v48  ;;  %v858_v51 = vpop.eup %857 }
 0x223   :  { %v367_v55 = vsel %vm85_vm1, %v858_v51, 0.0 }
 0x224   :  { %859 = vpow2.f32 %v300_v49 }
 0x227   :  { %v485_v47 = vpop.xlane.xlu0 %484 }
 0x228   :  { %v486_v12 = vsub.f32 %v1065_v5, %v485_v47 }
 0x22a   :  { %v487_v52 = vmul.f32 1.442695, %v486_v12  ;;  %v860_v58 = vpop.eup %859 }
 0x22b   :  { %v302_v61 = vsel %vm85_vm1, %v860_v58, 0.0 }
 0x22c   :  { %432 = vrot.lane.b32.xlu2 %v1019_v15, %s900_s15  ;;  %861 = vpow2.f32 %v487_v52 }
 0x232   :  { %v1098_v60 = vpop.eup %861 }
 0x233   :  { %373 = vrot.lane.b32.xlu1 %v1019_v15, %s901_s1  ;;  %v489_v62 = vsel %vm85_vm1, %v1098_v60, 0.0 }
 0x237   :  { %v245_v43 = vpop.permute.xlu1 %244 }
 0x238   :  { %v250_v45 = vsel %vm125_vm2, %v245_v43, 0 }
 0x239   :  { %259 = vmatpush.bf16.msrb.mxu1 %v250_v45 }
 0x23d   :  { %v548_v50 = vpop.xlane.xlu0 %547 }
 0x23e   :  { %v549_v53 = vsub.f32 %v545_v16, %v548_v50 }
 0x240   :  { %v550_v57 = vmul.f32 1.442695, %v549_v53 }
 0x242   :  { %863 = vpow2.f32 %v550_v57 }
 0x248   :  { %v422_v54 = vpop.xlane.xlu2 %421  ;;  %v1103_v63 = vpop.eup %863 }
 0x249   :  { %v423_v56 = vsub.f32 %v419_v20, %v422_v54  ;;  %v552_v1 = vsel %vm85_vm1, %v1103_v63, 0.0 }
 0x24a   :  { %368 = vadd.xlane.f32.xlu0 %v367_v55 }
 0x24b   :  { %v424_v59 = vmul.f32 1.442695, %v423_v56 }
 0x24d   :  { %865 = vpow2.f32 %v424_v59 }
 0x252   :  { %303 = vadd.xlane.f32.xlu0 %v302_v61 }
 0x253   :  { %v866_v0 = vpop.eup %865 }
 0x254   :  { %v426_v2 = vsel %vm85_vm1, %v866_v0, 0.0 }
 0x255   :  { %490 = vadd.xlane.f32.xlu2 %v489_v62 }
 0x25a   :  { %553 = vadd.xlane.f32.xlu0 %v552_v1 }
 0x25d   :  { %427 = vadd.xlane.f32.xlu1 %v426_v2  ;;  %v588_v2 = vld [vmem:[%s1242_s4 + $0x10] sm:$0xff] }
 0x26e   :  { %558 = vrot.lane.b32.xlu0 %v1019_v15, %s903_s19 }
 0x276   :  { %495 = vrot.lane.b32.xlu1 %v1019_v15, %s902_s18 }
 0x27f   :  { %v116_v3 = vpop.xlane.xlu0 %115 }
 0x280   :  { %867 = vrcp.f32 %v116_v3  ;;  %v589_v3 = vld [vmem:[%s1242_s4 + $0x18] sm:$0xff] }
 0x286   :  { %v868_v4 = vpop.eup %867 }
 0x287   :  { %v240_v5 = vpop.xlane.xlu2 %239  ;;  %v118_v8 = vmul.f32 %v868_v4, %v1073_v27  ;;  %v592_v4 = vpack.c.bf16 %v589_v3, %v588_v2 }
 0x288   :  { %869 = vrcp.f32 %v240_v5  ;;  %v586_v5 = vld [vmem:[%s1242_s4] sm:$0xff] }
 0x289   :  { %v119_v9 = vpack.c.bf16 %v118_v8, %v118_v8  ;;  %606 = vmatpush.bf16.msra.mxu0 %v592_v4  ;;  %v587_v8 = vld [vmem:[%s1242_s4 + $0x8] sm:$0xff]  ;;  %v846_v4 = vld [vmem:[%s1244_s7] ss:$0 sm:$0xff] }
 0x28b   :  { %810 = vmatmul.msk.bf16.vlgmr.msra.gmra.mxu2 %vm85_vm1, %v119_v9  ;;  %v591_v9 = vpack.c.bf16 %v587_v8, %v586_v5 }
 0x28d   :  { %v176_v10 = vpop.xlane.xlu1 %175  ;;  %607 = vmatpush.bf16.msra.mxu0 %v591_v9 }
 0x28e   :  { %v870_v11 = vpop.eup %869  ;;  %871 = vrcp.f32 %v176_v10 }
 0x28f   :  { %v242_v13 = vmul.f32 %v870_v11, %v1079_v37  ;;  %v433_v19 = vpop.permute.xlu2 %432 }
 0x290   :  { %v438_v21 = vsel %vm125_vm2, %v433_v19, 0 }
 0x291   :  { %v243_v14 = vpack.c.bf16 %v242_v13, %v242_v13 }
 0x292   :  { %v309_v16 = vpop.permute.xlu0 %308 }
 0x293   :  { %v314_v17 = vsel %vm125_vm2, %v309_v16, 0  ;;  %814 = vmatmul.msk.bf16.vlgmr.msrb.gmra.mxu1 %vm85_vm1, %v243_v14 }
 0x294   :  { %v872_v15 = vpop.eup %871  ;;  %323 = vmatpush.bf16.msra.mxu2 %v314_v17 }
 0x295   :  { %v178_v18 = vmul.f32 %v872_v15, %v1083_v39  ;;  %v844_v15 = vld [vmem:[%s1241_s5] ss:$0 sm:$0xff] }
 0x297   :  { %v179_v20 = vpack.c.bf16 %v178_v18, %v178_v18 }
 0x29b   :  { %812 = vmatmul.msk.bf16.vlgmr.msrb.gmra.mxu2 %vm85_vm1, %v179_v20 }
 0x29c   :  { %447 = vmatpush.bf16.msrb.mxu2 %v438_v21 }
 0x2a5   :  { %v374_v22 = vpop.permute.xlu1 %373 }
 0x2a6   :  { %v379_v23 = vsel %vm125_vm2, %v374_v22, 0 }
 0x2a7   :  { %388 = vmatpush.bf16.msra.mxu1 %v379_v23 }
 0x2bd   :  { %v369_v24 = vpop.xlane.xlu0 %368 }
 0x2be   :  { %873 = vrcp.f32 %v369_v24 }
 0x2c4   :  { %v874_v25 = vpop.eup %873 }
 0x2c5   :  { %v371_v26 = vmul.f32 %v874_v25, %v858_v51  ;;  %v304_v27 = vpop.xlane.xlu0 %303 }
 0x2c6   :  { %875 = vrcp.f32 %v304_v27 }
 0x2c7   :  { %v372_v28 = vpack.c.bf16 %v371_v26, %v371_v26  ;;  %v907_v26 = vmov 32.0  }
 0x2c8   :  { %v491_v35 = vpop.xlane.xlu2 %490 }
 0x2c9   :  { %818 = vmatmul.msk.bf16.vlgmr.msra.gmra.mxu1 %vm85_vm1, %v372_v28 }
 0x2cc   :  { %v876_v29 = vpop.eup %875 }
 0x2cd   :  { %v306_v30 = vmul.f32 %v876_v29, %v860_v58  ;;  %v554_v34 = vpop.xlane.xlu0 %553 }
 0x2cf   :  { %v307_v31 = vpack.c.bf16 %v306_v30, %v306_v30 }
 0x2d0   :  { %v428_v32 = vpop.xlane.xlu1 %427 }
 0x2d1   :  { %816 = vmatmul.msk.bf16.vlgmr.msra.gmra.mxu2 %vm85_vm1, %v307_v31  ;;  %877 = vrcp.f32 %v428_v32 }
 0x2d2   :  { %879 = vrcp.f32 %v491_v35 }
 0x2d3   :  { %881 = vrcp.f32 %v554_v34 }
 0x2d4   :  { %883 = vrcp.f32 %v907_v26 }
 0x2d7   :  { %v878_v33 = vpop.eup %877 }
 0x2d8   :  { %v430_v36 = vmul.f32 %v878_v33, %v866_v0  ;;  %v880_v40 = vpop.eup %879 }
 0x2d9   :  { %v493_v41 = vmul.f32 %v880_v40, %v1098_v60  ;;  %v882_v42 = vpop.eup %881 }
 0x2da   :  { %v431_v37 = vpack.c.bf16 %v430_v36, %v430_v36  ;;  %v556_v46 = vmul.f32 %v882_v42, %v1103_v63  ;;  %v884_v27 = vpop.eup %883  ;;  %v682_v42 = vld [vmem:[%s1246_s8 + $0x18] sm:$0xff] }
 0x2db   :  { %v494_v45 = vpack.c.bf16 %v493_v41, %v493_v41  ;;  %v625_v28 = vmul.f32 32.0, %v884_v27  ;;  %vm629_vm6 = vweird.f32 %v884_v27  ;;  %v681_v41 = vld [vmem:[%s1246_s8 + $0x10] sm:$0xff] }
 0x2dc   :  { %v557_v47 = vpack.c.bf16 %v556_v46, %v556_v46  ;;  %v679_v46 = vld [vmem:[%s1246_s8] sm:$0xff] }
 0x2dd   :  { %v626_v29 = vsub.f32 1.0, %v625_v28 }
 0x2df   :  { %v627_v30 = vmul.f32 %v884_v27, %v626_v29 }
 0x2e0   :  { %v559_v38 = vpop.permute.xlu0 %558 }
 0x2e1   :  { %v564_v39 = vsel %vm125_vm2, %v559_v38, 0  ;;  %820 = vmatmul.msk.bf16.vlgmr.msrb.gmra.mxu2 %vm85_vm1, %v431_v37  ;;  %v628_v31 = vadd.f32 %v884_v27, %v627_v30 }
 0x2e2   :  { %573 = vmatpush.bf16.msra.mxu2 %v564_v39 }
 0x2e3   :  { %v1158_v32 = vsel %vm629_vm6, %v884_v27, %v628_v31  ;;  %v847_v27 = vld [vmem:[%s1245_s9] ss:$0 sm:$0xff] }
 0x2e8   :  { %v496_v43 = vpop.permute.xlu1 %495 }
 0x2e9   :  { %v501_v44 = vsel %vm125_vm2, %v496_v43, 0  ;;  %v685_v43 = vpack.c.bf16 %v682_v42, %v681_v41 }
 0x2ea   :  { %510 = vmatpush.bf16.msrb.mxu1 %v501_v44 }
 0x2ed   :  { %822 = vmatmul.msk.bf16.vlgmr.msrb.gmra.mxu1 %vm85_vm1, %v494_v45 }
 0x2ee   :  { %699 = vmatpush.bf16.msra.mxu1 %v685_v43 }
 0x2f1   :  { %824 = vmatmul.msk.bf16.vlgmr.msra.gmra.mxu2 %vm85_vm1, %v557_v47  ;;  %v680_v47 = vld [vmem:[%s1246_s8 + $0x8] sm:$0xff] }
 0x30e   :  { %v138_v48 = vpop.f32.mrf.mxu2 }
 0x30f   :  { %142 = vst.msk [vmem:[#allocation2] sm:$0xff] %vm85_vm1, %v138_v48 }
 0x310   :  { %v261_v12 = vpop.f32.mrf.mxu1 }
 0x311   :  { %266 = vrot.lane.b32.xlu0 %v261_v12, %s904_s20  ;;  %v684_v12 = vpack.c.bf16 %v680_v47, %v679_v46 }
 0x313   :  { %700 = vmatpush.bf16.msra.mxu1 %v684_v12 }
 0x316   :  { %v140_v49 = vpop.f32.mrf.mxu2 }
 0x318   :  { %v263_v50 = vpop.f32.mrf.mxu1 }
 0x31e   :  { %v197_v51 = vpop.f32.mrf.mxu2 }
 0x31f   :  { %202 = vrot.lane.b32.xlu0 %v197_v51, %s905_s21 }
 0x326   :  { %v199_v52 = vpop.f32.mrf.mxu2 }
 0x346   :  { %v390_v53 = vpop.f32.mrf.mxu1 }
 0x347   :  { %394 = vst.msk [vmem:[#allocation2 + $0x8] sm:$0xff] %vm85_vm1, %v390_v53 }
 0x34e   :  { %v392_v54 = vpop.f32.mrf.mxu1 }
 0x354   :  { %v325_v55 = vpop.f32.mrf.mxu2 }
 0x355   :  { %330 = vrot.lane.b32.xlu2 %v325_v55, %s906_s22 }
 0x35c   :  { %v327_v56 = vpop.f32.mrf.mxu2 }
 0x364   :  { %v449_v57 = vpop.f32.mrf.mxu2 }
 0x365   :  { %454 = vrot.lane.b32.xlu1 %v449_v57, %s905_s21 }
 0x36a   :  { %v512_v58 = vpop.f32.mrf.mxu1 }
 0x36c   :  { %v451_v59 = vpop.f32.mrf.mxu2 }
 0x36d   :  { %517 = vrot.lane.b32.xlu1 %v512_v58, %s904_s20 }
 0x372   :  { %v514_v60 = vpop.f32.mrf.mxu1 }
 0x374   :  { %v575_v61 = vpop.f32.mrf.mxu2 }
 0x375   :  { %580 = vrot.lane.b32.xlu0 %v575_v61, %s906_s22 }
 0x37c   :  { %v577_v62 = vpop.f32.mrf.mxu2 }
 0x383   :  { %v267_v63 = vpop.permute.xlu0 %266 }
 0x391   :  { %v203_v0 = vpop.permute.xlu0 %202 }
 0x392   :  { %206 = vst.msk [vmem:[#allocation2] sm:$0xff] %vm205_vm3, %v203_v0  ;;  %v845_v0 = vld [vmem:[%s1243_s6] ss:$0 sm:$0xff] }
 0x393   :  { %270 = vst.msk [vmem:[#allocation2] sm:$0xff] %vm269_vm4, %v267_v63 }
 0x3af   :  { %v331_v1 = vpop.permute.xlu2 %330 }
 0x3b0   :  { %334 = vst.msk [vmem:[#allocation2] sm:$0xff] %vm333_vm5, %v331_v1 }
 0x3b7   :  { %v584_v14 = vld [vmem:[#allocation2] sm:$0xff] }
 0x3d7   :  { %v455_v10 = vpop.permute.xlu1 %454 }
 0x3d8   :  { %457 = vst.msk [vmem:[#allocation2 + $0x8] sm:$0xff] %vm205_vm3, %v455_v10 }
 0x3df   :  { %v518_v11 = vpop.permute.xlu1 %517 }
 0x3e0   :  { %520 = vst.msk [vmem:[#allocation2 + $0x8] sm:$0xff] %vm269_vm4, %v518_v11 }
 0x3e7   :  { %v581_v13 = vpop.permute.xlu0 %580 }
 0x3e8   :  { %583 = vst.msk [vmem:[#allocation2 + $0x8] sm:$0xff] %vm333_vm5, %v581_v13 }
 0x3ef   :  { %v585_v16 = vld [vmem:[#allocation2 + $0x8] sm:$0xff] }
 0x3f0   :  { %v590_v17 = vpack.c.bf16 %v585_v16, %v584_v14  ;;  %v715_v14 = vld [vmem:[%s1248_s10 + $0x30] sm:$0xff]  ;;  %v716_v16 = vld [vmem:[%s1248_s10 + $0x38] sm:$0xff] }
 0x3f2   :  { %825 = vmatmul.msk.bf16.vlgmr.msra.gmra.mxu0 %vm61_vm0, %v590_v17  ;;  %v721_v17 = vpack.c.bf16 %v716_v16, %v715_v14 }
 0x3f4   :  { %734 = vmatpush.bf16.msra.mxu3 %v721_v17 }
 0x46f   :  { %v609_v18 = vpop.f32.mrf.mxu0 }
 0x470   :  { %v610_v19 = vadd.f32 %v844_v15, %v609_v18  ;;  %v714_v18 = vld [vmem:[%s1248_s10 + $0x28] sm:$0xff] }
 0x472   :  { %v616_v20 = vadd.f32 %v610_v19, %v998_v6 }
 0x474   :  { %v618_v21 = vsel %vm61_vm0, %v616_v20, 0.0 }
 0x475   :  { %619 = vadd.xlane.f32.xlu1 %v618_v21  ;;  %v712_v21 = vld [vmem:[%s1248_s10 + $0x18] sm:$0xff] }
 0x477   :  { %v611_v22 = vpop.f32.mrf.mxu0 }
 0x478   :  { %v612_v23 = vadd.f32 %v844_v15, %v611_v22  ;;  %v713_v15 = vld [vmem:[%s1248_s10 + $0x20] sm:$0xff] }
 0x479   :  { %v720_v19 = vpack.c.bf16 %v714_v18, %v713_v15 }
 0x47a   :  { %v617_v24 = vadd.f32 %v612_v23, %v1003_v7  ;;  %v709_v23 = vld [vmem:[%s1248_s10] sm:$0xff] }
 0x47b   :  { %735 = vmatpush.bf16.msra.mxu3 %v720_v19 }
 0x47c   :  { %v621_v25 = vsel %vm61_vm0, %v617_v24, 0.0 }
 0x47d   :  { %622 = vadd.xlane.f32.xlu0 %v621_v25 }
 0x4e8   :  { %v620_v6 = vpop.xlane.xlu1 %619 }
 0x4e9   :  { %v631_v33 = vmul.f32 %v1158_v32, %v620_v6 }
 0x4eb   :  { %v633_v34 = vsub.f32 %v616_v20, %v631_v33  ;;  %v711_v20 = vld [vmem:[%s1248_s10 + $0x10] sm:$0xff] }
 0x4ec   :  { %v719_v22 = vpack.c.bf16 %v712_v21, %v711_v20 }
 0x4ed   :  { %v635_v35 = vmul.f32 %v633_v34, %v633_v34 }
 0x4ee   :  { %736 = vmatpush.bf16.msra.mxu3 %v719_v22 }
 0x4ef   :  { %v637_v7 = vsel %vm61_vm0, %v635_v35, 0.0 }
 0x4f0   :  { %v623_v36 = vpop.xlane.xlu0 %622  ;;  %638 = vadd.xlane.f32.xlu2 %v637_v7 }
 0x4f1   :  { %v632_v37 = vmul.f32 %v1158_v32, %v623_v36 }
 0x4f3   :  { %v634_v38 = vsub.f32 %v617_v24, %v632_v37  ;;  %v710_v24 = vld [vmem:[%s1248_s10 + $0x8] sm:$0xff] }
 0x4f4   :  { %v718_v25 = vpack.c.bf16 %v710_v24, %v709_v23 }
 0x4f5   :  { %v636_v39 = vmul.f32 %v634_v38, %v634_v38 }
 0x4f6   :  { %737 = vmatpush.bf16.msra.mxu3 %v718_v25 }
 0x4f7   :  { %v640_v40 = vsel %vm61_vm0, %v636_v39, 0.0 }
 0x4f8   :  { %641 = vadd.xlane.f32.xlu1 %v640_v40 }
 0x563   :  { %v639_v44 = vpop.xlane.xlu2 %638 }
 0x564   :  { %v643_v45 = vmul.f32 %v639_v44, %v1158_v32 }
 0x566   :  { %v645_v48 = vadd.f32 1e-05, %v643_v45 }
 0x568   :  { %885 = vrsqrt.f32 %v645_v48  ;;  %vm653_vm8 = vweird.f32 %v645_v48 }
 0x56b   :  { %v642_v49 = vpop.xlane.xlu1 %641 }
 0x56c   :  { %v644_v50 = vmul.f32 %v642_v49, %v1158_v32 }
 0x56e   :  { %v886_v51 = vpop.eup %885  ;;  %v646_v52 = vadd.f32 1e-05, %v644_v50 }
 0x56f   :  { %v648_v53 = vmul.f32 %v886_v51, %v645_v48  ;;  %vm654_vm7 = vweird.f32 %v886_v51 }
 0x570   :  { %887 = vrsqrt.f32 %v646_v52  ;;  %vm655_vm9 = vmor %vm653_vm8, %vm654_vm7  ;;  %vm663_vm11 = vweird.f32 %v646_v52 }
 0x571   :  { %v649_v54 = vmul.f32 %v886_v51, %v648_v53 }
 0x573   :  { %v650_v55 = vmul.f32 0.5, %v649_v54 }
 0x575   :  { %v651_v56 = vsub.f32 1.5, %v650_v55 }
 0x576   :  { %v888_v57 = vpop.eup %887 }
 0x577   :  { %v652_v58 = vmul.f32 %v886_v51, %v651_v56  ;;  %v658_v59 = vmul.f32 %v888_v57, %v646_v52  ;;  %vm664_vm10 = vweird.f32 %v888_v57 }
 0x578   :  { %vm665_vm12 = vmor %vm663_vm11, %vm664_vm10 }
 0x579   :  { %v659_v60 = vmul.f32 %v888_v57, %v658_v59  ;;  %v656_v61 = vsel %vm655_vm9, %v886_v51, %v652_v58 }
 0x57a   :  { %v667_v1 = vmul.f32 %v656_v61, %v633_v34  ;;  %v848_v34 = vld [vmem:[%s1247_s11] ss:$0 sm:$0xff] }
 0x57b   :  { %v660_v62 = vmul.f32 0.5, %v659_v60 }
 0x57c   :  { %v672_v5 = vmul.f32 %v845_v0, %v667_v1  ;;  %v849_v1 = vld [vmem:[%s1249_s12] ss:$0 sm:$0xff] }
 0x57d   :  { %v661_v63 = vsub.f32 1.5, %v660_v62 }
 0x57e   :  { %v677_v10 = vadd.f32 %v846_v4, %v672_v5 }
 0x57f   :  { %v662_v2 = vmul.f32 %v888_v57, %v661_v63 }
 0x581   :  { %v666_v3 = vsel %vm665_vm12, %v888_v57, %v662_v2 }
 0x582   :  { %v668_v8 = vmul.f32 %v666_v3, %v634_v38 }
 0x584   :  { %v673_v9 = vmul.f32 %v845_v0, %v668_v8 }
 0x586   :  { %v678_v11 = vadd.f32 %v846_v4, %v673_v9 }
 0x588   :  { %v683_v13 = vpack.c.bf16 %v678_v11, %v677_v10 }
 0x58a   :  { %826 = vmatmul.msk.bf16.vlgmr.msra.gmra.mxu1 %vm61_vm0, %v683_v13 }
 0x607   :  { %v702_v26 = vpop.f32.mrf.mxu1 }
 0x608   :  { %v703_v28 = vadd.f32 %v847_v27, %v702_v26 }
 0x60a   :  { %v707_v31 = vmax.f32 %v703_v28, 0.0 }
 0x60f   :  { %v704_v29 = vpop.f32.mrf.mxu1 }
 0x610   :  { %v705_v30 = vadd.f32 %v847_v27, %v704_v29 }
 0x612   :  { %v708_v6 = vmax.f32 %v705_v30, 0.0 }
 0x614   :  { %v717_v33 = vpack.c.bf16 %v708_v6, %v707_v31 }
 0x616   :  { %827 = vmatmul.msk.bf16.vlgmr.msra.gmra.mxu3 %vm726_vm13, %v717_v33 }
 0x699   :  { %v739_v35 = vpop.f32.mrf.mxu3 }
 0x69a   :  { %v740_v7 = vadd.f32 %v848_v34, %v739_v35 }
 0x69c   :  { %v746_v36 = vadd.f32 %v740_v7, %v677_v10 }
 0x69e   :  { %v748_v37 = vsel %vm61_vm0, %v746_v36, 0.0 }
 0x69f   :  { %749 = vadd.xlane.f32.xlu0 %v748_v37 }
 0x6a1   :  { %v741_v38 = vpop.f32.mrf.mxu3 }
 0x6a2   :  { %v742_v39 = vadd.f32 %v848_v34, %v741_v38 }
 0x6a4   :  { %v747_v40 = vadd.f32 %v742_v39, %v678_v11 }
 0x6a6   :  { %v751_v41 = vsel %vm61_vm0, %v747_v40, 0.0 }
 0x6a7   :  { %752 = vadd.xlane.f32.xlu1 %v751_v41 }
 0x712   :  { %v750_v42 = vpop.xlane.xlu0 %749 }
 0x713   :  { %v754_v43 = vmul.f32 %v750_v42, %v1158_v32 }
 0x715   :  { %v756_v44 = vsub.f32 %v746_v36, %v754_v43 }
 0x717   :  { %v758_v45 = vmul.f32 %v756_v44, %v756_v44 }
 0x719   :  { %v760_v46 = vsel %vm61_vm0, %v758_v45, 0.0 }
 0x71a   :  { %v753_v47 = vpop.xlane.xlu1 %752  ;;  %761 = vadd.xlane.f32.xlu0 %v760_v46 }
 0x71b   :  { %v755_v48 = vmul.f32 %v753_v47, %v1158_v32 }
 0x71d   :  { %v757_v12 = vsub.f32 %v747_v40, %v755_v48 }
 0x71f   :  { %v759_v49 = vmul.f32 %v757_v12, %v757_v12 }
 0x721   :  { %v763_v50 = vsel %vm61_vm0, %v759_v49, 0.0 }
 0x722   :  { %764 = vadd.xlane.f32.xlu1 %v763_v50 }
 0x78d   :  { %v762_v51 = vpop.xlane.xlu0 %761 }
 0x78e   :  { %v766_v52 = vmul.f32 %v762_v51, %v1158_v32 }
 0x790   :  { %v768_v53 = vadd.f32 1e-05, %v766_v52 }
 0x792   :  { %889 = vrsqrt.f32 %v768_v53  ;;  %vm776_vm15 = vweird.f32 %v768_v53 }
 0x795   :  { %v765_v54 = vpop.xlane.xlu1 %764 }
 0x796   :  { %v767_v55 = vmul.f32 %v765_v54, %v1158_v32  ;;  %v850_v32 = vld [vmem:[%s1250_s13] ss:$0 sm:$0xff] }
 0x798   :  { %v890_v56 = vpop.eup %889  ;;  %v769_v57 = vadd.f32 1e-05, %v767_v55 }
 0x799   :  { %v771_v58 = vmul.f32 %v890_v56, %v768_v53  ;;  %vm777_vm14 = vweird.f32 %v890_v56 }
 0x79a   :  { %891 = vrsqrt.f32 %v769_v57  ;;  %vm778_vm1 = vmor %vm776_vm15, %vm777_vm14  ;;  %vm786_vm3 = vweird.f32 %v769_v57 }
 0x79b   :  { %v772_v59 = vmul.f32 %v890_v56, %v771_v58 }
 0x79d   :  { %v773_v60 = vmul.f32 0.5, %v772_v59 }
 0x79f   :  { %v774_v61 = vsub.f32 1.5, %v773_v60 }
 0x7a0   :  { %v892_v62 = vpop.eup %891 }
 0x7a1   :  { %v775_v63 = vmul.f32 %v890_v56, %v774_v61  ;;  %v781_v0 = vmul.f32 %v892_v62, %v769_v57  ;;  %vm787_vm2 = vweird.f32 %v892_v62 }
 0x7a2   :  { %vm788_vm4 = vmor %vm786_vm3, %vm787_vm2 }
 0x7a3   :  { %v779_v2 = vsel %vm778_vm1, %v890_v56, %v775_v63  ;;  %v782_v3 = vmul.f32 %v892_v62, %v781_v0 }
 0x7a4   :  { %v790_v4 = vmul.f32 %v779_v2, %v756_v44 }
 0x7a5   :  { %v783_v5 = vmul.f32 0.5, %v782_v3 }
 0x7a6   :  { %v795_v8 = vmul.f32 %v849_v1, %v790_v4 }
 0x7a7   :  { %v784_v9 = vsub.f32 1.5, %v783_v5 }
 0x7a8   :  { %v800_v10 = vadd.f32 %v850_v32, %v795_v8 }
 0x7a9   :  { %v785_v11 = vmul.f32 %v892_v62, %v784_v9 }
 0x7aa   :  { %802 = vst.msk [vmem:[%s1251_s14] sm:$0xff] %vm61_vm0, %v800_v10 }
 0x7ab   :  { %v789_v13 = vsel %vm788_vm4, %v892_v62, %v785_v11 }
 0x7ac   :  { %v791_v14 = vmul.f32 %v789_v13, %v757_v12 }
 0x7ae   :  { %v796_v16 = vmul.f32 %v849_v1, %v791_v14 }
 0x7b0   :  { %v801_v17 = vadd.f32 %v850_v32, %v796_v16 }
 0x7b2   :  { %803 = vst.msk [vmem:[%s1251_s14 + $0x8] sm:$0xff] %vm61_vm0, %v801_v17 }

// kernel: transformer_forward.7
= control target key start
LH: loop header
LB: loop body
LE: loop exit
PB: predicated region body
PF: predicated region fallthrough
CT: control target
= control target key end

     0   :  { %vm93_vm0 = vcmask 261120   ;;  %s1642_s28 = smov 120   ;;  %s2304_s29 = smov 72   ;;  %vm126_vm1 = vcmask 64512   ;;  %v111_v38 = vlaneseq  ;;  %v1649_v43 = vmov 0.0   ;;  %s2269_s4 = inlined_call_operand.vmem [shape: f32[32,96], index: 4, kind: input, shape index: {}]   ;;  %s2270_s0 = inlined_call_operand.vmem [shape: f32[16,32], index: 0, kind: input, shape index: {}]   ;;  %s2271_s5 = inlined_call_operand.vmem [shape: f32[1,96], index: 5, kind: input, shape index: {}]   ;;  %s2272_s2 = inlined_call_operand.vmem [shape: f32[2,8], index: 2, kind: input, shape index: {}]   ;;  %s2273_s7 = inlined_call_operand.vmem [shape: f32[1,32], index: 7, kind: input, shape index: {}]   ;;  %s2274_s6 = inlined_call_operand.vmem [shape: f32[32,32], index: 6, kind: input, shape index: {}]   ;;  %s2275_s8 = inlined_call_operand.vmem [shape: f32[1,32], index: 8, kind: input, shape index: {}]   ;;  %s2276_s9 = inlined_call_operand.vmem [shape: f32[1,32], index: 9, kind: input, shape index: {}]   ;;  %s2277_s12 = inlined_call_operand.vmem [shape: f32[32,64], index: 12, kind: input, shape index: {}]   ;;  %s2278_s1 = inlined_call_operand.vmem [shape: f32[16,32], index: 1, kind: input, shape index: {}]   ;;  %s2279_s13 = inlined_call_operand.vmem [shape: f32[1,64], index: 13, kind: input, shape index: {}]   ;;  %s2280_s11 = inlined_call_operand.vmem [shape: f32[1,32], index: 11, kind: input, shape index: {}]   ;;  %s2281_s10 = inlined_call_operand.vmem [shape: f32[32,32], index: 10, kind: input, shape index: {}]   ;;  %s2282_s3 = inlined_call_operand.vmem [shape: f32[2,8], index: 3, kind: input, shape index: {}]   ;;  %s2283_s15 = inlined_call_operand.vmem [shape: f32[1,32], index: 15, kind: input, shape index: {}]   ;;  %s2284_s14 = inlined_call_operand.vmem [shape: f32[32,32], index: 14, kind: input, shape index: {}]   ;;  %s2285_s16 = inlined_call_operand.vmem [shape: f32[1,32], index: 16, kind: input, shape index: {}]   ;;  %s2286_s17 = inlined_call_operand.vmem [shape: f32[1,32], index: 17, kind: input, shape index: {}]   ;;  %s2287_s19 = inlined_call_operand.vmem [shape: f32[1,64], index: 19, kind: input, shape index: {}]   ;;  %s2288_s18 = inlined_call_operand.vmem [shape: f32[32,64], index: 18, kind: input, shape index: {}]   ;;  %s2289_s21 = inlined_call_operand.vmem [shape: f32[1,32], index: 21, kind: input, shape index: {}]   ;;  %s2290_s20 = inlined_call_operand.vmem [shape: f32[64,32], index: 20, kind: input, shape index: {}]   ;;  %s2291_s22 = inlined_call_operand.vmem [shape: f32[1,32], index: 22, kind: input, shape index: {}]   ;;  %s2292_s23 = inlined_call_operand.vmem [shape: f32[1,32], index: 23, kind: input, shape index: {}]   ;;  %s2293_s24 = inlined_call_operand.vmem [shape: f32[16,32], index: 24, kind: output, shape index: {}]  }
   0x1   :  { %2310 = sst [smem:[#allocation3_spill]] %s2269_s4  ;;  %s1648_s30 = smov 56   ;;  %vm165_vm3 = vcmask 1043456   ;;  %vm245_vm4 = vcmask 130112   ;;  %vm309_vm5 = vcmask 195712   ;;  %vm373_vm6 = vcmask 261312  }
   0x2   :  { %2311 = sst [smem:[#allocation4_spill]] %s2270_s0  ;;  %v112_v39 = vshrl.u32 %v111_v38, 7  ;;  %v114_v40 = vand.u32 127, %v111_v38  ;;  %s1651_s0 = smov 48  }
   0x3   :  { %2312 = sst [smem:[#allocation5_spill]] %s2271_s5  ;;  %s2306_s5 = smov 80  }
   0x4   :  { %2313 = sst [smem:[#allocation6_spill]] %s2272_s2  ;;  %s1646_s2 = smov 88   ;;  %vm115_vm2 = vcmp.gt.s32.totalorder %v114_v40, %v112_v39 }
   0x5   :  { %2314 = sst [smem:[#allocation7_spill]] %s2273_s7  ;;  %v1495_v44 = vsel %vm115_vm2, 1.0, %v1649_v43  ;;  %s1650_s7 = smov 64  }
   0x6   :  { %2315 = sst [smem:[#allocation8_spill]] %s2274_s6  ;;  %s1652_s6 = smov 40  }
   0x7   :  { %2316 = sst [smem:[#allocation9_spill]] %s2275_s8  ;;  %s2308_s8 = smov 96  }
   0x8   :  { %2317 = sst [smem:[#allocation10_spill]] %s2276_s9  ;;  %s1647_s9 = smov 112  }
   0x9   :  { %2318 = sst [smem:[#allocation11_spill]] %s2277_s12  ;;  %s2298_s4 = smov 24  }
   0xa   :  { %s2319_s27 = sld [smem:[#allocation3_spill]] }
   0xb   :  { %s2320_s25 = sld [smem:[#allocation4_spill]] }
   0xc   :  { %s2321_s26 = sld [smem:[#allocation5_spill]] }
   0xd   :  { %s2322_s12 = sld [smem:[#allocation6_spill]] }
  0x10   :  { %v84_v0 = vld [vmem:[%s2319_s27 + $0x10] sm:$0xff]  ;;  %v85_v1 = vld [vmem:[%s2319_s27 + $0x18] sm:$0xff]  ;;  %v82_v2 = vld [vmem:[%s2319_s27] sm:$0xff] }
  0x11   :  { %v88_v3 = vpack.c.bf16 %v85_v1, %v84_v0  ;;  %v83_v4 = vld [vmem:[%s2319_s27 + $0x8] sm:$0xff]  ;;  %v1797_v6 = vld [vmem:[%s2320_s25] sm:$0xff]  ;;  %s1641_s27 = smov 104  }
  0x12   :  { %v87_v5 = vpack.c.bf16 %v83_v4, %v82_v2  ;;  %v1802_v7 = vld [vmem:[%s2320_s25 + $0x8] sm:$0xff]  ;;  %v1550_v9 = vld [vmem:[%s2321_s26] ss:$0 sm:$0xff]  ;;  %s2300_s26 = smov 16  }
  0x13   :  { %103 = vmatpush.bf16.msra.mxu0 %v88_v3  ;;  %v86_v8 = vpack.c.bf16 %v1802_v7, %v1797_v6  ;;  %v118_v41 = vld [vmem:[%s2322_s12] sm:$0x3]  ;;  %s2325_s12 = sld [smem:[#allocation11_spill]] }
  0x14   :  { %v119_v42 = vperm.slane %v118_v41, 0  ;;  %v375_v59 = vperm.slane %v118_v41, 1 }
  0x16   :  { %v120_v45 = vmax.f32 %v119_v42, %v1495_v44  ;;  %v376_v62 = vmax.f32 %v375_v59, %v1495_v44 }
  0x17   :  { %104 = vmatpush.bf16.msra.mxu0 %v87_v5 }
  0x18   :  { %v121_v46 = vmul.f32 -1e+09, %v120_v45  ;;  %v377_v0 = vmul.f32 -1e+09, %v376_v62 }
  0x1a   :  { %1494 = vmatmul.msk.bf16.vlgmr.msra.gmra.mxu0 %vm93_vm0, %v86_v8 }
  0x97   :  { %v106_v10 = vpop.f32.mrf.mxu0 }
  0x98   :  { %v107_v11 = vadd.f32 %v1550_v9, %v106_v10 }
  0x9a   :  { %v1810_v12 = vpack.c.bf16 %v107_v11, %v107_v11 }
  0x9c   :  { %311 = vrot.lane.b32.xlu2 %v1810_v12, %s1641_s27  ;;  %183 = vrot.lane.b32.xlu1 %v1810_v12, %s1642_s28 }
  0x9d   :  { %124 = vrot.lane.b32.xlu0 %v1810_v12, %s2308_s8 }
  0x9f   :  { %v108_v13 = vpop.f32.mrf.mxu0 }
  0xa0   :  { %v109_v14 = vadd.f32 %v1550_v9, %v108_v13 }
  0xa2   :  { %v1824_v15 = vpack.c.bf16 %v109_v14, %v109_v14 }
  0xa4   :  { %249 = vrot.lane.b32.xlu2 %v1810_v12, %s2306_s5  ;;  %313 = vrot.lane.b32.xlu1 %v1810_v12, %s2304_s29 }
  0xa5   :  { %185 = vrot.lane.b32.xlu0 %v1810_v12, %s1646_s2 }
  0xac   :  { %437 = vrot.lane.b32.xlu2 %v1824_v15, %s1642_s28  ;;  %247 = vrot.lane.b32.xlu1 %v1810_v12, %s1647_s9 }
  0xad   :  { %439 = vrot.lane.b32.xlu0 %v1824_v15, %s1646_s2 }
  0xb4   :  { %563 = vrot.lane.b32.xlu2 %v1824_v15, %s1641_s27  ;;  %565 = vrot.lane.b32.xlu1 %v1824_v15, %s2304_s29  ;;  %s2324_s29 = sld [smem:[#allocation7_spill]] }
  0xb5   :  { %380 = vrot.lane.b32.xlu0 %v1824_v15, %s2308_s8  ;;  %s2327_s8 = sld [smem:[#allocation10_spill]] }
  0xbc   :  { %500 = vrot.lane.b32.xlu1 %v1824_v15, %s1647_s9 }
  0xbd   :  { %502 = vrot.lane.b32.xlu0 %v1824_v15, %s2306_s5 }
  0xc4   :  { %220 = vrot.lane.b32.xlu1 %v1810_v12, %s1648_s30 }
  0xf6   :  { %v312_v16 = vpop.permute.xlu2 %311 }
  0xfe   :  { %v250_v17 = vpop.permute.xlu2 %249 }
  0xff   :  { %v255_v18 = vsel %vm126_vm1, %v250_v17, 0 }
 0x100   :  { %264 = vmatpush.bf16.xpose.msrb.mxu0 %v255_v18 }
 0x106   :  { %v438_v35 = vpop.permute.xlu2 %437 }
 0x10e   :  { %v184_v19 = vpop.permute.xlu1 %183  ;;  %v564_v37 = vpop.permute.xlu2 %563 }
 0x10f   :  { %v125_v20 = vpop.permute.xlu0 %124 }
 0x110   :  { %v131_v21 = vsel %vm126_vm1, %v125_v20, 0 }
 0x111   :  { %140 = vmatpush.bf16.xpose.msra.mxu1 %v131_v21 }
 0x116   :  { %v314_v22 = vpop.permute.xlu1 %313 }
 0x117   :  { %v186_v23 = vpop.permute.xlu0 %185  ;;  %v319_v24 = vsel %vm126_vm1, %v314_v22, 0 }
 0x118   :  { %1496 = vmatmul.msk.bf16.vlgmr.msra.gmra.mxu1 %vm126_vm1, %v1810_v12  ;;  %v191_v25 = vsel %vm126_vm1, %v186_v23, 0 }
 0x119   :  { %200 = vmatpush.bf16.xpose.msra.mxu3 %v191_v25 }
 0x11e   :  { %v248_v26 = vpop.permute.xlu1 %247 }
 0x11f   :  { %v440_v27 = vpop.permute.xlu0 %439  ;;  %1500 = vmatmul.msk.bf16.vlgmr.msrb.gmra.mxu0 %vm126_vm1, %v248_v26 }
 0x120   :  { %v445_v28 = vsel %vm126_vm1, %v440_v27, 0  ;;  %1498 = vmatmul.msk.bf16.vlgmr.msra.gmra.mxu3 %vm126_vm1, %v184_v19 }
 0x121   :  { %328 = vmatpush.bf16.xpose.msrb.mxu3 %v319_v24 }
 0x126   :  { %v566_v31 = vpop.permute.xlu1 %565 }
 0x127   :  { %v381_v29 = vpop.permute.xlu0 %380  ;;  %v571_v33 = vsel %vm126_vm1, %v566_v31, 0 }
 0x128   :  { %v386_v30 = vsel %vm126_vm1, %v381_v29, 0 }
 0x129   :  { %454 = vmatpush.bf16.xpose.msra.mxu3 %v445_v28  ;;  %395 = vmatpush.bf16.xpose.msra.mxu0 %v386_v30 }
 0x12e   :  { %v501_v36 = vpop.permute.xlu1 %500 }
 0x12f   :  { %v503_v32 = vpop.permute.xlu0 %502 }
 0x130   :  { %v508_v34 = vsel %vm126_vm1, %v503_v32, 0  ;;  %1502 = vmatmul.msk.bf16.vlgmr.msrb.gmra.mxu3 %vm126_vm1, %v312_v16  ;;  %1504 = vmatmul.msk.bf16.vlgmr.msra.gmra.mxu0 %vm126_vm1, %v1824_v15 }
 0x131   :  { %580 = vmatpush.bf16.xpose.msrb.mxu3 %v571_v33  ;;  %517 = vmatpush.bf16.xpose.msrb.mxu0 %v508_v34 }
 0x136   :  { %v221_v39 = vpop.permute.xlu1 %220 }
 0x137   :  { %v226_v44 = vsel %vm165_vm3, %v221_v39, 0 }
 0x140   :  { %1506 = vmatmul.msk.bf16.vlgmr.msra.gmra.mxu3 %vm126_vm1, %v438_v35  ;;  %1508 = vmatmul.msk.bf16.vlgmr.msrb.gmra.mxu0 %vm126_vm1, %v501_v36 }
 0x150   :  { %1510 = vmatmul.msk.bf16.vlgmr.msrb.gmra.mxu3 %vm126_vm1, %v564_v37 }
 0x195   :  { %v142_v47 = vpop.f32.mrf.mxu1 }
 0x196   :  { %v146_v48 = vmul.f32 0.35355338, %v142_v47 }
 0x198   :  { %v147_v49 = vadd.f32 %v146_v48, %v121_v46 }
 0x19a   :  { %v148_v50 = vsel %vm126_vm1, %v147_v49, -inf }
 0x19b   :  { %149 = vmax.xlane.f32.xlu2 %v148_v50 }
 0x19c   :  { %v266_v51 = vpop.f32.mrf.mxu0 }
 0x19d   :  { %v144_v52 = vpop.f32.mrf.mxu1  ;;  %v270_v53 = vmul.f32 0.35355338, %v266_v51 }
 0x19f   :  { %v271_v54 = vadd.f32 %v270_v53, %v121_v46 }
 0x1a1   :  { %v272_v55 = vsel %vm126_vm1, %v271_v54, -inf }
 0x1a3   :  { %273 = vmax.xlane.f32.xlu2 %v272_v55  ;;  %v202_v56 = vpop.f32.mrf.mxu3 }
 0x1a4   :  { %v206_v57 = vmul.f32 0.35355338, %v202_v56  ;;  %v268_v58 = vpop.f32.mrf.mxu0 }
 0x1a6   :  { %v207_v60 = vadd.f32 %v206_v57, %v121_v46 }
 0x1a8   :  { %v208_v61 = vsel %vm126_vm1, %v207_v60, -inf }
 0x1a9   :  { %209 = vmax.xlane.f32.xlu0 %v208_v61 }
 0x1ab   :  { %v204_v63 = vpop.f32.mrf.mxu3 }
 0x1ad   :  { %v397_v1 = vpop.f32.mrf.mxu0 }
 0x1ae   :  { %v401_v2 = vmul.f32 0.35355338, %v397_v1 }
 0x1b0   :  { %v1868_v3 = vadd.f32 %v401_v2, %v377_v0 }
 0x1b2   :  { %v403_v4 = vsel %vm126_vm1, %v1868_v3, -inf }
 0x1b3   :  { %v330_v5 = vpop.f32.mrf.mxu3  ;;  %404 = vmax.xlane.f32.xlu1 %v403_v4 }
 0x1b4   :  { %v334_v8 = vmul.f32 0.35355338, %v330_v5 }
 0x1b5   :  { %v399_v9 = vpop.f32.mrf.mxu0 }
 0x1b6   :  { %v1872_v10 = vadd.f32 %v334_v8, %v121_v46 }
 0x1b8   :  { %v336_v11 = vsel %vm126_vm1, %v1872_v10, -inf }
 0x1bb   :  { %160 = vrot.lane.b32.xlu2 %v1810_v12, %s1650_s7  ;;  %v332_v13 = vpop.f32.mrf.mxu3  ;;  %337 = vmax.xlane.f32.xlu1 %v336_v11 }
 0x1bd   :  { %v519_v14 = vpop.f32.mrf.mxu0 }
 0x1be   :  { %v523_v16 = vmul.f32 0.35355338, %v519_v14 }
 0x1c0   :  { %v1878_v17 = vadd.f32 %v523_v16, %v377_v0 }
 0x1c2   :  { %v525_v18 = vsel %vm126_vm1, %v1878_v17, -inf }
 0x1c3   :  { %v456_v19 = vpop.f32.mrf.mxu3  ;;  %526 = vmax.xlane.f32.xlu0 %v525_v18 }
 0x1c4   :  { %v460_v26 = vmul.f32 0.35355338, %v456_v19 }
 0x1c5   :  { %v521_v20 = vpop.f32.mrf.mxu0 }
 0x1c6   :  { %v461_v28 = vadd.f32 %v460_v26, %v377_v0 }
 0x1c8   :  { %v462_v29 = vsel %vm126_vm1, %v461_v28, -inf }
 0x1cb   :  { %v458_v21 = vpop.f32.mrf.mxu3 }
 0x1d3   :  { %v582_v22 = vpop.f32.mrf.mxu3 }
 0x1d4   :  { %v586_v23 = vmul.f32 0.35355338, %v582_v22  ;;  %284 = vrot.lane.b32.xlu1 %v1810_v12, %s1651_s0 }
 0x1d6   :  { %v587_v24 = vadd.f32 %v586_v23, %v377_v0 }
 0x1d8   :  { %v588_v25 = vsel %vm126_vm1, %v587_v24, -inf }
 0x1d9   :  { %589 = vmax.xlane.f32.xlu0 %v588_v25 }
 0x1db   :  { %v584_v27 = vpop.f32.mrf.mxu3 }
 0x1e4   :  { %463 = vmax.xlane.f32.xlu2 %v462_v29 }
 0x20e   :  { %v150_v30 = vpop.xlane.xlu2 %149 }
 0x20f   :  { %v151_v31 = vsub.f32 %v147_v49, %v150_v30 }
 0x211   :  { %v152_v32 = vmul.f32 1.442695, %v151_v31 }
 0x213   :  { %1563 = vpow2.f32 %v152_v32 }
 0x216   :  { %v274_v33 = vpop.xlane.xlu2 %273 }
 0x217   :  { %v275_v34 = vsub.f32 %v271_v54, %v274_v33 }
 0x219   :  { %v1886_v35 = vpop.eup %1563  ;;  %v276_v36 = vmul.f32 1.442695, %v275_v34 }
 0x21a   :  { %v154_v37 = vsel %vm126_vm1, %v1886_v35, 0.0 }
 0x21b   :  { %1565 = vpow2.f32 %v276_v36  ;;  %155 = vadd.xlane.f32.xlu0 %v154_v37 }
 0x21c   :  { %v210_v38 = vpop.xlane.xlu0 %209 }
 0x21d   :  { %v211_v40 = vsub.f32 %v207_v60, %v210_v38 }
 0x21e   :  { %v161_v41 = vpop.permute.xlu2 %160 }
 0x21f   :  { %v212_v42 = vmul.f32 1.442695, %v211_v40  ;;  %v167_v43 = vsel %vm165_vm3, %v161_v41, 0 }
 0x220   :  { %176 = vmatpush.bf16.msra.mxu2 %v167_v43 }
 0x221   :  { %v1892_v45 = vpop.eup %1565  ;;  %1567 = vpow2.f32 %v212_v42 }
 0x222   :  { %v278_v46 = vsel %vm126_vm1, %v1892_v45, 0.0 }
 0x223   :  { %279 = vadd.xlane.f32.xlu2 %v278_v46 }
 0x224   :  { %235 = vmatpush.bf16.msrb.mxu2 %v226_v44 }
 0x226   :  { %v405_v49 = vpop.xlane.xlu1 %404 }
 0x227   :  { %v1896_v47 = vpop.eup %1567  ;;  %v406_v52 = vsub.f32 %v1868_v3, %v405_v49 }
 0x228   :  { %v214_v48 = vsel %vm126_vm1, %v1896_v47, 0.0 }
 0x229   :  { %215 = vadd.xlane.f32.xlu1 %v214_v48  ;;  %v407_v54 = vmul.f32 1.442695, %v406_v52 }
 0x22b   :  { %1569 = vpow2.f32 %v407_v54 }
 0x22e   :  { %v338_v50 = vpop.xlane.xlu1 %337 }
 0x22f   :  { %348 = vrot.lane.b32.xlu0 %v1810_v12, %s1652_s6  ;;  %v339_v56 = vsub.f32 %v1872_v10, %v338_v50 }
 0x231   :  { %v340_v57 = vmul.f32 1.442695, %v339_v56  ;;  %v1570_v59 = vpop.eup %1569 }
 0x232   :  { %v409_v63 = vsel %vm126_vm1, %v1570_v59, 0.0 }
 0x233   :  { %1571 = vpow2.f32 %v340_v57 }
 0x236   :  { %v527_v55 = vpop.xlane.xlu0 %526 }
 0x237   :  { %v528_v12 = vsub.f32 %v1878_v17, %v527_v55 }
 0x239   :  { %v529_v60 = vmul.f32 1.442695, %v528_v12  ;;  %v1572_v2 = vpop.eup %1571 }
 0x23a   :  { %v342_v5 = vsel %vm126_vm1, %v1572_v2, 0.0 }
 0x23b   :  { %474 = vrot.lane.b32.xlu2 %v1824_v15, %s1648_s30  ;;  %1573 = vpow2.f32 %v529_v60  ;;  %s2302_s30 = smov 8  }
 0x241   :  { %v1911_v4 = vpop.eup %1573 }
 0x242   :  { %415 = vrot.lane.b32.xlu1 %v1824_v15, %s1650_s7  ;;  %v531_v8 = vsel %vm126_vm1, %v1911_v4, 0.0  ;;  %s2323_s7 = sld [smem:[#allocation8_spill]] }
 0x246   :  { %v285_v51 = vpop.permute.xlu1 %284 }
 0x247   :  { %v290_v53 = vsel %vm165_vm3, %v285_v51, 0 }
 0x248   :  { %299 = vmatpush.bf16.msrb.mxu1 %v290_v53 }
 0x24c   :  { %v590_v58 = vpop.xlane.xlu0 %589 }
 0x24d   :  { %v591_v61 = vsub.f32 %v587_v24, %v590_v58 }
 0x24f   :  { %v592_v1 = vmul.f32 1.442695, %v591_v61 }
 0x251   :  { %1575 = vpow2.f32 %v592_v1 }
 0x257   :  { %v464_v62 = vpop.xlane.xlu2 %463  ;;  %v1916_v9 = vpop.eup %1575 }
 0x258   :  { %v465_v0 = vsub.f32 %v461_v28, %v464_v62  ;;  %v594_v11 = vsel %vm126_vm1, %v1916_v9, 0.0 }
 0x259   :  { %410 = vadd.xlane.f32.xlu0 %v409_v63 }
 0x25a   :  { %v466_v3 = vmul.f32 1.442695, %v465_v0 }
 0x25c   :  { %1577 = vpow2.f32 %v466_v3 }
 0x261   :  { %343 = vadd.xlane.f32.xlu0 %v342_v5 }
 0x262   :  { %v1578_v10 = vpop.eup %1577 }
 0x263   :  { %v468_v13 = vsel %vm126_vm1, %v1578_v10, 0.0 }
 0x264   :  { %532 = vadd.xlane.f32.xlu2 %v531_v8 }
 0x269   :  { %595 = vadd.xlane.f32.xlu0 %v594_v11 }
 0x26c   :  { %469 = vadd.xlane.f32.xlu1 %v468_v13  ;;  %v630_v13 = vld [vmem:[%s2323_s7 + $0x10] sm:$0xff] }
 0x27d   :  { %600 = vrot.lane.b32.xlu0 %v1824_v15, %s1652_s6 }
 0x285   :  { %537 = vrot.lane.b32.xlu1 %v1824_v15, %s1651_s0  ;;  %s2333_s0 = smov 24  }
 0x28e   :  { %v156_v14 = vpop.xlane.xlu0 %155 }
 0x28f   :  { %1579 = vrcp.f32 %v156_v14  ;;  %v631_v14 = vld [vmem:[%s2323_s7 + $0x18] sm:$0xff] }
 0x295   :  { %v1580_v16 = vpop.eup %1579 }
 0x296   :  { %v280_v17 = vpop.xlane.xlu2 %279  ;;  %v158_v18 = vmul.f32 %v1580_v16, %v1886_v35  ;;  %v634_v16 = vpack.c.bf16 %v631_v14, %v630_v13 }
 0x297   :  { %1581 = vrcp.f32 %v280_v17  ;;  %v628_v17 = vld [vmem:[%s2323_s7] sm:$0xff] }
 0x298   :  { %v159_v19 = vpack.c.bf16 %v158_v18, %v158_v18  ;;  %648 = vmatpush.bf16.msra.mxu0 %v634_v16  ;;  %v629_v18 = vld [vmem:[%s2323_s7 + $0x8] sm:$0xff]  ;;  %s2332_s7 = smov 16  }
 0x29a   :  { %1497 = vmatmul.msk.bf16.vlgmr.msra.gmra.mxu2 %vm126_vm1, %v159_v19  ;;  %v633_v19 = vpack.c.bf16 %v629_v18, %v628_v17 }
 0x29c   :  { %v216_v20 = vpop.xlane.xlu1 %215  ;;  %649 = vmatpush.bf16.msra.mxu0 %v633_v19 }
 0x29d   :  { %v1582_v21 = vpop.eup %1581  ;;  %1583 = vrcp.f32 %v216_v20 }
 0x29e   :  { %v282_v22 = vmul.f32 %v1582_v21, %v1892_v45  ;;  %v475_v27 = vpop.permute.xlu2 %474 }
 0x29f   :  { %v480_v29 = vsel %vm165_vm3, %v475_v27, 0 }
 0x2a0   :  { %v283_v23 = vpack.c.bf16 %v282_v22, %v282_v22 }
 0x2a1   :  { %v349_v24 = vpop.permute.xlu0 %348 }
 0x2a2   :  { %v354_v25 = vsel %vm165_vm3, %v349_v24, 0  ;;  %1501 = vmatmul.msk.bf16.vlgmr.msrb.gmra.mxu1 %vm126_vm1, %v283_v23 }
 0x2a3   :  { %v1584_v15 = vpop.eup %1583  ;;  %363 = vmatpush.bf16.msra.mxu2 %v354_v25 }
 0x2a4   :  { %v218_v26 = vmul.f32 %v1584_v15, %v1896_v47  ;;  %v1551_v15 = vld [vmem:[%s2324_s29] ss:$0 sm:$0xff] }
 0x2a6   :  { %v219_v28 = vpack.c.bf16 %v218_v26, %v218_v26 }
 0x2aa   :  { %1499 = vmatmul.msk.bf16.vlgmr.msrb.gmra.mxu2 %vm126_vm1, %v219_v28 }
 0x2ab   :  { %489 = vmatpush.bf16.msrb.mxu2 %v480_v29 }
 0x2b4   :  { %v416_v30 = vpop.permute.xlu1 %415 }
 0x2b5   :  { %v421_v31 = vsel %vm165_vm3, %v416_v30, 0 }
 0x2b6   :  { %430 = vmatpush.bf16.msra.mxu1 %v421_v31 }
 0x2cc   :  { %v411_v32 = vpop.xlane.xlu0 %410 }
 0x2cd   :  { %1585 = vrcp.f32 %v411_v32 }
 0x2d3   :  { %v1586_v33 = vpop.eup %1585 }
 0x2d4   :  { %v413_v34 = vmul.f32 %v1586_v33, %v1570_v59  ;;  %v344_v35 = vpop.xlane.xlu0 %343 }
 0x2d5   :  { %1587 = vrcp.f32 %v344_v35 }
 0x2d6   :  { %v414_v36 = vpack.c.bf16 %v413_v34, %v413_v34  ;;  %v1656_v34 = vmov 32.0  }
 0x2d7   :  { %v533_v43 = vpop.xlane.xlu2 %532 }
 0x2d8   :  { %1505 = vmatmul.msk.bf16.vlgmr.msra.gmra.mxu1 %vm126_vm1, %v414_v36 }
 0x2db   :  { %v1588_v37 = vpop.eup %1587 }
 0x2dc   :  { %v346_v38 = vmul.f32 %v1588_v37, %v1572_v2  ;;  %v596_v42 = vpop.xlane.xlu0 %595  ;;  %v751_v37 = vld [vmem:[%s2325_s12 + $0x10] sm:$0xff] }
 0x2de   :  { %v347_v39 = vpack.c.bf16 %v346_v38, %v346_v38  ;;  %v749_v38 = vld [vmem:[%s2325_s12] sm:$0xff] }
 0x2df   :  { %v470_v40 = vpop.xlane.xlu1 %469 }
 0x2e0   :  { %1503 = vmatmul.msk.bf16.vlgmr.msra.gmra.mxu2 %vm126_vm1, %v347_v39  ;;  %1589 = vrcp.f32 %v470_v40  ;;  %v750_v39 = vld [vmem:[%s2325_s12 + $0x8] sm:$0xff] }
 0x2e1   :  { %1591 = vrcp.f32 %v533_v43  ;;  %v81_v43 = vld [vmem:[%s2278_s1 + $0x8] sm:$0xff] }
 0x2e2   :  { %1593 = vrcp.f32 %v596_v42  ;;  %v80_v42 = vld [vmem:[%s2278_s1] sm:$0xff] }
 0x2e3   :  { %1595 = vrcp.f32 %v1656_v34 }
 0x2e6   :  { %v1590_v41 = vpop.eup %1589 }
 0x2e7   :  { %v472_v44 = vmul.f32 %v1590_v41, %v1578_v10  ;;  %v1592_v48 = vpop.eup %1591  ;;  %v754_v41 = vpack.c.bf16 %v750_v39, %v749_v38  ;;  %v1555_v39 = vld [vmem:[%s2280_s11] ss:$0 sm:$0xff] }
 0x2e8   :  { %v535_v49 = vmul.f32 %v1592_v48, %v1911_v4  ;;  %v1594_v50 = vpop.eup %1593 }
 0x2e9   :  { %v473_v45 = vpack.c.bf16 %v472_v44, %v472_v44  ;;  %v598_v54 = vmul.f32 %v1594_v50, %v1916_v9  ;;  %v1596_v35 = vpop.eup %1595 }
 0x2ea   :  { %v536_v53 = vpack.c.bf16 %v535_v49, %v535_v49  ;;  %v667_v36 = vmul.f32 32.0, %v1596_v35  ;;  %vm671_vm7 = vweird.f32 %v1596_v35 }
 0x2eb   :  { %v599_v55 = vpack.c.bf16 %v598_v54, %v598_v54 }
 0x2ec   :  { %v668_v40 = vsub.f32 1.0, %v667_v36 }
 0x2ee   :  { %v669_v44 = vmul.f32 %v1596_v35, %v668_v40 }
 0x2ef   :  { %v601_v46 = vpop.permute.xlu0 %600 }
 0x2f0   :  { %v606_v47 = vsel %vm165_vm3, %v601_v46, 0  ;;  %1507 = vmatmul.msk.bf16.vlgmr.msrb.gmra.mxu2 %vm126_vm1, %v473_v45  ;;  %v753_v45 = vpack.c.bf16 %v81_v43, %v80_v42  ;;  %v670_v46 = vadd.f32 %v1596_v35, %v669_v44 }
 0x2f1   :  { %615 = vmatpush.bf16.msra.mxu2 %v606_v47 }
 0x2f2   :  { %v1996_v47 = vsel %vm671_vm7, %v1596_v35, %v670_v46 }
 0x2f7   :  { %v538_v51 = vpop.permute.xlu1 %537 }
 0x2f8   :  { %v543_v52 = vsel %vm165_vm3, %v538_v51, 0 }
 0x2f9   :  { %552 = vmatpush.bf16.msrb.mxu1 %v543_v52 }
 0x2fc   :  { %1509 = vmatmul.msk.bf16.vlgmr.msrb.gmra.mxu1 %vm126_vm1, %v536_v53 }
 0x300   :  { %1511 = vmatmul.msk.bf16.vlgmr.msra.gmra.mxu2 %vm126_vm1, %v599_v55 }
 0x31d   :  { %v178_v56 = vpop.f32.mrf.mxu2 }
 0x31e   :  { %182 = vst.msk [vmem:[#allocation2] sm:$0xff] %vm126_vm1, %v178_v56 }
 0x31f   :  { %v301_v12 = vpop.f32.mrf.mxu1 }
 0x320   :  { %306 = vrot.lane.b32.xlu0 %v301_v12, %s2300_s26 }
 0x325   :  { %v180_v57 = vpop.f32.mrf.mxu2 }
 0x326   :  { %v723_v57 = vld [vmem:[%s2281_s10 + $0x10] sm:$0xff] }
 0x327   :  { %v303_v58 = vpop.f32.mrf.mxu1 }
 0x328   :  { %v724_v58 = vld [vmem:[%s2281_s10 + $0x18] sm:$0xff] }
 0x32d   :  { %v237_v59 = vpop.f32.mrf.mxu2 }
 0x32e   :  { %242 = vrot.lane.b32.xlu0 %v237_v59, %s2302_s30  ;;  %v727_v59 = vpack.c.bf16 %v724_v58, %v723_v57  ;;  %v777_v57 = vld [vmem:[%s2282_s3] sm:$0x3]  ;;  %s2328_s3 = smov 96  }
 0x32f   :  { %v778_v58 = vmul.f32 -1e+09, %v777_v57 }
 0x330   :  { %741 = vmatpush.bf16.msra.mxu1 %v727_v59 }
 0x335   :  { %v239_v60 = vpop.f32.mrf.mxu2 }
 0x355   :  { %v432_v61 = vpop.f32.mrf.mxu1 }
 0x356   :  { %436 = vst.msk [vmem:[#allocation2 + $0x8] sm:$0xff] %vm126_vm1, %v432_v61 }
 0x35d   :  { %v434_v62 = vpop.f32.mrf.mxu1 }
 0x35e   :  { %v721_v62 = vld [vmem:[%s2281_s10] sm:$0xff] }
 0x363   :  { %v365_v63 = vpop.f32.mrf.mxu2 }
 0x364   :  { %370 = vrot.lane.b32.xlu2 %v365_v63, %s2298_s4  ;;  %v722_v63 = vld [vmem:[%s2281_s10 + $0x8] sm:$0xff] }
 0x36b   :  { %v367_v0 = vpop.f32.mrf.mxu2 }
 0x373   :  { %v491_v1 = vpop.f32.mrf.mxu2 }
 0x374   :  { %496 = vrot.lane.b32.xlu1 %v491_v1, %s2302_s30  ;;  %v726_v1 = vpack.c.bf16 %v722_v63, %v721_v62  ;;  %s2326_s30 = sld [smem:[#allocation9_spill]] }
 0x376   :  { %742 = vmatpush.bf16.msra.mxu1 %v726_v1 }
 0x379   :  { %v554_v2 = vpop.f32.mrf.mxu1 }
 0x37b   :  { %v493_v3 = vpop.f32.mrf.mxu2 }
 0x37c   :  { %559 = vrot.lane.b32.xlu1 %v554_v2, %s2300_s26  ;;  %v1554_v2 = vld [vmem:[%s2279_s13] ss:$0 sm:$0xff] }
 0x381   :  { %v556_v4 = vpop.f32.mrf.mxu1 }
 0x383   :  { %v617_v5 = vpop.f32.mrf.mxu2 }
 0x384   :  { %622 = vrot.lane.b32.xlu0 %v617_v5, %s2298_s4 }
 0x38b   :  { %v619_v8 = vpop.f32.mrf.mxu2 }
 0x392   :  { %v307_v9 = vpop.permute.xlu0 %306 }
 0x3a0   :  { %v243_v10 = vpop.permute.xlu0 %242 }
 0x3a1   :  { %246 = vst.msk [vmem:[#allocation2] sm:$0xff] %vm245_vm4, %v243_v10 }
 0x3a2   :  { %310 = vst.msk [vmem:[#allocation2] sm:$0xff] %vm309_vm5, %v307_v9 }
 0x3be   :  { %v371_v11 = vpop.permute.xlu2 %370 }
 0x3bf   :  { %374 = vst.msk [vmem:[#allocation2] sm:$0xff] %vm373_vm6, %v371_v11 }
 0x3c6   :  { %v626_v23 = vld [vmem:[#allocation2] sm:$0xff] }
 0x3e6   :  { %v497_v20 = vpop.permute.xlu1 %496 }
 0x3e7   :  { %499 = vst.msk [vmem:[#allocation2 + $0x8] sm:$0xff] %vm245_vm4, %v497_v20 }
 0x3ee   :  { %v560_v21 = vpop.permute.xlu1 %559 }
 0x3ef   :  { %562 = vst.msk [vmem:[#allocation2 + $0x8] sm:$0xff] %vm309_vm5, %v560_v21 }
 0x3f6   :  { %v623_v22 = vpop.permute.xlu0 %622 }
 0x3f7   :  { %625 = vst.msk [vmem:[#allocation2 + $0x8] sm:$0xff] %vm373_vm6, %v623_v22 }
 0x3fe   :  { %v627_v24 = vld [vmem:[#allocation2 + $0x8] sm:$0xff] }
 0x3ff   :  { %v632_v25 = vpack.c.bf16 %v627_v24, %v626_v23 }
 0x401   :  { %1512 = vmatmul.msk.bf16.vlgmr.msra.gmra.mxu0 %vm93_vm0, %v632_v25 }
 0x47e   :  { %v651_v26 = vpop.f32.mrf.mxu0 }
 0x47f   :  { %v652_v27 = vadd.f32 %v1551_v15, %v651_v26 }
 0x481   :  { %v658_v28 = vadd.f32 %v652_v27, %v1797_v6  ;;  %v752_v6 = vld [vmem:[%s2325_s12 + $0x18] sm:$0xff] }
 0x483   :  { %v660_v29 = vsel %vm93_vm0, %v658_v28, 0.0 }
 0x484   :  { %661 = vadd.xlane.f32.xlu1 %v660_v29 }
 0x486   :  { %v653_v30 = vpop.f32.mrf.mxu0 }
 0x487   :  { %v654_v31 = vadd.f32 %v1551_v15, %v653_v30 }
 0x489   :  { %v659_v32 = vadd.f32 %v654_v31, %v1802_v7  ;;  %v755_v7 = vpack.c.bf16 %v752_v6, %v751_v37 }
 0x48b   :  { %v663_v33 = vsel %vm93_vm0, %v659_v32, 0.0  ;;  %769 = vmatpush.bf16.msra.mxu3 %v755_v7 }
 0x48c   :  { %664 = vadd.xlane.f32.xlu0 %v663_v33 }
 0x48f   :  { %770 = vmatpush.bf16.msra.mxu3 %v754_v41 }
 0x492   :  { %1514 = vmatmul.msk.bf16.vlgmr.msra.gmra.mxu3 %vm93_vm0, %v753_v45 }
 0x4f7   :  { %v662_v48 = vpop.xlane.xlu1 %661 }
 0x4f8   :  { %v673_v49 = vmul.f32 %v1996_v47, %v662_v48 }
 0x4fa   :  { %v675_v50 = vsub.f32 %v658_v28, %v673_v49  ;;  %v1552_v28 = vld [vmem:[%s2326_s30] ss:$0 sm:$0xff] }
 0x4fc   :  { %v677_v51 = vmul.f32 %v675_v50, %v675_v50 }
 0x4fe   :  { %v679_v52 = vsel %vm93_vm0, %v677_v51, 0.0 }
 0x4ff   :  { %v665_v53 = vpop.xlane.xlu0 %664  ;;  %680 = vadd.xlane.f32.xlu2 %v679_v52 }
 0x500   :  { %v674_v54 = vmul.f32 %v1996_v47, %v665_v53 }
 0x502   :  { %v676_v55 = vsub.f32 %v659_v32, %v674_v54  ;;  %v1553_v32 = vld [vmem:[%s2327_s8] ss:$0 sm:$0xff] }
 0x504   :  { %v678_v56 = vmul.f32 %v676_v55, %v676_v55 }
 0x506   :  { %v682_v12 = vsel %vm93_vm0, %v678_v56, 0.0 }
 0x507   :  { %683 = vadd.xlane.f32.xlu1 %v682_v12 }
 0x515   :  { %v772_v3 = vpop.f32.mrf.mxu3 }
 0x516   :  { %v773_v8 = vadd.f32 %v1554_v2, %v772_v3 }
 0x518   :  { %v2019_v11 = vpack.c.bf16 %v773_v8, %v773_v8 }
 0x51a   :  { %904 = vrot.lane.b32.xlu2 %v2019_v11, %s1647_s9  ;;  %841 = vrot.lane.b32.xlu0 %v2019_v11, %s1642_s28  ;;  %v785_v14 = vsel %vm126_vm1, %v2019_v11, 0 }
 0x51b   :  { %794 = vmatpush.bf16.xpose.msrb.mxu2 %v785_v14 }
 0x51d   :  { %v774_v17 = vpop.f32.mrf.mxu3 }
 0x51e   :  { %v775_v19 = vadd.f32 %v1554_v2, %v774_v17 }
 0x520   :  { %v2027_v21 = vpack.c.bf16 %v775_v19, %v775_v19 }
 0x522   :  { %967 = vrot.lane.b32.xlu0 %v2019_v11, %s1641_s27  ;;  %1153 = vrot.lane.b32.xlu2 %v2027_v21, %s1647_s9  ;;  %v1034_v45 = vsel %vm126_vm1, %v2027_v21, 0 }
 0x572   :  { %v681_v60 = vpop.xlane.xlu2 %680 }
 0x573   :  { %v685_v61 = vmul.f32 %v681_v60, %v1996_v47 }
 0x575   :  { %v687_v0 = vadd.f32 1e-05, %v685_v61  ;;  %v801_v61 = vperm.slane %v778_v58, 0 }
 0x577   :  { %1597 = vrsqrt.f32 %v687_v0  ;;  %vm695_vm9 = vweird.f32 %v687_v0 }
 0x57a   :  { %v684_v4 = vpop.xlane.xlu1 %683  ;;  %v905_v38 = vpop.permute.xlu2 %904 }
 0x57b   :  { %v686_v5 = vmul.f32 %v684_v4, %v1996_v47  ;;  %v910_v7 = vsel %vm126_vm1, %v905_v38, 0 }
 0x57c   :  { %919 = vmatpush.bf16.xpose.msra.mxu2 %v910_v7 }
 0x57d   :  { %v1598_v9 = vpop.eup %1597  ;;  %v688_v10 = vadd.f32 1e-05, %v686_v5 }
 0x57e   :  { %v690_v13 = vmul.f32 %v1598_v9, %v687_v0  ;;  %vm696_vm8 = vweird.f32 %v1598_v9 }
 0x57f   :  { %1599 = vrsqrt.f32 %v688_v10  ;;  %vm697_vm10 = vmor %vm695_vm9, %vm696_vm8  ;;  %vm705_vm12 = vweird.f32 %v688_v10 }
 0x580   :  { %v691_v16 = vmul.f32 %v1598_v9, %v690_v13 }
 0x582   :  { %v692_v18 = vmul.f32 0.5, %v691_v16  ;;  %v1154_v54 = vpop.permute.xlu2 %1153 }
 0x583   :  { %v1159_v12 = vsel %vm126_vm1, %v1154_v54, 0 }
 0x584   :  { %v693_v20 = vsub.f32 1.5, %v692_v18 }
 0x585   :  { %v1600_v22 = vpop.eup %1599 }
 0x586   :  { %v694_v23 = vmul.f32 %v1598_v9, %v693_v20  ;;  %v700_v24 = vmul.f32 %v1600_v22, %v688_v10  ;;  %vm706_vm11 = vweird.f32 %v1600_v22 }
 0x587   :  { %vm707_vm13 = vmor %vm705_vm12, %vm706_vm11 }
 0x588   :  { %v701_v25 = vmul.f32 %v1600_v22, %v700_v24  ;;  %v698_v15 = vsel %vm697_vm10, %v1598_v9, %v694_v23 }
 0x589   :  { %v709_v29 = vmul.f32 %v698_v15, %v675_v50 }
 0x58a   :  { %v702_v26 = vmul.f32 0.5, %v701_v25 }
 0x58b   :  { %v714_v33 = vmul.f32 %v1552_v28, %v709_v29 }
 0x58c   :  { %v703_v27 = vsub.f32 1.5, %v702_v26  ;;  %v842_v40 = vpop.permute.xlu0 %841 }
 0x58d   :  { %v2039_v36 = vadd.f32 %v1553_v32, %v714_v33  ;;  %v847_v41 = vsel %vm126_vm1, %v842_v40, 0 }
 0x58e   :  { %v704_v30 = vmul.f32 %v1600_v22, %v703_v27  ;;  %856 = vmatpush.bf16.xpose.msrb.mxu1 %v847_v41 }
 0x590   :  { %v708_v31 = vsel %vm707_vm13, %v1600_v22, %v704_v30 }
 0x591   :  { %v710_v34 = vmul.f32 %v708_v31, %v676_v55 }
 0x593   :  { %v715_v35 = vmul.f32 %v1552_v28, %v710_v34  ;;  %v1050_v34 = vperm.slane %v778_v58, 1 }
 0x594   :  { %v968_v50 = vpop.permute.xlu0 %967 }
 0x595   :  { %v2041_v37 = vadd.f32 %v1553_v32, %v715_v35  ;;  %v973_v51 = vsel %vm126_vm1, %v968_v50, 0 }
 0x597   :  { %v725_v6 = vpack.c.bf16 %v2041_v37, %v2039_v36 }
 0x599   :  { %1513 = vmatmul.msk.bf16.vlgmr.msra.gmra.mxu1 %vm93_vm0, %v725_v6 }
 0x59a   :  { %982 = vmatpush.bf16.xpose.msra.mxu1 %v973_v51 }
 0x616   :  { %v744_v42 = vpop.f32.mrf.mxu1 }
 0x617   :  { %v745_v43 = vadd.f32 %v1555_v39, %v744_v42 }
 0x619   :  { %v779_v44 = vpack.c.bf16 %v745_v43, %v745_v43 }
 0x61b   :  { %965 = vrot.lane.b32.xlu0 %v779_v44, %s1641_s27  ;;  %839 = vrot.lane.b32.xlu1 %v779_v44, %s1642_s28 }
 0x61c   :  { %1515 = vmatmul.msk.bf16.vlgmr.msrb.gmra.mxu2 %vm126_vm1, %v779_v44 }
 0x61d   :  { %1043 = vmatpush.bf16.xpose.msrb.mxu2 %v1034_v45 }
 0x61e   :  { %v746_v46 = vpop.f32.mrf.mxu1 }
 0x61f   :  { %v747_v48 = vadd.f32 %v1555_v39, %v746_v46 }
 0x621   :  { %v1028_v49 = vpack.c.bf16 %v747_v48, %v747_v48 }
 0x623   :  { %1214 = vrot.lane.b32.xlu2 %v1028_v49, %s1641_s27  ;;  %1088 = vrot.lane.b32.xlu0 %v1028_v49, %s1642_s28 }
 0x624   :  { %902 = vrot.lane.b32.xlu1 %v779_v44, %s1647_s9 }
 0x62b   :  { %1151 = vrot.lane.b32.xlu0 %v1028_v49, %s1647_s9  ;;  %s2331_s9 = smov 8  }
 0x62c   :  { %1090 = vrot.lane.b32.xlu1 %v2027_v21, %s1642_s28 }
 0x633   :  { %876 = vrot.lane.b32.xlu0 %v2019_v11, %s1646_s2 }
 0x634   :  { %1216 = vrot.lane.b32.xlu1 %v2027_v21, %s1641_s27  ;;  %s2329_s27 = smov 80  }
 0x67d   :  { %v1215_v10 = vpop.permute.xlu2 %1214 }
 0x68d   :  { %v966_v52 = vpop.permute.xlu0 %965  ;;  %v840_v53 = vpop.permute.xlu1 %839 }
 0x68e   :  { %1517 = vmatmul.msk.bf16.vlgmr.msrb.gmra.mxu1 %vm126_vm1, %v840_v53 }
 0x695   :  { %v1089_v55 = vpop.permute.xlu0 %1088 }
 0x696   :  { %v903_v56 = vpop.permute.xlu1 %902 }
 0x697   :  { %1519 = vmatmul.msk.bf16.vlgmr.msra.gmra.mxu2 %vm126_vm1, %v903_v56 }
 0x698   :  { %1168 = vmatpush.bf16.xpose.msra.mxu2 %v1159_v12 }
 0x69d   :  { %v1152_v59 = vpop.permute.xlu0 %1151 }
 0x69e   :  { %v1091_v60 = vpop.permute.xlu1 %1090  ;;  %1521 = vmatmul.msk.bf16.vlgmr.msra.gmra.mxu1 %vm126_vm1, %v966_v52 }
 0x69f   :  { %v1096_v62 = vsel %vm126_vm1, %v1091_v60, 0  ;;  %v796_v63 = vpop.f32.mrf.mxu2 }
 0x6a0   :  { %v800_v0 = vmul.f32 0.35355338, %v796_v63  ;;  %1105 = vmatpush.bf16.xpose.msrb.mxu1 %v1096_v62 }
 0x6a2   :  { %v802_v1 = vadd.f32 %v801_v61, %v800_v0 }
 0x6a4   :  { %v803_v2 = vsel %vm126_vm1, %v802_v1, -inf }
 0x6a5   :  { %804 = vmax.xlane.f32.xlu0 %v803_v2  ;;  %v877_v3 = vpop.permute.xlu0 %876 }
 0x6a6   :  { %v882_v4 = vsel %vm165_vm3, %v877_v3, 0  ;;  %v1217_v5 = vpop.permute.xlu1 %1216 }
 0x6a7   :  { %v1222_v8 = vsel %vm126_vm1, %v1217_v5, 0  ;;  %v798_v9 = vpop.f32.mrf.mxu2  ;;  %1523 = vmatmul.msk.bf16.vlgmr.msrb.gmra.mxu2 %vm126_vm1, %v1028_v49  ;;  %891 = vmatpush.bf16.msrb.mxu3 %v882_v4 }
 0x6a8   :  { %1231 = vmatpush.bf16.xpose.msra.mxu1 %v1222_v8 }
 0x6ae   :  { %1525 = vmatmul.msk.bf16.vlgmr.msrb.gmra.mxu1 %vm126_vm1, %v1089_v55 }
 0x6b7   :  { %1527 = vmatmul.msk.bf16.vlgmr.msra.gmra.mxu2 %vm126_vm1, %v1152_v59 }
 0x6be   :  { %1529 = vmatmul.msk.bf16.vlgmr.msra.gmra.mxu1 %vm126_vm1, %v1215_v10 }
 0x70b   :  { %v858_v13 = vpop.f32.mrf.mxu1 }
 0x70c   :  { %v862_v14 = vmul.f32 0.35355338, %v858_v13 }
 0x70e   :  { %v863_v16 = vadd.f32 %v862_v14, %v801_v61 }
 0x710   :  { %v864_v17 = vsel %vm126_vm1, %v863_v16, -inf }
 0x711   :  { %865 = vmax.xlane.f32.xlu1 %v864_v17 }
 0x713   :  { %v860_v18 = vpop.f32.mrf.mxu1 }
 0x718   :  { %v805_v19 = vpop.xlane.xlu0 %804 }
 0x719   :  { %v806_v20 = vsub.f32 %v802_v1, %v805_v19 }
 0x71a   :  { %v921_v22 = vpop.f32.mrf.mxu2 }
 0x71b   :  { %v807_v23 = vmul.f32 1.442695, %v806_v20  ;;  %v925_v24 = vmul.f32 0.35355338, %v921_v22  ;;  %v984_v25 = vpop.f32.mrf.mxu1 }
 0x71c   :  { %v988_v15 = vmul.f32 0.35355338, %v984_v25 }
 0x71d   :  { %v926_v26 = vadd.f32 %v925_v24, %v801_v61  ;;  %1601 = vpow2.f32 %v807_v23 }
 0x71e   :  { %v989_v27 = vadd.f32 %v988_v15, %v801_v61 }
 0x71f   :  { %v927_v28 = vsel %vm126_vm1, %v926_v26, -inf }
 0x720   :  { %928 = vmax.xlane.f32.xlu1 %v927_v28  ;;  %v990_v29 = vsel %vm126_vm1, %v989_v27, -inf }
 0x721   :  { %991 = vmax.xlane.f32.xlu2 %v990_v29 }
 0x722   :  { %v923_v30 = vpop.f32.mrf.mxu2 }
 0x723   :  { %v986_v31 = vpop.f32.mrf.mxu1  ;;  %v2085_v32 = vpop.eup %1601 }
 0x724   :  { %v809_v33 = vsel %vm126_vm1, %v2085_v32, 0.0 }
 0x728   :  { %810 = vadd.xlane.f32.xlu1 %v809_v33 }
 0x72a   :  { %v1045_v35 = vpop.f32.mrf.mxu2 }
 0x72b   :  { %v1049_v6 = vmul.f32 0.35355338, %v1045_v35  ;;  %v1107_v38 = vpop.f32.mrf.mxu1 }
 0x72c   :  { %v1111_v7 = vmul.f32 0.35355338, %v1107_v38 }
 0x72d   :  { %v2089_v39 = vadd.f32 %v1050_v34, %v1049_v6 }
 0x72e   :  { %v1112_v40 = vadd.f32 %v1111_v7, %v1050_v34 }
 0x72f   :  { %v1052_v41 = vsel %vm126_vm1, %v2089_v39, -inf }
 0x730   :  { %1053 = vmax.xlane.f32.xlu2 %v1052_v41  ;;  %v1113_v42 = vsel %vm126_vm1, %v1112_v40, -inf }
 0x731   :  { %1114 = vmax.xlane.f32.xlu0 %v1113_v42 }
 0x732   :  { %v1047_v43 = vpop.f32.mrf.mxu2 }
 0x733   :  { %v1109_v44 = vpop.f32.mrf.mxu1 }
 0x73a   :  { %v1170_v45 = vpop.f32.mrf.mxu2 }
 0x73b   :  { %v1174_v46 = vmul.f32 0.35355338, %v1170_v45  ;;  %v1233_v48 = vpop.f32.mrf.mxu1 }
 0x73c   :  { %v1237_v49 = vmul.f32 0.35355338, %v1233_v48 }
 0x73d   :  { %v1175_v50 = vadd.f32 %v1174_v46, %v1050_v34 }
 0x73e   :  { %v2094_v51 = vadd.f32 %v1237_v49, %v1050_v34 }
 0x73f   :  { %v1176_v52 = vsel %vm126_vm1, %v1175_v50, -inf }
 0x740   :  { %1177 = vmax.xlane.f32.xlu2 %v1176_v52  ;;  %v1239_v53 = vsel %vm126_vm1, %v2094_v51, -inf }
 0x741   :  { %1240 = vmax.xlane.f32.xlu1 %v1239_v53 }
 0x742   :  { %v1172_v54 = vpop.f32.mrf.mxu2 }
 0x743   :  { %v1235_v55 = vpop.f32.mrf.mxu1 }
 0x758   :  { %816 = vrot.lane.b32.xlu2 %v2019_v11, %s2328_s3 }
 0x75a   :  { %939 = vrot.lane.b32.xlu1 %v2019_v11, %s2329_s27 }
 0x762   :  { %1125 = vrot.lane.b32.xlu1 %v2027_v21, %s1646_s2  ;;  %s2330_s2 = smov 72  }
 0x784   :  { %v866_v56 = vpop.xlane.xlu1 %865 }
 0x785   :  { %v867_v12 = vsub.f32 %v863_v16, %v866_v56 }
 0x787   :  { %v868_v57 = vmul.f32 1.442695, %v867_v12 }
 0x789   :  { %1603 = vpow2.f32 %v868_v57 }
 0x78f   :  { %v2105_v58 = vpop.eup %1603 }
 0x790   :  { %v870_v59 = vsel %vm126_vm1, %v2105_v58, 0.0 }
 0x791   :  { %871 = vadd.xlane.f32.xlu0 %v870_v59 }
 0x793   :  { %v929_v60 = vpop.xlane.xlu1 %928 }
 0x794   :  { %v930_v61 = vsub.f32 %v926_v26, %v929_v60  ;;  %v992_v62 = vpop.xlane.xlu2 %991 }
 0x795   :  { %v993_v0 = vsub.f32 %v989_v27, %v992_v62 }
 0x796   :  { %v931_v63 = vmul.f32 1.442695, %v930_v61 }
 0x797   :  { %v994_v1 = vmul.f32 1.442695, %v993_v0 }
 0x798   :  { %1605 = vpow2.f32 %v931_v63 }
 0x799   :  { %1607 = vpow2.f32 %v994_v1 }
 0x79b   :  { %v811_v14 = vpop.xlane.xlu1 %810 }
 0x79e   :  { %v2109_v2 = vpop.eup %1605 }
 0x79f   :  { %v933_v3 = vsel %vm126_vm1, %v2109_v2, 0.0  ;;  %v2113_v4 = vpop.eup %1607 }
 0x7a0   :  { %934 = vadd.xlane.f32.xlu1 %v933_v3  ;;  %v996_v10 = vsel %vm126_vm1, %v2113_v4, 0.0 }
 0x7a3   :  { %v1054_v13 = vpop.xlane.xlu2 %1053 }
 0x7a4   :  { %v1115_v5 = vpop.xlane.xlu0 %1114  ;;  %v1055_v25 = vsub.f32 %v2089_v39, %v1054_v13 }
 0x7a5   :  { %v1116_v8 = vsub.f32 %v1112_v40, %v1115_v5  ;;  %1002 = vrot.lane.b32.xlu0 %v2019_v11, %s2330_s2 }
 0x7a6   :  { %v1056_v28 = vmul.f32 1.442695, %v1055_v25 }
 0x7a7   :  { %v1117_v9 = vmul.f32 1.442695, %v1116_v8 }
 0x7a8   :  { %997 = vadd.xlane.f32.xlu1 %v996_v10 }
 0x7a9   :  { %1609 = vpow2.f32 %v1117_v9 }
 0x7aa   :  { %1611 = vrcp.f32 %v811_v14 }
 0x7af   :  { %v2119_v16 = vpop.eup %1609 }
 0x7b0   :  { %v1119_v17 = vsel %vm126_vm1, %v2119_v16, 0.0  ;;  %v1612_v22 = vpop.eup %1611 }
 0x7b1   :  { %1120 = vadd.xlane.f32.xlu2 %v1119_v17  ;;  %v813_v11 = vmul.f32 %v1612_v22, %v2085_v32 }
 0x7b3   :  { %v1178_v18 = vpop.xlane.xlu2 %1177  ;;  %v814_v26 = vpack.c.bf16 %v813_v11, %v813_v11 }
 0x7b4   :  { %v1179_v19 = vsub.f32 %v1175_v50, %v1178_v18  ;;  %v1241_v29 = vpop.xlane.xlu1 %1240 }
 0x7b5   :  { %v1242_v34 = vsub.f32 %v2094_v51, %v1241_v29 }
 0x7b6   :  { %v1180_v20 = vmul.f32 1.442695, %v1179_v19 }
 0x7b7   :  { %v1243_v35 = vmul.f32 1.442695, %v1242_v34  ;;  %v1281_v34 = vld [vmem:[%s2284_s14 + $0x10] sm:$0xff] }
 0x7b8   :  { %1613 = vpow2.f32 %v1180_v20 }
 0x7b9   :  { %1615 = vpow2.f32 %v1056_v28 }
 0x7ba   :  { %1617 = vpow2.f32 %v1243_v35  ;;  %v1282_v35 = vld [vmem:[%s2284_s14 + $0x18] sm:$0xff] }
 0x7bb   :  { %v817_v23 = vpop.permute.xlu2 %816 }
 0x7bc   :  { %v822_v24 = vsel %vm165_vm3, %v817_v23, 0 }
 0x7bd   :  { %831 = vmatpush.bf16.msrb.mxu0 %v822_v24 }
 0x7be   :  { %v2126_v15 = vpop.eup %1613 }
 0x7bf   :  { %v1182_v27 = vsel %vm126_vm1, %v2126_v15, 0.0  ;;  %v1616_v30 = vpop.eup %1615 }
 0x7c0   :  { %1183 = vadd.xlane.f32.xlu2 %v1182_v27  ;;  %1516 = vmatmul.msk.bf16.vlgmr.msrb.gmra.mxu0 %vm126_vm1, %v814_v26  ;;  %v1058_v33 = vsel %vm126_vm1, %v1616_v30, 0.0  ;;  %v1618_v6 = vpop.eup %1617 }
 0x7c1   :  { %1065 = vrot.lane.b32.xlu1 %v2027_v21, %s2328_s3  ;;  %v1245_v38 = vsel %vm126_vm1, %v1618_v6, 0.0 }
 0x7cc   :  { %v940_v31 = vpop.permute.xlu1 %939 }
 0x7cd   :  { %v945_v32 = vsel %vm165_vm3, %v940_v31, 0 }
 0x7ce   :  { %954 = vmatpush.bf16.msra.mxu0 %v945_v32 }
 0x7cf   :  { %1059 = vadd.xlane.f32.xlu0 %v1058_v33 }
 0x7d4   :  { %v1126_v40 = vpop.permute.xlu1 %1125 }
 0x7d8   :  { %1188 = vrot.lane.b32.xlu2 %v2027_v21, %s2329_s27 }
 0x7e3   :  { %1251 = vrot.lane.b32.xlu0 %v2027_v21, %s2330_s2  ;;  %v1131_v21 = vsel %vm165_vm3, %v1126_v40, 0 }
 0x7eb   :  { %1246 = vadd.xlane.f32.xlu1 %v1245_v38 }
 0x804   :  { %v872_v7 = vpop.xlane.xlu0 %871 }
 0x805   :  { %1619 = vrcp.f32 %v872_v7  ;;  %v1279_v7 = vld [vmem:[%s2284_s14] sm:$0xff] }
 0x80b   :  { %v1620_v39 = vpop.eup %1619 }
 0x80c   :  { %v874_v41 = vmul.f32 %v1620_v39, %v2105_v58  ;;  %v1280_v39 = vld [vmem:[%s2284_s14 + $0x8] sm:$0xff] }
 0x80d   :  { %v1284_v40 = vpack.c.bf16 %v1280_v39, %v1279_v7  ;;  %v1402_v7 = vld [vmem:[%s2290_s20 + $0x38] sm:$0xff] }
 0x80e   :  { %v875_v42 = vpack.c.bf16 %v874_v41, %v874_v41 }
 0x810   :  { %1518 = vmatmul.msk.bf16.vlgmr.msrb.gmra.mxu3 %vm126_vm1, %v875_v42 }
 0x813   :  { %v935_v43 = vpop.xlane.xlu1 %934 }
 0x814   :  { %1621 = vrcp.f32 %v935_v43 }
 0x817   :  { %v1003_v44 = vpop.permute.xlu0 %1002 }
 0x818   :  { %v1008_v45 = vsel %vm165_vm3, %v1003_v44, 0 }
 0x819   :  { %1017 = vmatpush.bf16.msra.mxu3 %v1008_v45 }
 0x81a   :  { %v1622_v46 = vpop.eup %1621 }
 0x81b   :  { %v937_v48 = vmul.f32 %v1622_v46, %v2109_v2  ;;  %v998_v49 = vpop.xlane.xlu1 %997 }
 0x81c   :  { %1623 = vrcp.f32 %v998_v49 }
 0x81d   :  { %1140 = vmatpush.bf16.msrb.mxu3 %v1131_v21  ;;  %v938_v50 = vpack.c.bf16 %v937_v48, %v937_v48  ;;  %v1556_v21 = vld [vmem:[%s2283_s15] ss:$0 sm:$0xff] }
 0x81f   :  { %1520 = vmatmul.msk.bf16.vlgmr.msra.gmra.mxu0 %vm126_vm1, %v938_v50 }
 0x822   :  { %v1624_v51 = vpop.eup %1623 }
 0x823   :  { %v1000_v52 = vmul.f32 %v1624_v51, %v2113_v4 }
 0x824   :  { %v1121_v54 = vpop.xlane.xlu2 %1120 }
 0x825   :  { %v1001_v53 = vpack.c.bf16 %v1000_v52, %v1000_v52  ;;  %1625 = vrcp.f32 %v1121_v54 }
 0x827   :  { %1522 = vmatmul.msk.bf16.vlgmr.msra.gmra.mxu3 %vm126_vm1, %v1001_v53 }
 0x82b   :  { %v1626_v55 = vpop.eup %1625 }
 0x82c   :  { %v1123_v56 = vmul.f32 %v1626_v55, %v2119_v16 }
 0x82e   :  { %v1124_v59 = vpack.c.bf16 %v1123_v56, %v1123_v56 }
 0x833   :  { %v1066_v12 = vpop.permute.xlu1 %1065  ;;  %v1184_v57 = vpop.xlane.xlu2 %1183 }
 0x834   :  { %v1071_v58 = vsel %vm165_vm3, %v1066_v12, 0 }
 0x835   :  { %1080 = vmatpush.bf16.msrb.mxu0 %v1071_v58 }
 0x837   :  { %1526 = vmatmul.msk.bf16.vlgmr.msrb.gmra.mxu3 %vm126_vm1, %v1124_v59 }
 0x83b   :  { %v1189_v60 = vpop.permute.xlu2 %1188 }
 0x83c   :  { %v1194_v61 = vsel %vm165_vm3, %v1189_v60, 0 }
 0x83d   :  { %v833_v62 = vpop.f32.mrf.mxu0  ;;  %1203 = vmatpush.bf16.msra.mxu0 %v1194_v61 }
 0x83e   :  { %837 = vst.msk [vmem:[#allocation2] sm:$0xff] %vm126_vm1, %v833_v62 }
 0x842   :  { %v1060_v63 = vpop.xlane.xlu0 %1059 }
 0x843   :  { %1627 = vrcp.f32 %v1060_v63  ;;  %v1368_v63 = vld [vmem:[%s2288_s18 + $0x18] sm:$0xff] }
 0x844   :  { %1629 = vrcp.f32 %v1184_v57 }
 0x845   :  { %v835_v0 = vpop.f32.mrf.mxu0 }
 0x849   :  { %v1628_v1 = vpop.eup %1627 }
 0x84a   :  { %v1062_v2 = vmul.f32 %v1628_v1, %v1616_v30  ;;  %v1630_v4 = vpop.eup %1629 }
 0x84b   :  { %v1186_v9 = vmul.f32 %v1630_v4, %v2126_v15  ;;  %v1365_v4 = vld [vmem:[%s2288_s18] sm:$0xff] }
 0x84c   :  { %v1063_v3 = vpack.c.bf16 %v1062_v2, %v1062_v2 }
 0x84d   :  { %v1187_v10 = vpack.c.bf16 %v1186_v9, %v1186_v9 }
 0x84e   :  { %1524 = vmatmul.msk.bf16.vlgmr.msrb.gmra.mxu0 %vm126_vm1, %v1063_v3 }
 0x855   :  { %v1252_v5 = vpop.permute.xlu0 %1251 }
 0x856   :  { %v1257_v8 = vsel %vm165_vm3, %v1252_v5, 0  ;;  %v1366_v5 = vld [vmem:[%s2288_s18 + $0x8] sm:$0xff] }
 0x857   :  { %1266 = vmatpush.bf16.msra.mxu3 %v1257_v8  ;;  %v1370_v8 = vpack.c.bf16 %v1366_v5, %v1365_v4 }
 0x85e   :  { %v1247_v13 = vpop.xlane.xlu1 %1246  ;;  %1528 = vmatmul.msk.bf16.vlgmr.msra.gmra.mxu0 %vm126_vm1, %v1187_v10 }
 0x85f   :  { %1631 = vrcp.f32 %v1247_v13 }
 0x865   :  { %v1632_v14 = vpop.eup %1631 }
 0x866   :  { %v1249_v16 = vmul.f32 %v1632_v14, %v1618_v6  ;;  %v1285_v6 = vpack.c.bf16 %v1282_v35, %v1281_v34 }
 0x868   :  { %v1250_v17 = vpack.c.bf16 %v1249_v16, %v1249_v16  ;;  %1299 = vmatpush.bf16.msrb.mxu2 %v1285_v6 }
 0x86a   :  { %1530 = vmatmul.msk.bf16.vlgmr.msra.gmra.mxu3 %vm126_vm1, %v1250_v17 }
 0x86c   :  { %1300 = vmatpush.bf16.msrb.mxu2 %v1284_v40  ;;  %v1399_v40 = vld [vmem:[%s2290_s20 + $0x20] sm:$0xff] }
 0x893   :  { %v893_v18 = vpop.f32.mrf.mxu3 }
 0x894   :  { %898 = vrot.lane.b32.xlu0 %v893_v18, %s2331_s9 }
 0x89b   :  { %v895_v19 = vpop.f32.mrf.mxu3 }
 0x89c   :  { %v956_v20 = vpop.f32.mrf.mxu0 }
 0x89d   :  { %961 = vrot.lane.b32.xlu2 %v956_v20, %s2332_s7 }
 0x8a4   :  { %v958_v22 = vpop.f32.mrf.mxu0 }
 0x8aa   :  { %v1019_v11 = vpop.f32.mrf.mxu3 }
 0x8ab   :  { %1024 = vrot.lane.b32.xlu1 %v1019_v11, %s2333_s0 }
 0x8b2   :  { %v1021_v23 = vpop.f32.mrf.mxu3 }
 0x8ba   :  { %v1142_v24 = vpop.f32.mrf.mxu3 }
 0x8bb   :  { %1147 = vrot.lane.b32.xlu0 %v1142_v24, %s2331_s9 }
 0x8c2   :  { %v1144_v25 = vpop.f32.mrf.mxu3 }
 0x8cb   :  { %v1082_v15 = vpop.f32.mrf.mxu0 }
 0x8cc   :  { %1086 = vst.msk [vmem:[#allocation2 + $0x8] sm:$0xff] %vm126_vm1, %v1082_v15 }
 0x8d3   :  { %v1084_v26 = vpop.f32.mrf.mxu0 }
 0x8d4   :  { %v1557_v26 = vld [vmem:[%s2285_s16] ss:$0 sm:$0xff] }
 0x8db   :  { %v1205_v27 = vpop.f32.mrf.mxu0 }
 0x8dc   :  { %1210 = vrot.lane.b32.xlu0 %v1205_v27, %s2332_s7 }
 0x8e3   :  { %v1207_v28 = vpop.f32.mrf.mxu0 }
 0x8ed   :  { %v1268_v29 = vpop.f32.mrf.mxu3 }
 0x8ee   :  { %1273 = vrot.lane.b32.xlu2 %v1268_v29, %s2333_s0 }
 0x8f5   :  { %v1270_v30 = vpop.f32.mrf.mxu3 }
 0x8f6   :  { %v1558_v30 = vld [vmem:[%s2286_s17] ss:$0 sm:$0xff] }
 0x8f7   :  { %v962_v32 = vpop.permute.xlu2 %961 }
 0x906   :  { %v899_v31 = vpop.permute.xlu0 %898 }
 0x907   :  { %901 = vst.msk [vmem:[#allocation2] sm:$0xff] %vm245_vm4, %v899_v31 }
 0x908   :  { %964 = vst.msk [vmem:[#allocation2] sm:$0xff] %vm309_vm5, %v962_v32 }
 0x91d   :  { %v1025_v33 = vpop.permute.xlu1 %1024 }
 0x91e   :  { %1027 = vst.msk [vmem:[#allocation2] sm:$0xff] %vm373_vm6, %v1025_v33 }
 0x925   :  { %v1277_v43 = vld [vmem:[#allocation2] sm:$0xff] }
 0x92d   :  { %v1148_v38 = vpop.permute.xlu0 %1147 }
 0x92e   :  { %1150 = vst.msk [vmem:[#allocation2 + $0x8] sm:$0xff] %vm245_vm4, %v1148_v38  ;;  %v1401_v38 = vld [vmem:[%s2290_s20 + $0x30] sm:$0xff] }
 0x92f   :  { %v1407_v39 = vpack.c.bf16 %v1402_v7, %v1401_v38 }
 0x931   :  { %1420 = vmatpush.bf16.msrb.mxu1 %v1407_v39 }
 0x948   :  { %v1274_v42 = vpop.permute.xlu2 %1273 }
 0x94e   :  { %v1211_v41 = vpop.permute.xlu0 %1210 }
 0x94f   :  { %1213 = vst.msk [vmem:[#allocation2 + $0x8] sm:$0xff] %vm309_vm5, %v1211_v41  ;;  %v1400_v41 = vld [vmem:[%s2290_s20 + $0x28] sm:$0xff]  ;;  %vm1412_vm5 = vcmask 523264  }
 0x950   :  { %1276 = vst.msk [vmem:[#allocation2 + $0x8] sm:$0xff] %vm373_vm6, %v1274_v42  ;;  %v1406_v42 = vpack.c.bf16 %v1400_v41, %v1399_v40 }
 0x952   :  { %1421 = vmatpush.bf16.msrb.mxu1 %v1406_v42 }
 0x957   :  { %v1278_v44 = vld [vmem:[#allocation2 + $0x8] sm:$0xff] }
 0x958   :  { %v1283_v45 = vpack.c.bf16 %v1278_v44, %v1277_v43  ;;  %v1397_v43 = vld [vmem:[%s2290_s20 + $0x10] sm:$0xff]  ;;  %v1398_v44 = vld [vmem:[%s2290_s20 + $0x18] sm:$0xff] }
 0x95a   :  { %1531 = vmatmul.msk.bf16.vlgmr.msrb.gmra.mxu2 %vm93_vm0, %v1283_v45  ;;  %v1405_v45 = vpack.c.bf16 %v1398_v44, %v1397_v43 }
 0x95c   :  { %1422 = vmatpush.bf16.msrb.mxu1 %v1405_v45 }
 0x9dd   :  { %v1302_v46 = vpop.f32.mrf.mxu2 }
 0x9de   :  { %v1303_v48 = vadd.f32 %v1556_v21, %v1302_v46  ;;  %v1396_v46 = vld [vmem:[%s2290_s20 + $0x8] sm:$0xff] }
 0x9e0   :  { %v1309_v49 = vadd.f32 %v1303_v48, %v2039_v36 }
 0x9e2   :  { %v1311_v50 = vsel %vm93_vm0, %v1309_v49, 0.0 }
 0x9e3   :  { %1312 = vadd.xlane.f32.xlu0 %v1311_v50  ;;  %v1559_v50 = vld [vmem:[%s2287_s19] ss:$0 sm:$0xff] }
 0x9e5   :  { %v1304_v51 = vpop.f32.mrf.mxu2 }
 0x9e6   :  { %v1305_v52 = vadd.f32 %v1556_v21, %v1304_v51  ;;  %v1395_v21 = vld [vmem:[%s2290_s20] sm:$0xff] }
 0x9e7   :  { %v1404_v48 = vpack.c.bf16 %v1396_v46, %v1395_v21 }
 0x9e8   :  { %v1310_v53 = vadd.f32 %v1305_v52, %v2041_v37  ;;  %v1367_v37 = vld [vmem:[%s2288_s18 + $0x10] sm:$0xff] }
 0x9e9   :  { %v1371_v1 = vpack.c.bf16 %v1368_v63, %v1367_v37  ;;  %1423 = vmatpush.bf16.msrb.mxu1 %v1404_v48 }
 0x9ea   :  { %v1314_v54 = vsel %vm93_vm0, %v1310_v53, 0.0 }
 0x9eb   :  { %1315 = vadd.xlane.f32.xlu2 %v1314_v54  ;;  %1385 = vmatpush.bf16.msrb.mxu0 %v1371_v1 }
 0x9ef   :  { %1386 = vmatpush.bf16.msrb.mxu0 %v1370_v8 }
 0xa56   :  { %v1313_v55 = vpop.xlane.xlu0 %1312 }
 0xa57   :  { %v1317_v56 = vmul.f32 %v1313_v55, %v1996_v47 }
 0xa59   :  { %v1319_v12 = vsub.f32 %v1309_v49, %v1317_v56 }
 0xa5b   :  { %v1321_v57 = vmul.f32 %v1319_v12, %v1319_v12 }
 0xa5d   :  { %v1323_v58 = vsel %vm93_vm0, %v1321_v57, 0.0 }
 0xa5e   :  { %v1316_v59 = vpop.xlane.xlu2 %1315  ;;  %1324 = vadd.xlane.f32.xlu1 %v1323_v58 }
 0xa5f   :  { %v1318_v36 = vmul.f32 %v1316_v59, %v1996_v47 }
 0xa61   :  { %v1320_v60 = vsub.f32 %v1310_v53, %v1318_v36 }
 0xa63   :  { %v1322_v61 = vmul.f32 %v1320_v60, %v1320_v60 }
 0xa65   :  { %v1326_v62 = vsel %vm93_vm0, %v1322_v61, 0.0 }
 0xa66   :  { %1327 = vadd.xlane.f32.xlu2 %v1326_v62 }
 0xad1   :  { %v1325_v0 = vpop.xlane.xlu1 %1324 }
 0xad2   :  { %v1329_v2 = vmul.f32 %v1325_v0, %v1996_v47 }
 0xad4   :  { %v1331_v3 = vadd.f32 1e-05, %v1329_v2 }
 0xad6   :  { %1633 = vrsqrt.f32 %v1331_v3  ;;  %vm1339_vm15 = vweird.f32 %v1331_v3 }
 0xad9   :  { %v1328_v9 = vpop.xlane.xlu2 %1327 }
 0xada   :  { %v1330_v10 = vmul.f32 %v1328_v9, %v1996_v47 }
 0xadc   :  { %v1634_v13 = vpop.eup %1633  ;;  %v1332_v14 = vadd.f32 1e-05, %v1330_v10 }
 0xadd   :  { %v1334_v16 = vmul.f32 %v1634_v13, %v1331_v3  ;;  %vm1340_vm14 = vweird.f32 %v1634_v13 }
 0xade   :  { %1635 = vrsqrt.f32 %v1332_v14  ;;  %vm1341_vm1 = vmor %vm1339_vm15, %vm1340_vm14  ;;  %vm1349_vm3 = vweird.f32 %v1332_v14 }
 0xadf   :  { %v1335_v17 = vmul.f32 %v1634_v13, %v1334_v16 }
 0xae1   :  { %v1336_v18 = vmul.f32 0.5, %v1335_v17 }
 0xae3   :  { %v1337_v19 = vsub.f32 1.5, %v1336_v18 }
 0xae4   :  { %v1636_v20 = vpop.eup %1635 }
 0xae5   :  { %v1338_v22 = vmul.f32 %v1634_v13, %v1337_v19  ;;  %v1344_v11 = vmul.f32 %v1636_v20, %v1332_v14  ;;  %vm1350_vm2 = vweird.f32 %v1636_v20 }
 0xae6   :  { %vm1351_vm4 = vmor %vm1349_vm3, %vm1350_vm2 }
 0xae7   :  { %v1345_v23 = vmul.f32 %v1636_v20, %v1344_v11  ;;  %v1342_v24 = vsel %vm1341_vm1, %v1634_v13, %v1338_v22 }
 0xae8   :  { %v1353_v27 = vmul.f32 %v1342_v24, %v1319_v12  ;;  %v1560_v12 = vld [vmem:[%s2289_s21] ss:$0 sm:$0xff] }
 0xae9   :  { %v1346_v25 = vmul.f32 0.5, %v1345_v23 }
 0xaea   :  { %v1358_v31 = vmul.f32 %v1557_v26, %v1353_v27  ;;  %v1561_v27 = vld [vmem:[%s2291_s22] ss:$0 sm:$0xff] }
 0xaeb   :  { %v1347_v15 = vsub.f32 1.5, %v1346_v25 }
 0xaec   :  { %v1363_v34 = vadd.f32 %v1558_v30, %v1358_v31 }
 0xaed   :  { %v1348_v28 = vmul.f32 %v1636_v20, %v1347_v15 }
 0xaef   :  { %v1352_v29 = vsel %vm1351_vm4, %v1636_v20, %v1348_v28 }
 0xaf0   :  { %v1354_v32 = vmul.f32 %v1352_v29, %v1320_v60 }
 0xaf2   :  { %v1359_v33 = vmul.f32 %v1557_v26, %v1354_v32 }
 0xaf4   :  { %v1364_v35 = vadd.f32 %v1558_v30, %v1359_v33 }
 0xaf6   :  { %v1369_v6 = vpack.c.bf16 %v1364_v35, %v1363_v34 }
 0xaf8   :  { %1532 = vmatmul.msk.bf16.vlgmr.msrb.gmra.mxu0 %vm93_vm0, %v1369_v6 }
 0xb75   :  { %v1388_v49 = vpop.f32.mrf.mxu0 }
 0xb76   :  { %v1389_v51 = vadd.f32 %v1559_v50, %v1388_v49 }
 0xb78   :  { %v1393_v54 = vmax.f32 %v1389_v51, 0.0 }
 0xb7d   :  { %v1390_v52 = vpop.f32.mrf.mxu0 }
 0xb7e   :  { %v1391_v53 = vadd.f32 %v1559_v50, %v1390_v52 }
 0xb80   :  { %v1394_v55 = vmax.f32 %v1391_v53, 0.0 }
 0xb82   :  { %v1403_v56 = vpack.c.bf16 %v1394_v55, %v1393_v54 }
 0xb84   :  { %1533 = vmatmul.msk.bf16.vlgmr.msrb.gmra.mxu1 %vm1412_vm5, %v1403_v56 }
 0xc01   :  { %v1425_v57 = vpop.f32.mrf.mxu1 }
 0xc02   :  { %v1426_v58 = vadd.f32 %v1560_v12, %v1425_v57 }
 0xc04   :  { %v1432_v59 = vadd.f32 %v1426_v58, %v1363_v34 }
 0xc06   :  { %v1434_v36 = vsel %vm93_vm0, %v1432_v59, 0.0 }
 0xc07   :  { %1435 = vadd.xlane.f32.xlu0 %v1434_v36 }
 0xc09   :  { %v1427_v60 = vpop.f32.mrf.mxu1 }
 0xc0a   :  { %v1428_v61 = vadd.f32 %v1560_v12, %v1427_v60 }
 0xc0c   :  { %v1433_v62 = vadd.f32 %v1428_v61, %v1364_v35 }
 0xc0e   :  { %v1437_v37 = vsel %vm93_vm0, %v1433_v62, 0.0 }
 0xc0f   :  { %1438 = vadd.xlane.f32.xlu2 %v1437_v37 }
 0xc7a   :  { %v1436_v63 = vpop.xlane.xlu0 %1435 }
 0xc7b   :  { %v1440_v0 = vmul.f32 %v1436_v63, %v1996_v47 }
 0xc7d   :  { %v1442_v1 = vsub.f32 %v1432_v59, %v1440_v0 }
 0xc7f   :  { %v1444_v2 = vmul.f32 %v1442_v1, %v1442_v1 }
 0xc81   :  { %v1446_v3 = vsel %vm93_vm0, %v1444_v2, 0.0 }
 0xc82   :  { %v1439_v4 = vpop.xlane.xlu2 %1438  ;;  %1447 = vadd.xlane.f32.xlu0 %v1446_v3 }
 0xc83   :  { %v1441_v5 = vmul.f32 %v1439_v4, %v1996_v47 }
 0xc85   :  { %v1443_v8 = vsub.f32 %v1433_v62, %v1441_v5 }
 0xc87   :  { %v1445_v9 = vmul.f32 %v1443_v8, %v1443_v8 }
 0xc89   :  { %v1449_v10 = vsel %vm93_vm0, %v1445_v9, 0.0 }
 0xc8a   :  { %1450 = vadd.xlane.f32.xlu2 %v1449_v10 }
 0xcf5   :  { %v1448_v13 = vpop.xlane.xlu0 %1447 }
 0xcf6   :  { %v1452_v14 = vmul.f32 %v1448_v13, %v1996_v47 }
 0xcf8   :  { %v1454_v16 = vadd.f32 1e-05, %v1452_v14 }
 0xcfa   :  { %1637 = vrsqrt.f32 %v1454_v16  ;;  %vm1462_vm7 = vweird.f32 %v1454_v16 }
 0xcfd   :  { %v1451_v17 = vpop.xlane.xlu2 %1450 }
 0xcfe   :  { %v1453_v18 = vmul.f32 %v1451_v17, %v1996_v47  ;;  %v1562_v47 = vld [vmem:[%s2292_s23] ss:$0 sm:$0xff] }
 0xd00   :  { %v1638_v19 = vpop.eup %1637  ;;  %v1455_v20 = vadd.f32 1e-05, %v1453_v18 }
 0xd01   :  { %v1457_v22 = vmul.f32 %v1638_v19, %v1454_v16  ;;  %vm1463_vm6 = vweird.f32 %v1638_v19 }
 0xd02   :  { %1639 = vrsqrt.f32 %v1455_v20  ;;  %vm1464_vm8 = vmor %vm1462_vm7, %vm1463_vm6  ;;  %vm1472_vm10 = vweird.f32 %v1455_v20 }
 0xd03   :  { %v1458_v11 = vmul.f32 %v1638_v19, %v1457_v22 }
 0xd05   :  { %v1459_v23 = vmul.f32 0.5, %v1458_v11 }
 0xd07   :  { %v1460_v24 = vsub.f32 1.5, %v1459_v23 }
 0xd08   :  { %v1640_v25 = vpop.eup %1639 }
 0xd09   :  { %v1461_v15 = vmul.f32 %v1638_v19, %v1460_v24  ;;  %v1467_v26 = vmul.f32 %v1640_v25, %v1455_v20  ;;  %vm1473_vm9 = vweird.f32 %v1640_v25 }
 0xd0a   :  { %vm1474_vm11 = vmor %vm1472_vm10, %vm1473_vm9 }
 0xd0b   :  { %v1465_v28 = vsel %vm1464_vm8, %v1638_v19, %v1461_v15  ;;  %v1468_v29 = vmul.f32 %v1640_v25, %v1467_v26 }
 0xd0c   :  { %v1476_v30 = vmul.f32 %v1465_v28, %v1442_v1 }
 0xd0d   :  { %v1469_v31 = vmul.f32 0.5, %v1468_v29 }
 0xd0e   :  { %v1481_v32 = vmul.f32 %v1561_v27, %v1476_v30 }
 0xd0f   :  { %v1470_v33 = vsub.f32 1.5, %v1469_v31 }
 0xd10   :  { %v1486_v34 = vadd.f32 %v1562_v47, %v1481_v32 }
 0xd11   :  { %v1471_v35 = vmul.f32 %v1640_v25, %v1470_v33 }
 0xd12   :  { %1488 = vst.msk [vmem:[%s2293_s24] sm:$0xff] %vm93_vm0, %v1486_v34 }
 0xd13   :  { %v1475_v6 = vsel %vm1474_vm11, %v1640_v25, %v1471_v35 }
 0xd14   :  { %v1477_v38 = vmul.f32 %v1475_v6, %v1443_v8 }
 0xd16   :  { %v1482_v7 = vmul.f32 %v1561_v27, %v1477_v38 }
 0xd18   :  { %v1487_v39 = vadd.f32 %v1562_v47, %v1482_v7 }
 0xd1a   :  { %1489 = vst.msk [vmem:[%s2293_s24 + $0x8] sm:$0xff] %vm93_vm0, %v1487_v39 }

</bundles_post_ra>
